<compile_context>
chip_gen: v6e
topology: v6e:2x2x1
jax: 0.10.0
libtpu: 0.0.40
codegen_flags: <defaults>
</compile_context>

<pallas_src>
import jax
import jax.numpy as jnp
from jax import lax
from jax.experimental import pallas as pl
from jax.experimental.pallas import tpu as pltpu


def _largest_divisor(n, cap, multiple=1):
    """Largest d <= cap with n % d == 0 and d % multiple == 0 (None if none)."""
    cap = max(1, min(n, cap))
    for d in range(cap, 0, -1):
        if n % d == 0 and d % multiple == 0:
            return d
    return None


def _make_kernel(H, W, K, PAD, TB, TC, CH, TBE):
    HW = H * W
    KK = K * K
    n_chunks = TC // CH
    w_pow2 = (W & (W - 1)) == 0

    def kernel(x_ref, w_ref, o_ref, sum_ref, max_ref):
        # x_ref:   (TB, TC, HW)  VMEM input block (batch tile, channel tile, spatial)
        # w_ref:   (2*K*K,)      SMEM conv weights, (in_ch, ky, kx) order;
        #                        avg-channel weights pre-scaled by 1/C
        # o_ref:   (TB, HW)      VMEM output block (lane-dense)
        # sum_ref: (TB, CH, HW)  f32 sublane-partial channel-sum accumulator
        # max_ref: (TB, CH, HW)  input-dtype sublane-partial channel-max accumulator
        ci = pl.program_id(1)

        @pl.when(ci == 0)
        def _():
            sum_ref[...] = jnp.zeros_like(sum_ref)
            max_ref[...] = jnp.full_like(max_ref, -jnp.inf)

        # ---- hot loop: pure-VPU partial accumulation over CH-channel chunks ----
        if n_chunks == 1:
            chunk = x_ref[...]
            sum_ref[...] = sum_ref[...] + chunk.astype(jnp.float32)
            max_ref[...] = jnp.maximum(max_ref[...], chunk)
        else:
            def chunk_body(g, carry):
                start = pl.multiple_of(g * CH, CH)
                chunk = x_ref[:, pl.ds(start, CH), :]
                sum_ref[...] = sum_ref[...] + chunk.astype(jnp.float32)
                max_ref[...] = jnp.maximum(max_ref[...], chunk)
                return carry
            lax.fori_loop(0, n_chunks, chunk_body, 0,
                          unroll=True if n_chunks <= 8 else 4)

        # ---- last channel block: one cross-sublane reduce, KxK conv, sigmoid ----
        @pl.when(ci == pl.num_programs(1) - 1)
        def _():
            flat = lax.broadcasted_iota(jnp.int32, (1, HW), 1)
            if w_pow2:
                col = jnp.bitwise_and(flat, W - 1)
            else:
                # Avoid vector integer div/mod; exact via a +/-1 correction.
                row_i = jnp.floor(
                    (flat.astype(jnp.float32) + 0.5) * (1.0 / W)
                ).astype(jnp.int32)
                col = flat - row_i * W
                col = jnp.where(col >= W, col - W, col)
                col = jnp.where(col < 0, col + W, col)

            def row_mask(dy):
                # valid iff 0 <= row(o)+dy < H  <=>  (-dy)*W <= flat < (H-dy)*W
                if dy < 0:
                    return flat >= (-dy) * W
                if dy > 0:
                    return flat < (H - dy) * W
                return None

            def col_mask(dx):
                if dx < 0:
                    return col >= -dx
                if dx > 0:
                    return col < (W - dx)
                return None

            row_ok = [row_mask(ky - PAD) for ky in range(K)]
            col_ok = [col_mask(kx - PAD) for kx in range(K)]

            def conv_rows(start):
                # Single deferred cross-sublane reduce of the partial accumulators.
                s = jnp.sum(sum_ref[pl.ds(start, TBE), :, :], axis=1)       # (TBE, HW) f32
                m = jnp.max(max_ref[pl.ds(start, TBE), :, :],
                            axis=1).astype(jnp.float32)                     # (TBE, HW) f32

                acc = jnp.zeros((TBE, HW), jnp.float32)
                for ky in range(K):
                    dy = ky - PAD
                    for kx in range(K):
                        dx = kx - PAD
                        shift = (-(dy * W + dx)) % HW
                        w_a = w_ref[ky * K + kx]        # avg-channel tap (1/C folded)
                        w_m = w_ref[KK + ky * K + kx]   # max-channel tap
                        combo = w_a * s + w_m * m       # combine BEFORE rolling
                        tap = combo if shift == 0 else pltpu.roll(combo, shift, axis=1)
                        rm, cm = row_ok[ky], col_ok[kx]
                        if rm is None and cm is None:
                            valid = None
                        elif rm is None:
                            valid = cm
                        elif cm is None:
                            valid = rm
                        else:
                            valid = jnp.logical_and(rm, cm)
                        if valid is not None:
                            tap = jnp.where(valid, tap, 0.0)
                        acc = acc + tap

                o_ref[pl.ds(start, TBE), :] = jax.nn.sigmoid(acc).astype(o_ref.dtype)

            if TB == TBE:
                conv_rows(0)
            else:
                # Sub-tile the epilogue in 8-row groups to bound vreg live ranges
                # across the K*K-tap unroll (no spills).
                def row_body(r, carry):
                    conv_rows(pl.multiple_of(r * TBE, TBE))
                    return carry
                lax.fori_loop(0, TB // TBE, row_body, 0)

    return kernel


def spatial_attention(x, w, kernel_size=7):
    """x: (N, C, H, W); w: (1, 2, K, K) conv weight (OIHW, no bias)."""
    N, C, H, W = x.shape
    K = kernel_size
    assert K in (3, 7), "kernel size must be 3 or 7"
    assert w.shape == (1, 2, K, K)
    PAD = 3 if K == 7 else 1
    HW = H * W
    itemsize = jnp.dtype(x.dtype).itemsize

    # Fold 1/C into the avg-channel weights -> kernel accumulates a raw sum.
    w32 = w.astype(jnp.float32)
    w_flat = jnp.concatenate(
        [(w32[0, 0] * (1.0 / C)).reshape(-1), w32[0, 1].reshape(-1)])

    # Lane-dense spatial layout (contiguous reshape, free).
    x_r = x.reshape(N, C, HW)

    # ---- per-generation VMEM / block budgeting ----
    try:
        vmem_cap = int(pltpu.get_tpu_info().vmem_capacity_bytes)
    except Exception:
        vmem_cap = 64 << 20  # conservative (v7x) fallback
    if vmem_cap >= (100 << 20):      # v5e / v6e: 128 MiB physical VMEM
        block_target = 6 << 20       # per-step input block target
        vmem_budget = 80 << 20
    else:                            # v7x: 64 MiB physical VMEM
        block_target = 3 << 20
        vmem_budget = 44 << 20

    # ---- chunk size (sublane depth of the partial accumulators) ----
    if C % 8 != 0:
        CH = C
    else:
        CH = 32 if C % 32 == 0 else (16 if C % 16 == 0 else 8)

    # ---- batch tile ----
    scratch_per_row = CH * HW * (4 + itemsize)   # sum (f32) + max (x dtype)
    tb_cap = N
    if N >= 16:
        tb_cap = N // 2              # >= 2 blocks on the parallel axis (v7x megacore)
    tb_cap = min(tb_cap, 64, max(8, (4 << 20) // max(1, scratch_per_row)))
    if N % 8 == 0:
        TB = _largest_divisor(N, max(8, tb_cap), multiple=8) or N
    else:
        TB = N                       # sublane dim of output block must equal full N
    # Guard scratch size for the (rare) N%8!=0 fallback with large N.
    if C % 8 == 0 and CH > 8 and TB * CH * HW * (4 + itemsize) > (16 << 20):
        CH = 8
    TBE = 8 if (TB > 8 and TB % 8 == 0) else TB

    # ---- channel tile ----
    if C % 8 != 0:
        TC = C
    else:
        tc_cap = max(CH, block_target // max(1, TB * HW * itemsize))
        TC = _largest_divisor(C, tc_cap, multiple=CH) or CH

    grid = (N // TB, C // TC)

    # Tight VMEM estimate: double-buffered IO + scratch + epilogue temporaries.
    vmem_est = (2 * TB * TC * HW * itemsize      # double-buffered input blocks
                + 2 * TB * HW * itemsize         # double-buffered output block
                + TB * CH * HW * 4               # sum scratch (f32)
                + TB * CH * HW * itemsize        # max scratch (x dtype)
                + 8 * TBE * HW * 4)              # epilogue temporaries
    vmem_limit = int(min(vmem_budget, max(16 << 20, int(1.5 * vmem_est))))

    out = pl.pallas_call(
        _make_kernel(H, W, K, PAD, TB, TC, CH, TBE),
        out_shape=jax.ShapeDtypeStruct((N, HW), x.dtype),
        grid=grid,
        in_specs=[
            pl.BlockSpec((TB, TC, HW), lambda b, c: (b, c, 0)),
            pl.BlockSpec(memory_space=pltpu.MemorySpace.SMEM),
        ],
        out_specs=pl.BlockSpec((TB, HW), lambda b, c: (b, 0)),
        scratch_shapes=[
            pltpu.VMEM((TB, CH, HW), jnp.float32),   # partial channel sums
            pltpu.VMEM((TB, CH, HW), x.dtype),       # partial channel maxes
        ],
        compiler_params=pltpu.CompilerParams(
            dimension_semantics=("parallel", "arbitrary"),
            vmem_limit_bytes=vmem_limit,
        ),
    )(x_r, w_flat)

    return out.reshape(N, 1, H, W)


def spatial_attention_reference(x, w, kernel_size=7):
    """Plain-JAX reference mirroring the PyTorch forward."""
    PAD = 3 if kernel_size == 7 else 1
    avg = jnp.mean(x, axis=1, keepdims=True)
    mx = jnp.max(x, axis=1, keepdims=True)
    cat = jnp.concatenate([avg, mx], axis=1)
    out = lax.conv_general_dilated(
        cat, w, window_strides=(1, 1), padding=((PAD, PAD), (PAD, PAD)),
        dimension_numbers=("NCHW", "OIHW", "NCHW"))
    return jax.nn.sigmoid(out)


if __name__ == "__main__":
    key = jax.random.PRNGKey(0)
    kx_, kw_ = jax.random.split(key)

    K = 7
    # Small NCHW input consistent with the module.
    x = jax.random.normal(kx_, (2, 4, 16, 16), dtype=jnp.float32)

    # Deterministic Conv2d(2, 1, 7, bias=False) weight (synthetic kaiming-uniform-ish).
    fan_in = 2 * K * K
    bound = 1.0 / (fan_in ** 0.5)
    w = jax.random.uniform(kw_, (1, 2, K, K), dtype=jnp.float32,
                           minval=-bound, maxval=bound)

    out = spatial_attention(x, w, kernel_size=K)
    out = jax.block_until_ready(out)

    ref = spatial_attention_reference(x, w, kernel_size=K)
    assert out.shape == (2, 1, 16, 16)
    assert jnp.allclose(out, ref, atol=1e-5, rtol=1e-5), "mismatch vs reference"

    print("KERNEL_OK")
</pallas_src>

<mosaic_0001>
module attributes {stable_mosaic.version = 11 : i64} {
  func.func @kernel(%arg0: i32, %arg1: i32, %arg2: memref<2x4x256xf32, #tpu.memory_space<vmem>>, %arg3: memref<98xf32, #tpu.memory_space<smem>>, %arg4: memref<2x256xf32, #tpu.memory_space<vmem>>, %arg5: memref<2x4x256xf32, #tpu.memory_space<vmem>>, %arg6: memref<2x4x256xf32, #tpu.memory_space<vmem>>) attributes {dimension_semantics = [#tpu.dimension_semantics<parallel>, #tpu.dimension_semantics<arbitrary>], iteration_bounds = array<i64: 1, 1>, scalar_prefetch = 0 : i64, scratch_operands = 2 : i64, tpu.core_type = #tpu.core_type<tc>, window_params = [{transform_indices = @transform_0, window_bounds = array<i64: 2, 4, 256>}, {transform_indices = @transform_1, window_bounds = array<i64: 98>}, {transform_indices = @transform_2, window_bounds = array<i64: 2, 256>}]} {
    %c0_i32 = arith.constant 0 : i32
    %0 = arith.cmpi eq, %arg1, %c0_i32 : i32
    %1 = arith.extui %0 : i1 to i32
    %c0_i32_0 = arith.constant 0 : i32
    %2 = arith.cmpi ne, %1, %c0_i32_0 : i32
    scf.if %2 {
      %cst = arith.constant 0.000000e+00 : f32
      %13 = vector.broadcast %cst : f32 to vector<2x4x256xf32>
      %c0_17 = arith.constant 0 : index
      %c0_18 = arith.constant 0 : index
      %c0_19 = arith.constant 0 : index
      %14 = vector.load %arg5[%c0_17, %c0_18, %c0_19] : memref<2x4x256xf32, #tpu.memory_space<vmem>>, vector<2x4x256xf32>
      tpu.vector_store %arg5[%c0_17, %c0_18, %c0_19], %13 {strides = array<i32>} : memref<2x4x256xf32, #tpu.memory_space<vmem>>, vector<2x4x256xf32>,
      %cst_20 = arith.constant 0xFF800000 : f32
      %15 = vector.broadcast %cst_20 : f32 to vector<2x4x256xf32>
      %c0_21 = arith.constant 0 : index
      %c0_22 = arith.constant 0 : index
      %c0_23 = arith.constant 0 : index
      %16 = vector.load %arg6[%c0_21, %c0_22, %c0_23] : memref<2x4x256xf32, #tpu.memory_space<vmem>>, vector<2x4x256xf32>
      tpu.vector_store %arg6[%c0_21, %c0_22, %c0_23], %15 {strides = array<i32>} : memref<2x4x256xf32, #tpu.memory_space<vmem>>, vector<2x4x256xf32>,
    } else {
    }
    %c0 = arith.constant 0 : index
    %c0_1 = arith.constant 0 : index
    %c0_2 = arith.constant 0 : index
    %3 = vector.load %arg2[%c0, %c0_1, %c0_2] : memref<2x4x256xf32, #tpu.memory_space<vmem>>, vector<2x4x256xf32>
    %c0_3 = arith.constant 0 : index
    %c0_4 = arith.constant 0 : index
    %c0_5 = arith.constant 0 : index
    %4 = vector.load %arg5[%c0_3, %c0_4, %c0_5] : memref<2x4x256xf32, #tpu.memory_space<vmem>>, vector<2x4x256xf32>
    %5 = arith.addf %4, %3 : vector<2x4x256xf32>
    %c0_6 = arith.constant 0 : index
    %c0_7 = arith.constant 0 : index
    %c0_8 = arith.constant 0 : index
    %6 = vector.load %arg5[%c0_6, %c0_7, %c0_8] : memref<2x4x256xf32, #tpu.memory_space<vmem>>, vector<2x4x256xf32>
    tpu.vector_store %arg5[%c0_6, %c0_7, %c0_8], %5 {strides = array<i32>} : memref<2x4x256xf32, #tpu.memory_space<vmem>>, vector<2x4x256xf32>,
    %c0_9 = arith.constant 0 : index
    %c0_10 = arith.constant 0 : index
    %c0_11 = arith.constant 0 : index
    %7 = vector.load %arg6[%c0_9, %c0_10, %c0_11] : memref<2x4x256xf32, #tpu.memory_space<vmem>>, vector<2x4x256xf32>
    %8 = arith.maximumf %7, %3 : vector<2x4x256xf32>
    %c0_12 = arith.constant 0 : index
    %c0_13 = arith.constant 0 : index
    %c0_14 = arith.constant 0 : index
    %9 = vector.load %arg6[%c0_12, %c0_13, %c0_14] : memref<2x4x256xf32, #tpu.memory_space<vmem>>, vector<2x4x256xf32>
    tpu.vector_store %arg6[%c0_12, %c0_13, %c0_14], %8 {strides = array<i32>} : memref<2x4x256xf32, #tpu.memory_space<vmem>>, vector<2x4x256xf32>,
    %c0_i32_15 = arith.constant 0 : i32
    %10 = arith.cmpi eq, %arg1, %c0_i32_15 : i32
    %11 = arith.extui %10 : i1 to i32
    %c0_i32_16 = arith.constant 0 : i32
    %12 = arith.cmpi ne, %11, %c0_i32_16 : i32
    scf.if %12 {
      %13 = tpu.iota {dimensions = array<i32: 1>} : vector<1x256xi32>
      %c15_i32 = arith.constant 15 : i32
      %14 = vector.broadcast %c15_i32 : i32 to vector<1x256xi32>
      %15 = arith.andi %13, %14 : vector<1x256xi32>
      %c48_i32 = arith.constant 48 : i32
      %16 = vector.broadcast %c48_i32 : i32 to vector<1x256xi32>
      %17 = arith.cmpi sge, %13, %16 : vector<1x256xi32>
      %c32_i32 = arith.constant 32 : i32
      %18 = vector.broadcast %c32_i32 : i32 to vector<1x256xi32>
      %19 = arith.cmpi sge, %13, %18 : vector<1x256xi32>
      %c16_i32 = arith.constant 16 : i32
      %20 = vector.broadcast %c16_i32 : i32 to vector<1x256xi32>
      %21 = arith.cmpi sge, %13, %20 : vector<1x256xi32>
      %c240_i32 = arith.constant 240 : i32
      %22 = vector.broadcast %c240_i32 : i32 to vector<1x256xi32>
      %23 = arith.cmpi slt, %13, %22 : vector<1x256xi32>
      %c224_i32 = arith.constant 224 : i32
      %24 = vector.broadcast %c224_i32 : i32 to vector<1x256xi32>
      %25 = arith.cmpi slt, %13, %24 : vector<1x256xi32>
      %c208_i32 = arith.constant 208 : i32
      %26 = vector.broadcast %c208_i32 : i32 to vector<1x256xi32>
      %27 = arith.cmpi slt, %13, %26 : vector<1x256xi32>
      %c3_i32 = arith.constant 3 : i32
      %28 = vector.broadcast %c3_i32 : i32 to vector<1x256xi32>
      %29 = arith.cmpi sge, %15, %28 : vector<1x256xi32>
      %c2_i32 = arith.constant 2 : i32
      %30 = vector.broadcast %c2_i32 : i32 to vector<1x256xi32>
      %31 = arith.cmpi sge, %15, %30 : vector<1x256xi32>
      %c1_i32 = arith.constant 1 : i32
      %32 = vector.broadcast %c1_i32 : i32 to vector<1x256xi32>
      %33 = arith.cmpi sge, %15, %32 : vector<1x256xi32>
      %c15_i32_17 = arith.constant 15 : i32
      %34 = vector.broadcast %c15_i32_17 : i32 to vector<1x256xi32>
      %35 = arith.cmpi slt, %15, %34 : vector<1x256xi32>
      %c14_i32 = arith.constant 14 : i32
      %36 = vector.broadcast %c14_i32 : i32 to vector<1x256xi32>
      %37 = arith.cmpi slt, %15, %36 : vector<1x256xi32>
      %c13_i32 = arith.constant 13 : i32
      %38 = vector.broadcast %c13_i32 : i32 to vector<1x256xi32>
      %39 = arith.cmpi slt, %15, %38 : vector<1x256xi32>
      %c0_18 = arith.constant 0 : index
      %c0_19 = arith.constant 0 : index
      %c0_20 = arith.constant 0 : index
      %40 = vector.load %arg5[%c0_18, %c0_19, %c0_20] : memref<2x4x256xf32, #tpu.memory_space<vmem>>, vector<2x4x256xf32>
      %cst = arith.constant dense<0.000000e+00> : vector<2x256xf32>
      %41 = vector.multi_reduction <add>, %40, %cst [1] : vector<2x4x256xf32> to vector<2x256xf32>
      %c0_21 = arith.constant 0 : index
      %c0_22 = arith.constant 0 : index
      %c0_23 = arith.constant 0 : index
      %42 = vector.load %arg6[%c0_21, %c0_22, %c0_23] : memref<2x4x256xf32, #tpu.memory_space<vmem>>, vector<2x4x256xf32>
      %cst_24 = arith.constant dense<0xFF800000> : vector<2x256xf32>
      %43 = vector.multi_reduction <maximumf>, %42, %cst_24 [1] : vector<2x4x256xf32> to vector<2x256xf32>
      %cst_25 = arith.constant 0.000000e+00 : f32
      %44 = vector.broadcast %cst_25 : f32 to vector<2x256xf32>
      %c0_26 = arith.constant 0 : index
      %45 = memref.load %arg3[%c0_26] : memref<98xf32, #tpu.memory_space<smem>>
      %c49 = arith.constant 49 : index
      %46 = memref.load %arg3[%c49] : memref<98xf32, #tpu.memory_space<smem>>
      %47 = vector.broadcast %45 : f32 to vector<2x256xf32>
      %48 = arith.mulf %47, %41 : vector<2x256xf32>
      %49 = vector.broadcast %46 : f32 to vector<2x256xf32>
      %50 = arith.mulf %49, %43 : vector<2x256xf32>
      %51 = arith.addf %48, %50 : vector<2x256xf32>
      %c51_i32 = arith.constant 51 : i32
      %52 = tpu.dynamic_rotate %51 by %c51_i32 dim 1 : vector<2x256xf32>, i32 -> vector<2x256xf32>
      %53 = arith.andi %17, %29 : vector<1x256xi1>
      %cst_27 = arith.constant 0.000000e+00 : f32
      %54 = vector.shape_cast %53 : vector<1x256xi1> to vector<1x256xi1>
      %55 = vector.broadcast %54 : vector<1x256xi1> to vector<2x256xi1>
      %56 = vector.broadcast %cst_27 : f32 to vector<2x256xf32>
      %57 = arith.select %55, %52, %56 : vector<2x256xi1>, vector<2x256xf32>
      %58 = arith.addf %44, %57 : vector<2x256xf32>
      %c1 = arith.constant 1 : index
      %59 = memref.load %arg3[%c1] : memref<98xf32, #tpu.memory_space<smem>>
      %c50 = arith.constant 50 : index
      %60 = memref.load %arg3[%c50] : memref<98xf32, #tpu.memory_space<smem>>
      %61 = vector.broadcast %59 : f32 to vector<2x256xf32>
      %62 = arith.mulf %61, %41 : vector<2x256xf32>
      %63 = vector.broadcast %60 : f32 to vector<2x256xf32>
      %64 = arith.mulf %63, %43 : vector<2x256xf32>
      %65 = arith.addf %62, %64 : vector<2x256xf32>
      %c50_i32 = arith.constant 50 : i32
      %66 = tpu.dynamic_rotate %65 by %c50_i32 dim 1 : vector<2x256xf32>, i32 -> vector<2x256xf32>
      %67 = arith.andi %17, %31 : vector<1x256xi1>
      %cst_28 = arith.constant 0.000000e+00 : f32
      %68 = vector.shape_cast %67 : vector<1x256xi1> to vector<1x256xi1>
      %69 = vector.broadcast %68 : vector<1x256xi1> to vector<2x256xi1>
      %70 = vector.broadcast %cst_28 : f32 to vector<2x256xf32>
      %71 = arith.select %69, %66, %70 : vector<2x256xi1>, vector<2x256xf32>
      %72 = arith.addf %58, %71 : vector<2x256xf32>
      %c2 = arith.constant 2 : index
      %73 = memref.load %arg3[%c2] : memref<98xf32, #tpu.memory_space<smem>>
      %c51 = arith.constant 51 : index
      %74 = memref.load %arg3[%c51] : memref<98xf32, #tpu.memory_space<smem>>
      %75 = vector.broadcast %73 : f32 to vector<2x256xf32>
      %76 = arith.mulf %75, %41 : vector<2x256xf32>
      %77 = vector.broadcast %74 : f32 to vector<2x256xf32>
      %78 = arith.mulf %77, %43 : vector<2x256xf32>
      %79 = arith.addf %76, %78 : vector<2x256xf32>
      %c49_i32 = arith.constant 49 : i32
      %80 = tpu.dynamic_rotate %79 by %c49_i32 dim 1 : vector<2x256xf32>, i32 -> vector<2x256xf32>
      %81 = arith.andi %17, %33 : vector<1x256xi1>
      %cst_29 = arith.constant 0.000000e+00 : f32
      %82 = vector.shape_cast %81 : vector<1x256xi1> to vector<1x256xi1>
      %83 = vector.broadcast %82 : vector<1x256xi1> to vector<2x256xi1>
      %84 = vector.broadcast %cst_29 : f32 to vector<2x256xf32>
      %85 = arith.select %83, %80, %84 : vector<2x256xi1>, vector<2x256xf32>
      %86 = arith.addf %72, %85 : vector<2x256xf32>
      %c3 = arith.constant 3 : index
      %87 = memref.load %arg3[%c3] : memref<98xf32, #tpu.memory_space<smem>>
      %c52 = arith.constant 52 : index
      %88 = memref.load %arg3[%c52] : memref<98xf32, #tpu.memory_space<smem>>
      %89 = vector.broadcast %87 : f32 to vector<2x256xf32>
      %90 = arith.mulf %89, %41 : vector<2x256xf32>
      %91 = vector.broadcast %88 : f32 to vector<2x256xf32>
      %92 = arith.mulf %91, %43 : vector<2x256xf32>
      %93 = arith.addf %90, %92 : vector<2x256xf32>
      %c48_i32_30 = arith.constant 48 : i32
      %94 = tpu.dynamic_rotate %93 by %c48_i32_30 dim 1 : vector<2x256xf32>, i32 -> vector<2x256xf32>
      %cst_31 = arith.constant 0.000000e+00 : f32
      %95 = vector.shape_cast %17 : vector<1x256xi1> to vector<1x256xi1>
      %96 = vector.broadcast %95 : vector<1x256xi1> to vector<2x256xi1>
      %97 = vector.broadcast %cst_31 : f32 to vector<2x256xf32>
      %98 = arith.select %96, %94, %97 : vector<2x256xi1>, vector<2x256xf32>
      %99 = arith.addf %86, %98 : vector<2x256xf32>
      %c4 = arith.constant 4 : index
      %100 = memref.load %arg3[%c4] : memref<98xf32, #tpu.memory_space<smem>>
      %c53 = arith.constant 53 : index
      %101 = memref.load %arg3[%c53] : memref<98xf32, #tpu.memory_space<smem>>
      %102 = vector.broadcast %100 : f32 to vector<2x256xf32>
      %103 = arith.mulf %102, %41 : vector<2x256xf32>
      %104 = vector.broadcast %101 : f32 to vector<2x256xf32>
      %105 = arith.mulf %104, %43 : vector<2x256xf32>
      %106 = arith.addf %103, %105 : vector<2x256xf32>
      %c47_i32 = arith.constant 47 : i32
      %107 = tpu.dynamic_rotate %106 by %c47_i32 dim 1 : vector<2x256xf32>, i32 -> vector<2x256xf32>
      %108 = arith.andi %17, %35 : vector<1x256xi1>
      %cst_32 = arith.constant 0.000000e+00 : f32
      %109 = vector.shape_cast %108 : vector<1x256xi1> to vector<1x256xi1>
      %110 = vector.broadcast %109 : vector<1x256xi1> to vector<2x256xi1>
      %111 = vector.broadcast %cst_32 : f32 to vector<2x256xf32>
      %112 = arith.select %110, %107, %111 : vector<2x256xi1>, vector<2x256xf32>
      %113 = arith.addf %99, %112 : vector<2x256xf32>
      %c5 = arith.constant 5 : index
      %114 = memref.load %arg3[%c5] : memref<98xf32, #tpu.memory_space<smem>>
      %c54 = arith.constant 54 : index
      %115 = memref.load %arg3[%c54] : memref<98xf32, #tpu.memory_space<smem>>
      %116 = vector.broadcast %114 : f32 to vector<2x256xf32>
      %117 = arith.mulf %116, %41 : vector<2x256xf32>
      %118 = vector.broadcast %115 : f32 to vector<2x256xf32>
      %119 = arith.mulf %118, %43 : vector<2x256xf32>
      %120 = arith.addf %117, %119 : vector<2x256xf32>
      %c46_i32 = arith.constant 46 : i32
      %121 = tpu.dynamic_rotate %120 by %c46_i32 dim 1 : vector<2x256xf32>, i32 -> vector<2x256xf32>
      %122 = arith.andi %17, %37 : vector<1x256xi1>
      %cst_33 = arith.constant 0.000000e+00 : f32
      %123 = vector.shape_cast %122 : vector<1x256xi1> to vector<1x256xi1>
      %124 = vector.broadcast %123 : vector<1x256xi1> to vector<2x256xi1>
      %125 = vector.broadcast %cst_33 : f32 to vector<2x256xf32>
      %126 = arith.select %124, %121, %125 : vector<2x256xi1>, vector<2x256xf32>
      %127 = arith.addf %113, %126 : vector<2x256xf32>
      %c6 = arith.constant 6 : index
      %128 = memref.load %arg3[%c6] : memref<98xf32, #tpu.memory_space<smem>>
      %c55 = arith.constant 55 : index
      %129 = memref.load %arg3[%c55] : memref<98xf32, #tpu.memory_space<smem>>
      %130 = vector.broadcast %128 : f32 to vector<2x256xf32>
      %131 = arith.mulf %130, %41 : vector<2x256xf32>
      %132 = vector.broadcast %129 : f32 to vector<2x256xf32>
      %133 = arith.mulf %132, %43 : vector<2x256xf32>
      %134 = arith.addf %131, %133 : vector<2x256xf32>
      %c45_i32 = arith.constant 45 : i32
      %135 = tpu.dynamic_rotate %134 by %c45_i32 dim 1 : vector<2x256xf32>, i32 -> vector<2x256xf32>
      %136 = arith.andi %17, %39 : vector<1x256xi1>
      %cst_34 = arith.constant 0.000000e+00 : f32
      %137 = vector.shape_cast %136 : vector<1x256xi1> to vector<1x256xi1>
      %138 = vector.broadcast %137 : vector<1x256xi1> to vector<2x256xi1>
      %139 = vector.broadcast %cst_34 : f32 to vector<2x256xf32>
      %140 = arith.select %138, %135, %139 : vector<2x256xi1>, vector<2x256xf32>
      %141 = arith.addf %127, %140 : vector<2x256xf32>
      %c7 = arith.constant 7 : index
      %142 = memref.load %arg3[%c7] : memref<98xf32, #tpu.memory_space<smem>>
      %c56 = arith.constant 56 : index
      %143 = memref.load %arg3[%c56] : memref<98xf32, #tpu.memory_space<smem>>
      %144 = vector.broadcast %142 : f32 to vector<2x256xf32>
      %145 = arith.mulf %144, %41 : vector<2x256xf32>
      %146 = vector.broadcast %143 : f32 to vector<2x256xf32>
      %147 = arith.mulf %146, %43 : vector<2x256xf32>
      %148 = arith.addf %145, %147 : vector<2x256xf32>
      %c35_i32 = arith.constant 35 : i32
      %149 = tpu.dynamic_rotate %148 by %c35_i32 dim 1 : vector<2x256xf32>, i32 -> vector<2x256xf32>
      %150 = arith.andi %19, %29 : vector<1x256xi1>
      %cst_35 = arith.constant 0.000000e+00 : f32
      %151 = vector.shape_cast %150 : vector<1x256xi1> to vector<1x256xi1>
      %152 = vector.broadcast %151 : vector<1x256xi1> to vector<2x256xi1>
      %153 = vector.broadcast %cst_35 : f32 to vector<2x256xf32>
      %154 = arith.select %152, %149, %153 : vector<2x256xi1>, vector<2x256xf32>
      %155 = arith.addf %141, %154 : vector<2x256xf32>
      %c8 = arith.constant 8 : index
      %156 = memref.load %arg3[%c8] : memref<98xf32, #tpu.memory_space<smem>>
      %c57 = arith.constant 57 : index
      %157 = memref.load %arg3[%c57] : memref<98xf32, #tpu.memory_space<smem>>
      %158 = vector.broadcast %156 : f32 to vector<2x256xf32>
      %159 = arith.mulf %158, %41 : vector<2x256xf32>
      %160 = vector.broadcast %157 : f32 to vector<2x256xf32>
      %161 = arith.mulf %160, %43 : vector<2x256xf32>
      %162 = arith.addf %159, %161 : vector<2x256xf32>
      %c34_i32 = arith.constant 34 : i32
      %163 = tpu.dynamic_rotate %162 by %c34_i32 dim 1 : vector<2x256xf32>, i32 -> vector<2x256xf32>
      %164 = arith.andi %19, %31 : vector<1x256xi1>
      %cst_36 = arith.constant 0.000000e+00 : f32
      %165 = vector.shape_cast %164 : vector<1x256xi1> to vector<1x256xi1>
      %166 = vector.broadcast %165 : vector<1x256xi1> to vector<2x256xi1>
      %167 = vector.broadcast %cst_36 : f32 to vector<2x256xf32>
      %168 = arith.select %166, %163, %167 : vector<2x256xi1>, vector<2x256xf32>
      %169 = arith.addf %155, %168 : vector<2x256xf32>
      %c9 = arith.constant 9 : index
      %170 = memref.load %arg3[%c9] : memref<98xf32, #tpu.memory_space<smem>>
      %c58 = arith.constant 58 : index
      %171 = memref.load %arg3[%c58] : memref<98xf32, #tpu.memory_space<smem>>
      %172 = vector.broadcast %170 : f32 to vector<2x256xf32>
      %173 = arith.mulf %172, %41 : vector<2x256xf32>
      %174 = vector.broadcast %171 : f32 to vector<2x256xf32>
      %175 = arith.mulf %174, %43 : vector<2x256xf32>
      %176 = arith.addf %173, %175 : vector<2x256xf32>
      %c33_i32 = arith.constant 33 : i32
      %177 = tpu.dynamic_rotate %176 by %c33_i32 dim 1 : vector<2x256xf32>, i32 -> vector<2x256xf32>
      %178 = arith.andi %19, %33 : vector<1x256xi1>
      %cst_37 = arith.constant 0.000000e+00 : f32
      %179 = vector.shape_cast %178 : vector<1x256xi1> to vector<1x256xi1>
      %180 = vector.broadcast %179 : vector<1x256xi1> to vector<2x256xi1>
      %181 = vector.broadcast %cst_37 : f32 to vector<2x256xf32>
      %182 = arith.select %180, %177, %181 : vector<2x256xi1>, vector<2x256xf32>
      %183 = arith.addf %169, %182 : vector<2x256xf32>
      %c10 = arith.constant 10 : index
      %184 = memref.load %arg3[%c10] : memref<98xf32, #tpu.memory_space<smem>>
      %c59 = arith.constant 59 : index
      %185 = memref.load %arg3[%c59] : memref<98xf32, #tpu.memory_space<smem>>
      %186 = vector.broadcast %184 : f32 to vector<2x256xf32>
      %187 = arith.mulf %186, %41 : vector<2x256xf32>
      %188 = vector.broadcast %185 : f32 to vector<2x256xf32>
      %189 = arith.mulf %188, %43 : vector<2x256xf32>
      %190 = arith.addf %187, %189 : vector<2x256xf32>
      %c32_i32_38 = arith.constant 32 : i32
      %191 = tpu.dynamic_rotate %190 by %c32_i32_38 dim 1 : vector<2x256xf32>, i32 -> vector<2x256xf32>
      %cst_39 = arith.constant 0.000000e+00 : f32
      %192 = vector.shape_cast %19 : vector<1x256xi1> to vector<1x256xi1>
      %193 = vector.broadcast %192 : vector<1x256xi1> to vector<2x256xi1>
      %194 = vector.broadcast %cst_39 : f32 to vector<2x256xf32>
      %195 = arith.select %193, %191, %194 : vector<2x256xi1>, vector<2x256xf32>
      %196 = arith.addf %183, %195 : vector<2x256xf32>
      %c11 = arith.constant 11 : index
      %197 = memref.load %arg3[%c11] : memref<98xf32, #tpu.memory_space<smem>>
      %c60 = arith.constant 60 : index
      %198 = memref.load %arg3[%c60] : memref<98xf32, #tpu.memory_space<smem>>
      %199 = vector.broadcast %197 : f32 to vector<2x256xf32>
      %200 = arith.mulf %199, %41 : vector<2x256xf32>
      %201 = vector.broadcast %198 : f32 to vector<2x256xf32>
      %202 = arith.mulf %201, %43 : vector<2x256xf32>
      %203 = arith.addf %200, %202 : vector<2x256xf32>
      %c31_i32 = arith.constant 31 : i32
      %204 = tpu.dynamic_rotate %203 by %c31_i32 dim 1 : vector<2x256xf32>, i32 -> vector<2x256xf32>
      %205 = arith.andi %19, %35 : vector<1x256xi1>
      %cst_40 = arith.constant 0.000000e+00 : f32
      %206 = vector.shape_cast %205 : vector<1x256xi1> to vector<1x256xi1>
      %207 = vector.broadcast %206 : vector<1x256xi1> to vector<2x256xi1>
      %208 = vector.broadcast %cst_40 : f32 to vector<2x256xf32>
      %209 = arith.select %207, %204, %208 : vector<2x256xi1>, vector<2x256xf32>
      %210 = arith.addf %196, %209 : vector<2x256xf32>
      %c12 = arith.constant 12 : index
      %211 = memref.load %arg3[%c12] : memref<98xf32, #tpu.memory_space<smem>>
      %c61 = arith.constant 61 : index
      %212 = memref.load %arg3[%c61] : memref<98xf32, #tpu.memory_space<smem>>
      %213 = vector.broadcast %211 : f32 to vector<2x256xf32>
      %214 = arith.mulf %213, %41 : vector<2x256xf32>
      %215 = vector.broadcast %212 : f32 to vector<2x256xf32>
      %216 = arith.mulf %215, %43 : vector<2x256xf32>
      %217 = arith.addf %214, %216 : vector<2x256xf32>
      %c30_i32 = arith.constant 30 : i32
      %218 = tpu.dynamic_rotate %217 by %c30_i32 dim 1 : vector<2x256xf32>, i32 -> vector<2x256xf32>
      %219 = arith.andi %19, %37 : vector<1x256xi1>
      %cst_41 = arith.constant 0.000000e+00 : f32
      %220 = vector.shape_cast %219 : vector<1x256xi1> to vector<1x256xi1>
      %221 = vector.broadcast %220 : vector<1x256xi1> to vector<2x256xi1>
      %222 = vector.broadcast %cst_41 : f32 to vector<2x256xf32>
      %223 = arith.select %221, %218, %222 : vector<2x256xi1>, vector<2x256xf32>
      %224 = arith.addf %210, %223 : vector<2x256xf32>
      %c13 = arith.constant 13 : index
      %225 = memref.load %arg3[%c13] : memref<98xf32, #tpu.memory_space<smem>>
      %c62 = arith.constant 62 : index
      %226 = memref.load %arg3[%c62] : memref<98xf32, #tpu.memory_space<smem>>
      %227 = vector.broadcast %225 : f32 to vector<2x256xf32>
      %228 = arith.mulf %227, %41 : vector<2x256xf32>
      %229 = vector.broadcast %226 : f32 to vector<2x256xf32>
      %230 = arith.mulf %229, %43 : vector<2x256xf32>
      %231 = arith.addf %228, %230 : vector<2x256xf32>
      %c29_i32 = arith.constant 29 : i32
      %232 = tpu.dynamic_rotate %231 by %c29_i32 dim 1 : vector<2x256xf32>, i32 -> vector<2x256xf32>
      %233 = arith.andi %19, %39 : vector<1x256xi1>
      %cst_42 = arith.constant 0.000000e+00 : f32
      %234 = vector.shape_cast %233 : vector<1x256xi1> to vector<1x256xi1>
      %235 = vector.broadcast %234 : vector<1x256xi1> to vector<2x256xi1>
      %236 = vector.broadcast %cst_42 : f32 to vector<2x256xf32>
      %237 = arith.select %235, %232, %236 : vector<2x256xi1>, vector<2x256xf32>
      %238 = arith.addf %224, %237 : vector<2x256xf32>
      %c14 = arith.constant 14 : index
      %239 = memref.load %arg3[%c14] : memref<98xf32, #tpu.memory_space<smem>>
      %c63 = arith.constant 63 : index
      %240 = memref.load %arg3[%c63] : memref<98xf32, #tpu.memory_space<smem>>
      %241 = vector.broadcast %239 : f32 to vector<2x256xf32>
      %242 = arith.mulf %241, %41 : vector<2x256xf32>
      %243 = vector.broadcast %240 : f32 to vector<2x256xf32>
      %244 = arith.mulf %243, %43 : vector<2x256xf32>
      %245 = arith.addf %242, %244 : vector<2x256xf32>
      %c19_i32 = arith.constant 19 : i32
      %246 = tpu.dynamic_rotate %245 by %c19_i32 dim 1 : vector<2x256xf32>, i32 -> vector<2x256xf32>
      %247 = arith.andi %21, %29 : vector<1x256xi1>
      %cst_43 = arith.constant 0.000000e+00 : f32
      %248 = vector.shape_cast %247 : vector<1x256xi1> to vector<1x256xi1>
      %249 = vector.broadcast %248 : vector<1x256xi1> to vector<2x256xi1>
      %250 = vector.broadcast %cst_43 : f32 to vector<2x256xf32>
      %251 = arith.select %249, %246, %250 : vector<2x256xi1>, vector<2x256xf32>
      %252 = arith.addf %238, %251 : vector<2x256xf32>
      %c15 = arith.constant 15 : index
      %253 = memref.load %arg3[%c15] : memref<98xf32, #tpu.memory_space<smem>>
      %c64 = arith.constant 64 : index
      %254 = memref.load %arg3[%c64] : memref<98xf32, #tpu.memory_space<smem>>
      %255 = vector.broadcast %253 : f32 to vector<2x256xf32>
      %256 = arith.mulf %255, %41 : vector<2x256xf32>
      %257 = vector.broadcast %254 : f32 to vector<2x256xf32>
      %258 = arith.mulf %257, %43 : vector<2x256xf32>
      %259 = arith.addf %256, %258 : vector<2x256xf32>
      %c18_i32 = arith.constant 18 : i32
      %260 = tpu.dynamic_rotate %259 by %c18_i32 dim 1 : vector<2x256xf32>, i32 -> vector<2x256xf32>
      %261 = arith.andi %21, %31 : vector<1x256xi1>
      %cst_44 = arith.constant 0.000000e+00 : f32
      %262 = vector.shape_cast %261 : vector<1x256xi1> to vector<1x256xi1>
      %263 = vector.broadcast %262 : vector<1x256xi1> to vector<2x256xi1>
      %264 = vector.broadcast %cst_44 : f32 to vector<2x256xf32>
      %265 = arith.select %263, %260, %264 : vector<2x256xi1>, vector<2x256xf32>
      %266 = arith.addf %252, %265 : vector<2x256xf32>
      %c16 = arith.constant 16 : index
      %267 = memref.load %arg3[%c16] : memref<98xf32, #tpu.memory_space<smem>>
      %c65 = arith.constant 65 : index
      %268 = memref.load %arg3[%c65] : memref<98xf32, #tpu.memory_space<smem>>
      %269 = vector.broadcast %267 : f32 to vector<2x256xf32>
      %270 = arith.mulf %269, %41 : vector<2x256xf32>
      %271 = vector.broadcast %268 : f32 to vector<2x256xf32>
      %272 = arith.mulf %271, %43 : vector<2x256xf32>
      %273 = arith.addf %270, %272 : vector<2x256xf32>
      %c17_i32 = arith.constant 17 : i32
      %274 = tpu.dynamic_rotate %273 by %c17_i32 dim 1 : vector<2x256xf32>, i32 -> vector<2x256xf32>
      %275 = arith.andi %21, %33 : vector<1x256xi1>
      %cst_45 = arith.constant 0.000000e+00 : f32
      %276 = vector.shape_cast %275 : vector<1x256xi1> to vector<1x256xi1>
      %277 = vector.broadcast %276 : vector<1x256xi1> to vector<2x256xi1>
      %278 = vector.broadcast %cst_45 : f32 to vector<2x256xf32>
      %279 = arith.select %277, %274, %278 : vector<2x256xi1>, vector<2x256xf32>
      %280 = arith.addf %266, %279 : vector<2x256xf32>
      %c17 = arith.constant 17 : index
      %281 = memref.load %arg3[%c17] : memref<98xf32, #tpu.memory_space<smem>>
      %c66 = arith.constant 66 : index
      %282 = memref.load %arg3[%c66] : memref<98xf32, #tpu.memory_space<smem>>
      %283 = vector.broadcast %281 : f32 to vector<2x256xf32>
      %284 = arith.mulf %283, %41 : vector<2x256xf32>
      %285 = vector.broadcast %282 : f32 to vector<2x256xf32>
      %286 = arith.mulf %285, %43 : vector<2x256xf32>
      %287 = arith.addf %284, %286 : vector<2x256xf32>
      %c16_i32_46 = arith.constant 16 : i32
      %288 = tpu.dynamic_rotate %287 by %c16_i32_46 dim 1 : vector<2x256xf32>, i32 -> vector<2x256xf32>
      %cst_47 = arith.constant 0.000000e+00 : f32
      %289 = vector.shape_cast %21 : vector<1x256xi1> to vector<1x256xi1>
      %290 = vector.broadcast %289 : vector<1x256xi1> to vector<2x256xi1>
      %291 = vector.broadcast %cst_47 : f32 to vector<2x256xf32>
      %292 = arith.select %290, %288, %291 : vector<2x256xi1>, vector<2x256xf32>
      %293 = arith.addf %280, %292 : vector<2x256xf32>
      %c18 = arith.constant 18 : index
      %294 = memref.load %arg3[%c18] : memref<98xf32, #tpu.memory_space<smem>>
      %c67 = arith.constant 67 : index
      %295 = memref.load %arg3[%c67] : memref<98xf32, #tpu.memory_space<smem>>
      %296 = vector.broadcast %294 : f32 to vector<2x256xf32>
      %297 = arith.mulf %296, %41 : vector<2x256xf32>
      %298 = vector.broadcast %295 : f32 to vector<2x256xf32>
      %299 = arith.mulf %298, %43 : vector<2x256xf32>
      %300 = arith.addf %297, %299 : vector<2x256xf32>
      %c15_i32_48 = arith.constant 15 : i32
      %301 = tpu.dynamic_rotate %300 by %c15_i32_48 dim 1 : vector<2x256xf32>, i32 -> vector<2x256xf32>
      %302 = arith.andi %21, %35 : vector<1x256xi1>
      %cst_49 = arith.constant 0.000000e+00 : f32
      %303 = vector.shape_cast %302 : vector<1x256xi1> to vector<1x256xi1>
      %304 = vector.broadcast %303 : vector<1x256xi1> to vector<2x256xi1>
      %305 = vector.broadcast %cst_49 : f32 to vector<2x256xf32>
      %306 = arith.select %304, %301, %305 : vector<2x256xi1>, vector<2x256xf32>
      %307 = arith.addf %293, %306 : vector<2x256xf32>
      %c19 = arith.constant 19 : index
      %308 = memref.load %arg3[%c19] : memref<98xf32, #tpu.memory_space<smem>>
      %c68 = arith.constant 68 : index
      %309 = memref.load %arg3[%c68] : memref<98xf32, #tpu.memory_space<smem>>
      %310 = vector.broadcast %308 : f32 to vector<2x256xf32>
      %311 = arith.mulf %310, %41 : vector<2x256xf32>
      %312 = vector.broadcast %309 : f32 to vector<2x256xf32>
      %313 = arith.mulf %312, %43 : vector<2x256xf32>
      %314 = arith.addf %311, %313 : vector<2x256xf32>
      %c14_i32_50 = arith.constant 14 : i32
      %315 = tpu.dynamic_rotate %314 by %c14_i32_50 dim 1 : vector<2x256xf32>, i32 -> vector<2x256xf32>
      %316 = arith.andi %21, %37 : vector<1x256xi1>
      %cst_51 = arith.constant 0.000000e+00 : f32
      %317 = vector.shape_cast %316 : vector<1x256xi1> to vector<1x256xi1>
      %318 = vector.broadcast %317 : vector<1x256xi1> to vector<2x256xi1>
      %319 = vector.broadcast %cst_51 : f32 to vector<2x256xf32>
      %320 = arith.select %318, %315, %319 : vector<2x256xi1>, vector<2x256xf32>
      %321 = arith.addf %307, %320 : vector<2x256xf32>
      %c20 = arith.constant 20 : index
      %322 = memref.load %arg3[%c20] : memref<98xf32, #tpu.memory_space<smem>>
      %c69 = arith.constant 69 : index
      %323 = memref.load %arg3[%c69] : memref<98xf32, #tpu.memory_space<smem>>
      %324 = vector.broadcast %322 : f32 to vector<2x256xf32>
      %325 = arith.mulf %324, %41 : vector<2x256xf32>
      %326 = vector.broadcast %323 : f32 to vector<2x256xf32>
      %327 = arith.mulf %326, %43 : vector<2x256xf32>
      %328 = arith.addf %325, %327 : vector<2x256xf32>
      %c13_i32_52 = arith.constant 13 : i32
      %329 = tpu.dynamic_rotate %328 by %c13_i32_52 dim 1 : vector<2x256xf32>, i32 -> vector<2x256xf32>
      %330 = arith.andi %21, %39 : vector<1x256xi1>
      %cst_53 = arith.constant 0.000000e+00 : f32
      %331 = vector.shape_cast %330 : vector<1x256xi1> to vector<1x256xi1>
      %332 = vector.broadcast %331 : vector<1x256xi1> to vector<2x256xi1>
      %333 = vector.broadcast %cst_53 : f32 to vector<2x256xf32>
      %334 = arith.select %332, %329, %333 : vector<2x256xi1>, vector<2x256xf32>
      %335 = arith.addf %321, %334 : vector<2x256xf32>
      %c21 = arith.constant 21 : index
      %336 = memref.load %arg3[%c21] : memref<98xf32, #tpu.memory_space<smem>>
      %c70 = arith.constant 70 : index
      %337 = memref.load %arg3[%c70] : memref<98xf32, #tpu.memory_space<smem>>
      %338 = vector.broadcast %336 : f32 to vector<2x256xf32>
      %339 = arith.mulf %338, %41 : vector<2x256xf32>
      %340 = vector.broadcast %337 : f32 to vector<2x256xf32>
      %341 = arith.mulf %340, %43 : vector<2x256xf32>
      %342 = arith.addf %339, %341 : vector<2x256xf32>
      %c3_i32_54 = arith.constant 3 : i32
      %343 = tpu.dynamic_rotate %342 by %c3_i32_54 dim 1 : vector<2x256xf32>, i32 -> vector<2x256xf32>
      %cst_55 = arith.constant 0.000000e+00 : f32
      %344 = vector.shape_cast %29 : vector<1x256xi1> to vector<1x256xi1>
      %345 = vector.broadcast %344 : vector<1x256xi1> to vector<2x256xi1>
      %346 = vector.broadcast %cst_55 : f32 to vector<2x256xf32>
      %347 = arith.select %345, %343, %346 : vector<2x256xi1>, vector<2x256xf32>
      %348 = arith.addf %335, %347 : vector<2x256xf32>
      %c22 = arith.constant 22 : index
      %349 = memref.load %arg3[%c22] : memref<98xf32, #tpu.memory_space<smem>>
      %c71 = arith.constant 71 : index
      %350 = memref.load %arg3[%c71] : memref<98xf32, #tpu.memory_space<smem>>
      %351 = vector.broadcast %349 : f32 to vector<2x256xf32>
      %352 = arith.mulf %351, %41 : vector<2x256xf32>
      %353 = vector.broadcast %350 : f32 to vector<2x256xf32>
      %354 = arith.mulf %353, %43 : vector<2x256xf32>
      %355 = arith.addf %352, %354 : vector<2x256xf32>
      %c2_i32_56 = arith.constant 2 : i32
      %356 = tpu.dynamic_rotate %355 by %c2_i32_56 dim 1 : vector<2x256xf32>, i32 -> vector<2x256xf32>
      %cst_57 = arith.constant 0.000000e+00 : f32
      %357 = vector.shape_cast %31 : vector<1x256xi1> to vector<1x256xi1>
      %358 = vector.broadcast %357 : vector<1x256xi1> to vector<2x256xi1>
      %359 = vector.broadcast %cst_57 : f32 to vector<2x256xf32>
      %360 = arith.select %358, %356, %359 : vector<2x256xi1>, vector<2x256xf32>
      %361 = arith.addf %348, %360 : vector<2x256xf32>
      %c23 = arith.constant 23 : index
      %362 = memref.load %arg3[%c23] : memref<98xf32, #tpu.memory_space<smem>>
      %c72 = arith.constant 72 : index
      %363 = memref.load %arg3[%c72] : memref<98xf32, #tpu.memory_space<smem>>
      %364 = vector.broadcast %362 : f32 to vector<2x256xf32>
      %365 = arith.mulf %364, %41 : vector<2x256xf32>
      %366 = vector.broadcast %363 : f32 to vector<2x256xf32>
      %367 = arith.mulf %366, %43 : vector<2x256xf32>
      %368 = arith.addf %365, %367 : vector<2x256xf32>
      %c1_i32_58 = arith.constant 1 : i32
      %369 = tpu.dynamic_rotate %368 by %c1_i32_58 dim 1 : vector<2x256xf32>, i32 -> vector<2x256xf32>
      %cst_59 = arith.constant 0.000000e+00 : f32
      %370 = vector.shape_cast %33 : vector<1x256xi1> to vector<1x256xi1>
      %371 = vector.broadcast %370 : vector<1x256xi1> to vector<2x256xi1>
      %372 = vector.broadcast %cst_59 : f32 to vector<2x256xf32>
      %373 = arith.select %371, %369, %372 : vector<2x256xi1>, vector<2x256xf32>
      %374 = arith.addf %361, %373 : vector<2x256xf32>
      %c24 = arith.constant 24 : index
      %375 = memref.load %arg3[%c24] : memref<98xf32, #tpu.memory_space<smem>>
      %c73 = arith.constant 73 : index
      %376 = memref.load %arg3[%c73] : memref<98xf32, #tpu.memory_space<smem>>
      %377 = vector.broadcast %375 : f32 to vector<2x256xf32>
      %378 = arith.mulf %377, %41 : vector<2x256xf32>
      %379 = vector.broadcast %376 : f32 to vector<2x256xf32>
      %380 = arith.mulf %379, %43 : vector<2x256xf32>
      %381 = arith.addf %378, %380 : vector<2x256xf32>
      %382 = arith.addf %374, %381 : vector<2x256xf32>
      %c25 = arith.constant 25 : index
      %383 = memref.load %arg3[%c25] : memref<98xf32, #tpu.memory_space<smem>>
      %c74 = arith.constant 74 : index
      %384 = memref.load %arg3[%c74] : memref<98xf32, #tpu.memory_space<smem>>
      %385 = vector.broadcast %383 : f32 to vector<2x256xf32>
      %386 = arith.mulf %385, %41 : vector<2x256xf32>
      %387 = vector.broadcast %384 : f32 to vector<2x256xf32>
      %388 = arith.mulf %387, %43 : vector<2x256xf32>
      %389 = arith.addf %386, %388 : vector<2x256xf32>
      %c255_i32 = arith.constant 255 : i32
      %390 = tpu.dynamic_rotate %389 by %c255_i32 dim 1 : vector<2x256xf32>, i32 -> vector<2x256xf32>
      %cst_60 = arith.constant 0.000000e+00 : f32
      %391 = vector.shape_cast %35 : vector<1x256xi1> to vector<1x256xi1>
      %392 = vector.broadcast %391 : vector<1x256xi1> to vector<2x256xi1>
      %393 = vector.broadcast %cst_60 : f32 to vector<2x256xf32>
      %394 = arith.select %392, %390, %393 : vector<2x256xi1>, vector<2x256xf32>
      %395 = arith.addf %382, %394 : vector<2x256xf32>
      %c26 = arith.constant 26 : index
      %396 = memref.load %arg3[%c26] : memref<98xf32, #tpu.memory_space<smem>>
      %c75 = arith.constant 75 : index
      %397 = memref.load %arg3[%c75] : memref<98xf32, #tpu.memory_space<smem>>
      %398 = vector.broadcast %396 : f32 to vector<2x256xf32>
      %399 = arith.mulf %398, %41 : vector<2x256xf32>
      %400 = vector.broadcast %397 : f32 to vector<2x256xf32>
      %401 = arith.mulf %400, %43 : vector<2x256xf32>
      %402 = arith.addf %399, %401 : vector<2x256xf32>
      %c254_i32 = arith.constant 254 : i32
      %403 = tpu.dynamic_rotate %402 by %c254_i32 dim 1 : vector<2x256xf32>, i32 -> vector<2x256xf32>
      %cst_61 = arith.constant 0.000000e+00 : f32
      %404 = vector.shape_cast %37 : vector<1x256xi1> to vector<1x256xi1>
      %405 = vector.broadcast %404 : vector<1x256xi1> to vector<2x256xi1>
      %406 = vector.broadcast %cst_61 : f32 to vector<2x256xf32>
      %407 = arith.select %405, %403, %406 : vector<2x256xi1>, vector<2x256xf32>
      %408 = arith.addf %395, %407 : vector<2x256xf32>
      %c27 = arith.constant 27 : index
      %409 = memref.load %arg3[%c27] : memref<98xf32, #tpu.memory_space<smem>>
      %c76 = arith.constant 76 : index
      %410 = memref.load %arg3[%c76] : memref<98xf32, #tpu.memory_space<smem>>
      %411 = vector.broadcast %409 : f32 to vector<2x256xf32>
      %412 = arith.mulf %411, %41 : vector<2x256xf32>
      %413 = vector.broadcast %410 : f32 to vector<2x256xf32>
      %414 = arith.mulf %413, %43 : vector<2x256xf32>
      %415 = arith.addf %412, %414 : vector<2x256xf32>
      %c253_i32 = arith.constant 253 : i32
      %416 = tpu.dynamic_rotate %415 by %c253_i32 dim 1 : vector<2x256xf32>, i32 -> vector<2x256xf32>
      %cst_62 = arith.constant 0.000000e+00 : f32
      %417 = vector.shape_cast %39 : vector<1x256xi1> to vector<1x256xi1>
      %418 = vector.broadcast %417 : vector<1x256xi1> to vector<2x256xi1>
      %419 = vector.broadcast %cst_62 : f32 to vector<2x256xf32>
      %420 = arith.select %418, %416, %419 : vector<2x256xi1>, vector<2x256xf32>
      %421 = arith.addf %408, %420 : vector<2x256xf32>
      %c28 = arith.constant 28 : index
      %422 = memref.load %arg3[%c28] : memref<98xf32, #tpu.memory_space<smem>>
      %c77 = arith.constant 77 : index
      %423 = memref.load %arg3[%c77] : memref<98xf32, #tpu.memory_space<smem>>
      %424 = vector.broadcast %422 : f32 to vector<2x256xf32>
      %425 = arith.mulf %424, %41 : vector<2x256xf32>
      %426 = vector.broadcast %423 : f32 to vector<2x256xf32>
      %427 = arith.mulf %426, %43 : vector<2x256xf32>
      %428 = arith.addf %425, %427 : vector<2x256xf32>
      %c243_i32 = arith.constant 243 : i32
      %429 = tpu.dynamic_rotate %428 by %c243_i32 dim 1 : vector<2x256xf32>, i32 -> vector<2x256xf32>
      %430 = arith.andi %23, %29 : vector<1x256xi1>
      %cst_63 = arith.constant 0.000000e+00 : f32
      %431 = vector.shape_cast %430 : vector<1x256xi1> to vector<1x256xi1>
      %432 = vector.broadcast %431 : vector<1x256xi1> to vector<2x256xi1>
      %433 = vector.broadcast %cst_63 : f32 to vector<2x256xf32>
      %434 = arith.select %432, %429, %433 : vector<2x256xi1>, vector<2x256xf32>
      %435 = arith.addf %421, %434 : vector<2x256xf32>
      %c29 = arith.constant 29 : index
      %436 = memref.load %arg3[%c29] : memref<98xf32, #tpu.memory_space<smem>>
      %c78 = arith.constant 78 : index
      %437 = memref.load %arg3[%c78] : memref<98xf32, #tpu.memory_space<smem>>
      %438 = vector.broadcast %436 : f32 to vector<2x256xf32>
      %439 = arith.mulf %438, %41 : vector<2x256xf32>
      %440 = vector.broadcast %437 : f32 to vector<2x256xf32>
      %441 = arith.mulf %440, %43 : vector<2x256xf32>
      %442 = arith.addf %439, %441 : vector<2x256xf32>
      %c242_i32 = arith.constant 242 : i32
      %443 = tpu.dynamic_rotate %442 by %c242_i32 dim 1 : vector<2x256xf32>, i32 -> vector<2x256xf32>
      %444 = arith.andi %23, %31 : vector<1x256xi1>
      %cst_64 = arith.constant 0.000000e+00 : f32
      %445 = vector.shape_cast %444 : vector<1x256xi1> to vector<1x256xi1>
      %446 = vector.broadcast %445 : vector<1x256xi1> to vector<2x256xi1>
      %447 = vector.broadcast %cst_64 : f32 to vector<2x256xf32>
      %448 = arith.select %446, %443, %447 : vector<2x256xi1>, vector<2x256xf32>
      %449 = arith.addf %435, %448 : vector<2x256xf32>
      %c30 = arith.constant 30 : index
      %450 = memref.load %arg3[%c30] : memref<98xf32, #tpu.memory_space<smem>>
      %c79 = arith.constant 79 : index
      %451 = memref.load %arg3[%c79] : memref<98xf32, #tpu.memory_space<smem>>
      %452 = vector.broadcast %450 : f32 to vector<2x256xf32>
      %453 = arith.mulf %452, %41 : vector<2x256xf32>
      %454 = vector.broadcast %451 : f32 to vector<2x256xf32>
      %455 = arith.mulf %454, %43 : vector<2x256xf32>
      %456 = arith.addf %453, %455 : vector<2x256xf32>
      %c241_i32 = arith.constant 241 : i32
      %457 = tpu.dynamic_rotate %456 by %c241_i32 dim 1 : vector<2x256xf32>, i32 -> vector<2x256xf32>
      %458 = arith.andi %23, %33 : vector<1x256xi1>
      %cst_65 = arith.constant 0.000000e+00 : f32
      %459 = vector.shape_cast %458 : vector<1x256xi1> to vector<1x256xi1>
      %460 = vector.broadcast %459 : vector<1x256xi1> to vector<2x256xi1>
      %461 = vector.broadcast %cst_65 : f32 to vector<2x256xf32>
      %462 = arith.select %460, %457, %461 : vector<2x256xi1>, vector<2x256xf32>
      %463 = arith.addf %449, %462 : vector<2x256xf32>
      %c31 = arith.constant 31 : index
      %464 = memref.load %arg3[%c31] : memref<98xf32, #tpu.memory_space<smem>>
      %c80 = arith.constant 80 : index
      %465 = memref.load %arg3[%c80] : memref<98xf32, #tpu.memory_space<smem>>
      %466 = vector.broadcast %464 : f32 to vector<2x256xf32>
      %467 = arith.mulf %466, %41 : vector<2x256xf32>
      %468 = vector.broadcast %465 : f32 to vector<2x256xf32>
      %469 = arith.mulf %468, %43 : vector<2x256xf32>
      %470 = arith.addf %467, %469 : vector<2x256xf32>
      %c240_i32_66 = arith.constant 240 : i32
      %471 = tpu.dynamic_rotate %470 by %c240_i32_66 dim 1 : vector<2x256xf32>, i32 -> vector<2x256xf32>
      %cst_67 = arith.constant 0.000000e+00 : f32
      %472 = vector.shape_cast %23 : vector<1x256xi1> to vector<1x256xi1>
      %473 = vector.broadcast %472 : vector<1x256xi1> to vector<2x256xi1>
      %474 = vector.broadcast %cst_67 : f32 to vector<2x256xf32>
      %475 = arith.select %473, %471, %474 : vector<2x256xi1>, vector<2x256xf32>
      %476 = arith.addf %463, %475 : vector<2x256xf32>
      %c32 = arith.constant 32 : index
      %477 = memref.load %arg3[%c32] : memref<98xf32, #tpu.memory_space<smem>>
      %c81 = arith.constant 81 : index
      %478 = memref.load %arg3[%c81] : memref<98xf32, #tpu.memory_space<smem>>
      %479 = vector.broadcast %477 : f32 to vector<2x256xf32>
      %480 = arith.mulf %479, %41 : vector<2x256xf32>
      %481 = vector.broadcast %478 : f32 to vector<2x256xf32>
      %482 = arith.mulf %481, %43 : vector<2x256xf32>
      %483 = arith.addf %480, %482 : vector<2x256xf32>
      %c239_i32 = arith.constant 239 : i32
      %484 = tpu.dynamic_rotate %483 by %c239_i32 dim 1 : vector<2x256xf32>, i32 -> vector<2x256xf32>
      %485 = arith.andi %23, %35 : vector<1x256xi1>
      %cst_68 = arith.constant 0.000000e+00 : f32
      %486 = vector.shape_cast %485 : vector<1x256xi1> to vector<1x256xi1>
      %487 = vector.broadcast %486 : vector<1x256xi1> to vector<2x256xi1>
      %488 = vector.broadcast %cst_68 : f32 to vector<2x256xf32>
      %489 = arith.select %487, %484, %488 : vector<2x256xi1>, vector<2x256xf32>
      %490 = arith.addf %476, %489 : vector<2x256xf32>
      %c33 = arith.constant 33 : index
      %491 = memref.load %arg3[%c33] : memref<98xf32, #tpu.memory_space<smem>>
      %c82 = arith.constant 82 : index
      %492 = memref.load %arg3[%c82] : memref<98xf32, #tpu.memory_space<smem>>
      %493 = vector.broadcast %491 : f32 to vector<2x256xf32>
      %494 = arith.mulf %493, %41 : vector<2x256xf32>
      %495 = vector.broadcast %492 : f32 to vector<2x256xf32>
      %496 = arith.mulf %495, %43 : vector<2x256xf32>
      %497 = arith.addf %494, %496 : vector<2x256xf32>
      %c238_i32 = arith.constant 238 : i32
      %498 = tpu.dynamic_rotate %497 by %c238_i32 dim 1 : vector<2x256xf32>, i32 -> vector<2x256xf32>
      %499 = arith.andi %23, %37 : vector<1x256xi1>
      %cst_69 = arith.constant 0.000000e+00 : f32
      %500 = vector.shape_cast %499 : vector<1x256xi1> to vector<1x256xi1>
      %501 = vector.broadcast %500 : vector<1x256xi1> to vector<2x256xi1>
      %502 = vector.broadcast %cst_69 : f32 to vector<2x256xf32>
      %503 = arith.select %501, %498, %502 : vector<2x256xi1>, vector<2x256xf32>
      %504 = arith.addf %490, %503 : vector<2x256xf32>
      %c34 = arith.constant 34 : index
      %505 = memref.load %arg3[%c34] : memref<98xf32, #tpu.memory_space<smem>>
      %c83 = arith.constant 83 : index
      %506 = memref.load %arg3[%c83] : memref<98xf32, #tpu.memory_space<smem>>
      %507 = vector.broadcast %505 : f32 to vector<2x256xf32>
      %508 = arith.mulf %507, %41 : vector<2x256xf32>
      %509 = vector.broadcast %506 : f32 to vector<2x256xf32>
      %510 = arith.mulf %509, %43 : vector<2x256xf32>
      %511 = arith.addf %508, %510 : vector<2x256xf32>
      %c237_i32 = arith.constant 237 : i32
      %512 = tpu.dynamic_rotate %511 by %c237_i32 dim 1 : vector<2x256xf32>, i32 -> vector<2x256xf32>
      %513 = arith.andi %23, %39 : vector<1x256xi1>
      %cst_70 = arith.constant 0.000000e+00 : f32
      %514 = vector.shape_cast %513 : vector<1x256xi1> to vector<1x256xi1>
      %515 = vector.broadcast %514 : vector<1x256xi1> to vector<2x256xi1>
      %516 = vector.broadcast %cst_70 : f32 to vector<2x256xf32>
      %517 = arith.select %515, %512, %516 : vector<2x256xi1>, vector<2x256xf32>
      %518 = arith.addf %504, %517 : vector<2x256xf32>
      %c35 = arith.constant 35 : index
      %519 = memref.load %arg3[%c35] : memref<98xf32, #tpu.memory_space<smem>>
      %c84 = arith.constant 84 : index
      %520 = memref.load %arg3[%c84] : memref<98xf32, #tpu.memory_space<smem>>
      %521 = vector.broadcast %519 : f32 to vector<2x256xf32>
      %522 = arith.mulf %521, %41 : vector<2x256xf32>
      %523 = vector.broadcast %520 : f32 to vector<2x256xf32>
      %524 = arith.mulf %523, %43 : vector<2x256xf32>
      %525 = arith.addf %522, %524 : vector<2x256xf32>
      %c227_i32 = arith.constant 227 : i32
      %526 = tpu.dynamic_rotate %525 by %c227_i32 dim 1 : vector<2x256xf32>, i32 -> vector<2x256xf32>
      %527 = arith.andi %25, %29 : vector<1x256xi1>
      %cst_71 = arith.constant 0.000000e+00 : f32
      %528 = vector.shape_cast %527 : vector<1x256xi1> to vector<1x256xi1>
      %529 = vector.broadcast %528 : vector<1x256xi1> to vector<2x256xi1>
      %530 = vector.broadcast %cst_71 : f32 to vector<2x256xf32>
      %531 = arith.select %529, %526, %530 : vector<2x256xi1>, vector<2x256xf32>
      %532 = arith.addf %518, %531 : vector<2x256xf32>
      %c36 = arith.constant 36 : index
      %533 = memref.load %arg3[%c36] : memref<98xf32, #tpu.memory_space<smem>>
      %c85 = arith.constant 85 : index
      %534 = memref.load %arg3[%c85] : memref<98xf32, #tpu.memory_space<smem>>
      %535 = vector.broadcast %533 : f32 to vector<2x256xf32>
      %536 = arith.mulf %535, %41 : vector<2x256xf32>
      %537 = vector.broadcast %534 : f32 to vector<2x256xf32>
      %538 = arith.mulf %537, %43 : vector<2x256xf32>
      %539 = arith.addf %536, %538 : vector<2x256xf32>
      %c226_i32 = arith.constant 226 : i32
      %540 = tpu.dynamic_rotate %539 by %c226_i32 dim 1 : vector<2x256xf32>, i32 -> vector<2x256xf32>
      %541 = arith.andi %25, %31 : vector<1x256xi1>
      %cst_72 = arith.constant 0.000000e+00 : f32
      %542 = vector.shape_cast %541 : vector<1x256xi1> to vector<1x256xi1>
      %543 = vector.broadcast %542 : vector<1x256xi1> to vector<2x256xi1>
      %544 = vector.broadcast %cst_72 : f32 to vector<2x256xf32>
      %545 = arith.select %543, %540, %544 : vector<2x256xi1>, vector<2x256xf32>
      %546 = arith.addf %532, %545 : vector<2x256xf32>
      %c37 = arith.constant 37 : index
      %547 = memref.load %arg3[%c37] : memref<98xf32, #tpu.memory_space<smem>>
      %c86 = arith.constant 86 : index
      %548 = memref.load %arg3[%c86] : memref<98xf32, #tpu.memory_space<smem>>
      %549 = vector.broadcast %547 : f32 to vector<2x256xf32>
      %550 = arith.mulf %549, %41 : vector<2x256xf32>
      %551 = vector.broadcast %548 : f32 to vector<2x256xf32>
      %552 = arith.mulf %551, %43 : vector<2x256xf32>
      %553 = arith.addf %550, %552 : vector<2x256xf32>
      %c225_i32 = arith.constant 225 : i32
      %554 = tpu.dynamic_rotate %553 by %c225_i32 dim 1 : vector<2x256xf32>, i32 -> vector<2x256xf32>
      %555 = arith.andi %25, %33 : vector<1x256xi1>
      %cst_73 = arith.constant 0.000000e+00 : f32
      %556 = vector.shape_cast %555 : vector<1x256xi1> to vector<1x256xi1>
      %557 = vector.broadcast %556 : vector<1x256xi1> to vector<2x256xi1>
      %558 = vector.broadcast %cst_73 : f32 to vector<2x256xf32>
      %559 = arith.select %557, %554, %558 : vector<2x256xi1>, vector<2x256xf32>
      %560 = arith.addf %546, %559 : vector<2x256xf32>
      %c38 = arith.constant 38 : index
      %561 = memref.load %arg3[%c38] : memref<98xf32, #tpu.memory_space<smem>>
      %c87 = arith.constant 87 : index
      %562 = memref.load %arg3[%c87] : memref<98xf32, #tpu.memory_space<smem>>
      %563 = vector.broadcast %561 : f32 to vector<2x256xf32>
      %564 = arith.mulf %563, %41 : vector<2x256xf32>
      %565 = vector.broadcast %562 : f32 to vector<2x256xf32>
      %566 = arith.mulf %565, %43 : vector<2x256xf32>
      %567 = arith.addf %564, %566 : vector<2x256xf32>
      %c224_i32_74 = arith.constant 224 : i32
      %568 = tpu.dynamic_rotate %567 by %c224_i32_74 dim 1 : vector<2x256xf32>, i32 -> vector<2x256xf32>
      %cst_75 = arith.constant 0.000000e+00 : f32
      %569 = vector.shape_cast %25 : vector<1x256xi1> to vector<1x256xi1>
      %570 = vector.broadcast %569 : vector<1x256xi1> to vector<2x256xi1>
      %571 = vector.broadcast %cst_75 : f32 to vector<2x256xf32>
      %572 = arith.select %570, %568, %571 : vector<2x256xi1>, vector<2x256xf32>
      %573 = arith.addf %560, %572 : vector<2x256xf32>
      %c39 = arith.constant 39 : index
      %574 = memref.load %arg3[%c39] : memref<98xf32, #tpu.memory_space<smem>>
      %c88 = arith.constant 88 : index
      %575 = memref.load %arg3[%c88] : memref<98xf32, #tpu.memory_space<smem>>
      %576 = vector.broadcast %574 : f32 to vector<2x256xf32>
      %577 = arith.mulf %576, %41 : vector<2x256xf32>
      %578 = vector.broadcast %575 : f32 to vector<2x256xf32>
      %579 = arith.mulf %578, %43 : vector<2x256xf32>
      %580 = arith.addf %577, %579 : vector<2x256xf32>
      %c223_i32 = arith.constant 223 : i32
      %581 = tpu.dynamic_rotate %580 by %c223_i32 dim 1 : vector<2x256xf32>, i32 -> vector<2x256xf32>
      %582 = arith.andi %25, %35 : vector<1x256xi1>
      %cst_76 = arith.constant 0.000000e+00 : f32
      %583 = vector.shape_cast %582 : vector<1x256xi1> to vector<1x256xi1>
      %584 = vector.broadcast %583 : vector<1x256xi1> to vector<2x256xi1>
      %585 = vector.broadcast %cst_76 : f32 to vector<2x256xf32>
      %586 = arith.select %584, %581, %585 : vector<2x256xi1>, vector<2x256xf32>
      %587 = arith.addf %573, %586 : vector<2x256xf32>
      %c40 = arith.constant 40 : index
      %588 = memref.load %arg3[%c40] : memref<98xf32, #tpu.memory_space<smem>>
      %c89 = arith.constant 89 : index
      %589 = memref.load %arg3[%c89] : memref<98xf32, #tpu.memory_space<smem>>
      %590 = vector.broadcast %588 : f32 to vector<2x256xf32>
      %591 = arith.mulf %590, %41 : vector<2x256xf32>
      %592 = vector.broadcast %589 : f32 to vector<2x256xf32>
      %593 = arith.mulf %592, %43 : vector<2x256xf32>
      %594 = arith.addf %591, %593 : vector<2x256xf32>
      %c222_i32 = arith.constant 222 : i32
      %595 = tpu.dynamic_rotate %594 by %c222_i32 dim 1 : vector<2x256xf32>, i32 -> vector<2x256xf32>
      %596 = arith.andi %25, %37 : vector<1x256xi1>
      %cst_77 = arith.constant 0.000000e+00 : f32
      %597 = vector.shape_cast %596 : vector<1x256xi1> to vector<1x256xi1>
      %598 = vector.broadcast %597 : vector<1x256xi1> to vector<2x256xi1>
      %599 = vector.broadcast %cst_77 : f32 to vector<2x256xf32>
      %600 = arith.select %598, %595, %599 : vector<2x256xi1>, vector<2x256xf32>
      %601 = arith.addf %587, %600 : vector<2x256xf32>
      %c41 = arith.constant 41 : index
      %602 = memref.load %arg3[%c41] : memref<98xf32, #tpu.memory_space<smem>>
      %c90 = arith.constant 90 : index
      %603 = memref.load %arg3[%c90] : memref<98xf32, #tpu.memory_space<smem>>
      %604 = vector.broadcast %602 : f32 to vector<2x256xf32>
      %605 = arith.mulf %604, %41 : vector<2x256xf32>
      %606 = vector.broadcast %603 : f32 to vector<2x256xf32>
      %607 = arith.mulf %606, %43 : vector<2x256xf32>
      %608 = arith.addf %605, %607 : vector<2x256xf32>
      %c221_i32 = arith.constant 221 : i32
      %609 = tpu.dynamic_rotate %608 by %c221_i32 dim 1 : vector<2x256xf32>, i32 -> vector<2x256xf32>
      %610 = arith.andi %25, %39 : vector<1x256xi1>
      %cst_78 = arith.constant 0.000000e+00 : f32
      %611 = vector.shape_cast %610 : vector<1x256xi1> to vector<1x256xi1>
      %612 = vector.broadcast %611 : vector<1x256xi1> to vector<2x256xi1>
      %613 = vector.broadcast %cst_78 : f32 to vector<2x256xf32>
      %614 = arith.select %612, %609, %613 : vector<2x256xi1>, vector<2x256xf32>
      %615 = arith.addf %601, %614 : vector<2x256xf32>
      %c42 = arith.constant 42 : index
      %616 = memref.load %arg3[%c42] : memref<98xf32, #tpu.memory_space<smem>>
      %c91 = arith.constant 91 : index
      %617 = memref.load %arg3[%c91] : memref<98xf32, #tpu.memory_space<smem>>
      %618 = vector.broadcast %616 : f32 to vector<2x256xf32>
      %619 = arith.mulf %618, %41 : vector<2x256xf32>
      %620 = vector.broadcast %617 : f32 to vector<2x256xf32>
      %621 = arith.mulf %620, %43 : vector<2x256xf32>
      %622 = arith.addf %619, %621 : vector<2x256xf32>
      %c211_i32 = arith.constant 211 : i32
      %623 = tpu.dynamic_rotate %622 by %c211_i32 dim 1 : vector<2x256xf32>, i32 -> vector<2x256xf32>
      %624 = arith.andi %27, %29 : vector<1x256xi1>
      %cst_79 = arith.constant 0.000000e+00 : f32
      %625 = vector.shape_cast %624 : vector<1x256xi1> to vector<1x256xi1>
      %626 = vector.broadcast %625 : vector<1x256xi1> to vector<2x256xi1>
      %627 = vector.broadcast %cst_79 : f32 to vector<2x256xf32>
      %628 = arith.select %626, %623, %627 : vector<2x256xi1>, vector<2x256xf32>
      %629 = arith.addf %615, %628 : vector<2x256xf32>
      %c43 = arith.constant 43 : index
      %630 = memref.load %arg3[%c43] : memref<98xf32, #tpu.memory_space<smem>>
      %c92 = arith.constant 92 : index
      %631 = memref.load %arg3[%c92] : memref<98xf32, #tpu.memory_space<smem>>
      %632 = vector.broadcast %630 : f32 to vector<2x256xf32>
      %633 = arith.mulf %632, %41 : vector<2x256xf32>
      %634 = vector.broadcast %631 : f32 to vector<2x256xf32>
      %635 = arith.mulf %634, %43 : vector<2x256xf32>
      %636 = arith.addf %633, %635 : vector<2x256xf32>
      %c210_i32 = arith.constant 210 : i32
      %637 = tpu.dynamic_rotate %636 by %c210_i32 dim 1 : vector<2x256xf32>, i32 -> vector<2x256xf32>
      %638 = arith.andi %27, %31 : vector<1x256xi1>
      %cst_80 = arith.constant 0.000000e+00 : f32
      %639 = vector.shape_cast %638 : vector<1x256xi1> to vector<1x256xi1>
      %640 = vector.broadcast %639 : vector<1x256xi1> to vector<2x256xi1>
      %641 = vector.broadcast %cst_80 : f32 to vector<2x256xf32>
      %642 = arith.select %640, %637, %641 : vector<2x256xi1>, vector<2x256xf32>
      %643 = arith.addf %629, %642 : vector<2x256xf32>
      %c44 = arith.constant 44 : index
      %644 = memref.load %arg3[%c44] : memref<98xf32, #tpu.memory_space<smem>>
      %c93 = arith.constant 93 : index
      %645 = memref.load %arg3[%c93] : memref<98xf32, #tpu.memory_space<smem>>
      %646 = vector.broadcast %644 : f32 to vector<2x256xf32>
      %647 = arith.mulf %646, %41 : vector<2x256xf32>
      %648 = vector.broadcast %645 : f32 to vector<2x256xf32>
      %649 = arith.mulf %648, %43 : vector<2x256xf32>
      %650 = arith.addf %647, %649 : vector<2x256xf32>
      %c209_i32 = arith.constant 209 : i32
      %651 = tpu.dynamic_rotate %650 by %c209_i32 dim 1 : vector<2x256xf32>, i32 -> vector<2x256xf32>
      %652 = arith.andi %27, %33 : vector<1x256xi1>
      %cst_81 = arith.constant 0.000000e+00 : f32
      %653 = vector.shape_cast %652 : vector<1x256xi1> to vector<1x256xi1>
      %654 = vector.broadcast %653 : vector<1x256xi1> to vector<2x256xi1>
      %655 = vector.broadcast %cst_81 : f32 to vector<2x256xf32>
      %656 = arith.select %654, %651, %655 : vector<2x256xi1>, vector<2x256xf32>
      %657 = arith.addf %643, %656 : vector<2x256xf32>
      %c45 = arith.constant 45 : index
      %658 = memref.load %arg3[%c45] : memref<98xf32, #tpu.memory_space<smem>>
      %c94 = arith.constant 94 : index
      %659 = memref.load %arg3[%c94] : memref<98xf32, #tpu.memory_space<smem>>
      %660 = vector.broadcast %658 : f32 to vector<2x256xf32>
      %661 = arith.mulf %660, %41 : vector<2x256xf32>
      %662 = vector.broadcast %659 : f32 to vector<2x256xf32>
      %663 = arith.mulf %662, %43 : vector<2x256xf32>
      %664 = arith.addf %661, %663 : vector<2x256xf32>
      %c208_i32_82 = arith.constant 208 : i32
      %665 = tpu.dynamic_rotate %664 by %c208_i32_82 dim 1 : vector<2x256xf32>, i32 -> vector<2x256xf32>
      %cst_83 = arith.constant 0.000000e+00 : f32
      %666 = vector.shape_cast %27 : vector<1x256xi1> to vector<1x256xi1>
      %667 = vector.broadcast %666 : vector<1x256xi1> to vector<2x256xi1>
      %668 = vector.broadcast %cst_83 : f32 to vector<2x256xf32>
      %669 = arith.select %667, %665, %668 : vector<2x256xi1>, vector<2x256xf32>
      %670 = arith.addf %657, %669 : vector<2x256xf32>
      %c46 = arith.constant 46 : index
      %671 = memref.load %arg3[%c46] : memref<98xf32, #tpu.memory_space<smem>>
      %c95 = arith.constant 95 : index
      %672 = memref.load %arg3[%c95] : memref<98xf32, #tpu.memory_space<smem>>
      %673 = vector.broadcast %671 : f32 to vector<2x256xf32>
      %674 = arith.mulf %673, %41 : vector<2x256xf32>
      %675 = vector.broadcast %672 : f32 to vector<2x256xf32>
      %676 = arith.mulf %675, %43 : vector<2x256xf32>
      %677 = arith.addf %674, %676 : vector<2x256xf32>
      %c207_i32 = arith.constant 207 : i32
      %678 = tpu.dynamic_rotate %677 by %c207_i32 dim 1 : vector<2x256xf32>, i32 -> vector<2x256xf32>
      %679 = arith.andi %27, %35 : vector<1x256xi1>
      %cst_84 = arith.constant 0.000000e+00 : f32
      %680 = vector.shape_cast %679 : vector<1x256xi1> to vector<1x256xi1>
      %681 = vector.broadcast %680 : vector<1x256xi1> to vector<2x256xi1>
      %682 = vector.broadcast %cst_84 : f32 to vector<2x256xf32>
      %683 = arith.select %681, %678, %682 : vector<2x256xi1>, vector<2x256xf32>
      %684 = arith.addf %670, %683 : vector<2x256xf32>
      %c47 = arith.constant 47 : index
      %685 = memref.load %arg3[%c47] : memref<98xf32, #tpu.memory_space<smem>>
      %c96 = arith.constant 96 : index
      %686 = memref.load %arg3[%c96] : memref<98xf32, #tpu.memory_space<smem>>
      %687 = vector.broadcast %685 : f32 to vector<2x256xf32>
      %688 = arith.mulf %687, %41 : vector<2x256xf32>
      %689 = vector.broadcast %686 : f32 to vector<2x256xf32>
      %690 = arith.mulf %689, %43 : vector<2x256xf32>
      %691 = arith.addf %688, %690 : vector<2x256xf32>
      %c206_i32 = arith.constant 206 : i32
      %692 = tpu.dynamic_rotate %691 by %c206_i32 dim 1 : vector<2x256xf32>, i32 -> vector<2x256xf32>
      %693 = arith.andi %27, %37 : vector<1x256xi1>
      %cst_85 = arith.constant 0.000000e+00 : f32
      %694 = vector.shape_cast %693 : vector<1x256xi1> to vector<1x256xi1>
      %695 = vector.broadcast %694 : vector<1x256xi1> to vector<2x256xi1>
      %696 = vector.broadcast %cst_85 : f32 to vector<2x256xf32>
      %697 = arith.select %695, %692, %696 : vector<2x256xi1>, vector<2x256xf32>
      %698 = arith.addf %684, %697 : vector<2x256xf32>
      %c48 = arith.constant 48 : index
      %699 = memref.load %arg3[%c48] : memref<98xf32, #tpu.memory_space<smem>>
      %c97 = arith.constant 97 : index
      %700 = memref.load %arg3[%c97] : memref<98xf32, #tpu.memory_space<smem>>
      %701 = vector.broadcast %699 : f32 to vector<2x256xf32>
      %702 = arith.mulf %701, %41 : vector<2x256xf32>
      %703 = vector.broadcast %700 : f32 to vector<2x256xf32>
      %704 = arith.mulf %703, %43 : vector<2x256xf32>
      %705 = arith.addf %702, %704 : vector<2x256xf32>
      %c205_i32 = arith.constant 205 : i32
      %706 = tpu.dynamic_rotate %705 by %c205_i32 dim 1 : vector<2x256xf32>, i32 -> vector<2x256xf32>
      %707 = arith.andi %27, %39 : vector<1x256xi1>
      %cst_86 = arith.constant 0.000000e+00 : f32
      %708 = vector.shape_cast %707 : vector<1x256xi1> to vector<1x256xi1>
      %709 = vector.broadcast %708 : vector<1x256xi1> to vector<2x256xi1>
      %710 = vector.broadcast %cst_86 : f32 to vector<2x256xf32>
      %711 = arith.select %709, %706, %710 : vector<2x256xi1>, vector<2x256xf32>
      %712 = arith.addf %698, %711 : vector<2x256xf32>
      %713 = arith.negf %712 : vector<2x256xf32>
      %714 = math.exp %713 : vector<2x256xf32>
      %cst_87 = arith.constant 1.000000e+00 : f32
      %715 = vector.broadcast %cst_87 : f32 to vector<2x256xf32>
      %716 = arith.addf %715, %714 : vector<2x256xf32>
      %717 = arith.divf %715, %716 : vector<2x256xf32>
      %c0_88 = arith.constant 0 : index
      %c0_89 = arith.constant 0 : index
      %718 = vector.load %arg4[%c0_88, %c0_89] : memref<2x256xf32, #tpu.memory_space<vmem>>, vector<2x256xf32>
      tpu.vector_store %arg4[%c0_88, %c0_89], %717 {strides = array<i32>} : memref<2x256xf32, #tpu.memory_space<vmem>>, vector<2x256xf32>,
    } else {
    }
    return
  }
  func.func @transform_0(%arg0: i32, %arg1: i32) -> (i32, i32, i32) {
    %c0_i32 = arith.constant 0 : i32
    %c0_i32_0 = arith.constant 0 : i32
    return %arg0, %arg1, %c0_i32 : i32, i32, i32
  }
  func.func @transform_1(%arg0: i32, %arg1: i32) -> i32 {
    %c0_i32 = arith.constant 0 : i32
    %c0_i32_0 = arith.constant 0 : i32
    return %c0_i32 : i32
  }
  func.func @transform_2(%arg0: i32, %arg1: i32) -> (i32, i32) {
    %c0_i32 = arith.constant 0 : i32
    %c0_i32_0 = arith.constant 0 : i32
    return %arg0, %c0_i32 : i32, i32
  }
}

</mosaic_0001>

<bundles_post_ra>
// kernel: tpu_custom_call.1
= control target key start
LH: loop header
LB: loop body
LE: loop exit
PB: predicated region body
PF: predicated region fallthrough
CT: control target
= control target key end

     0   :  { %7 = vsyncpa [#allocation5], 0  ;;  %s4316_s0 = inlined_call_operand.hbm [shape: f32[2,4,256], index: 0, kind: input, shape index: {}]   ;;  %s4317_s1 = inlined_call_operand.vmem [shape: f32[98], index: 1, kind: input, shape index: {}]   ;;  %s4318_s2 = inlined_call_operand.hbm [shape: f32[2,256], index: 2, kind: output, shape index: {}]  }
   0x1   :  { %8 = vsyncpa [#allocation7], 0 }
   0x2   :  { %9 = vsyncpa [#allocation6], 0  ;;  %s2398_s9 = smov [#allocation4]   ;;  %s28_s13 = sshll.u32 %s4317_s1, 4  ;;  %s29_s13 = int_to_ptr.vmem [resolvable:$true] %s28_s13 }
   0x3   :  { %s15_s10 = sshll.u32 %s2398_s9, 4  ;;  %s16_s10 = int_to_ptr.vmem [resolvable:$true] %s15_s10 }
   0x4   :  { %s2348_s14 = scalar_lea.vmem %s16_s10, 256  ;;  %p2353_p1 = scmp.lt.s32.totalorder %s16_s10, %s16_s10 }
   0x5   :  { %p2349_p0 = scmp.ne.s32.totalorder %s16_s10, %s2348_s14  ;;  %p2354_p2 = scmp.lt.s32.totalorder %s2348_s14, %s2348_s14 }
   0x7   :  { %p2355_p3 = por %p2354_p2, %p2353_p1 }
   0x9   :  { %p2356_p4 = pnand %p2355_p3, %p2349_p0 }
   0xb   :  { %2359 = shalt.err (!%p2356_p4)
}
   0xc   :  { %s2399_s15 = smov 128   ;;  %s2400_s16 = smov 8  }
   0xd   :  { %21 = dma.hbm_to_vmem [thread:$0]  %s4316_s0, 256, %s16_s10, [#allocation5], %s2399_s15, %s2399_s15, %s2400_s16  }
   0xe   :  { %s2360_s19 = scalar_lea.vmem %s29_s13, 16  ;;  %p2365_p6 = scmp.lt.s32.totalorder %s29_s13, %s29_s13 }
   0xf   :  { %p2361_p5 = scmp.ne.s32.totalorder %s29_s13, %s2360_s19  ;;  %p2366_p7 = scmp.lt.s32.totalorder %s2360_s19, %s2360_s19 }
  0x11   :  { %p2367_p8 = por %p2366_p7, %p2365_p6 }
  0x13   :  { %p2368_p9 = pnand %p2367_p8, %p2361_p5 }
  0x15   :  { %2371 = shalt.err (!%p2368_p9)
}
  0x16   :  { %s2401_s1 = smov [#allocation8]  }
  0x17   :  { %31 = dma.vmem_to_smem %s29_s13, 16, %s2401_s1, [#allocation7]  }
  0x18   :  { %2392 = dma.done.wait [#allocation5], 256  }
  0x19   :  { %2393 = vsyncadd [#allocation5], 4294967040 }
  0x1a   :  { %2394 = dma.done.wait [#allocation7], 16  }
  0x1b   :  { %2395 = vsyncadd [#allocation7], 4294967280 }
  0x1c   :  { %38 = sfence }
  0x1d   :  { %v47_v0 = vld [vmem:[#allocation4] sm:$0xff]  ;;  %v48_v1 = vld [vmem:[#allocation4 + $0x8] sm:$0xff]  ;;  %vm101_vm0 = vcmask 1043456   ;;  %s2178_s20 = sld [smem:[#allocation8 + $0x1]]  ;;  %vm4320_vm1 = vcmask 1041409   ;;  %s2402_s29 = smov 50  }
  0x1e   :  { %v102_v2 = vsel %vm101_vm0, %v47_v0, 0.0  ;;  %v116_v3 = vsel %vm101_vm0, %v48_v1, 0.0  ;;  %v138_v4 = vsel %vm101_vm0, %v47_v0, -inf  ;;  %v152_v5 = vsel %vm101_vm0, %v48_v1, -inf  ;;  %s2179_s0 = sld [smem:[#allocation8 + $0x32]]  ;;  %s2403_s30 = smov 51  }
  0x1f   :  { %v103_v6 = vrot.slane %v102_v2, 4  ;;  %v117_v7 = vrot.slane %v116_v3, 4  ;;  %v139_v8 = vrot.slane %v138_v4, 4  ;;  %v153_v9 = vrot.slane %v152_v5, 4  ;;  %s166_s21 = sld [smem:[#allocation8]]  ;;  %s2404_s5 = smov 49  }
  0x20   :  { %v97_v10 = vcombine.high %v47_v0, %v47_v0  ;;  %v98_v11 = vcombine.high %v48_v1, %v48_v1  ;;  %s2177_s22 = sld [smem:[#allocation8 + $0x31]]  ;;  %s2405_s6 = smov 48  }
  0x21   :  { %v104_v12 = vadd.f32 %v103_v6, %v102_v2  ;;  %v118_v13 = vadd.f32 %v117_v7, %v116_v3  ;;  %v140_v14 = vmax.f32 %v138_v4, %v139_v8  ;;  %v154_v15 = vmax.f32 %v152_v5, %v153_v9  ;;  %s2180_s23 = sld [smem:[#allocation8 + $0x2]]  ;;  %s2406_s8 = smov 47  }
  0x22   :  { %v109_v16 = vsel %vm101_vm0, %v97_v10, 0.0  ;;  %v123_v17 = vsel %vm101_vm0, %v98_v11, 0.0  ;;  %v145_v18 = vsel %vm101_vm0, %v97_v10, -inf  ;;  %v2480_v19 = vsel %vm101_vm0, %v98_v11, -inf  ;;  %s2181_s24 = sld [smem:[#allocation8 + $0x33]]  ;;  %s2407_s12 = smov 46  }
  0x23   :  { %v105_v20 = vrot.slane %v104_v12, 2  ;;  %v119_v21 = vrot.slane %v118_v13, 2  ;;  %v141_v22 = vrot.slane %v140_v14, 2  ;;  %v155_v23 = vrot.slane %v154_v15, 2  ;;  %s2500_s25 = sld [smem:[#allocation8 + $0x3]]  ;;  %s2408_s19 = smov 45  }
  0x24   :  { %v2482_v24 = vstv %s2178_s20  ;;  %v2484_v25 = vstv %s2179_s0  ;;  %v110_v26 = vrot.slane %v109_v16, 4  ;;  %v124_v27 = vrot.slane %v123_v17, 4  ;;  %s2512_s26 = sld [smem:[#allocation8 + $0x34]]  ;;  %s2409_s20 = smov 35  }
  0x25   :  { %v106_v28 = vadd.f32 %v105_v20, %v104_v12  ;;  %v120_v29 = vadd.f32 %v119_v21, %v118_v13  ;;  %v142_v30 = vmax.f32 %v140_v14, %v141_v22  ;;  %v156_v31 = vmax.f32 %v154_v15, %v155_v23  ;;  %s2522_s27 = sld [smem:[#allocation8 + $0x4]] }
  0x26   :  { %v2486_v32 = vstv %s166_s21  ;;  %v111_v33 = vadd.f32 %v110_v26, %v109_v16  ;;  %v125_v34 = vadd.f32 %v124_v27, %v123_v17  ;;  %v146_v35 = vrot.slane %v145_v18, 4  ;;  %s2528_s28 = sld [smem:[#allocation8 + $0x35]] }
  0x27   :  { %v107_v36 = vrot.slane %v106_v28, 1  ;;  %v121_v37 = vrot.slane %v120_v29, 1  ;;  %v143_v38 = vrot.slane %v142_v30, 1  ;;  %v157_v39 = vrot.slane %v156_v31, 1  ;;  %s2548_s3 = sld [smem:[#allocation8 + $0x5]] }
  0x28   :  { %v2488_v40 = vstv %s2177_s22  ;;  %v2490_v41 = vstv %s2180_s23  ;;  %v112_v42 = vrot.slane %v111_v33, 2  ;;  %v126_v43 = vrot.slane %v125_v34, 2  ;;  %s2553_s4 = sld [smem:[#allocation8 + $0x36]]  ;;  %s2410_s22 = smov 34  }
  0x29   :  { %v2492_v44 = vadd.f32 %v107_v36, %v106_v28  ;;  %v2494_v45 = vadd.f32 %v121_v37, %v120_v29  ;;  %v2496_v46 = vmax.f32 %v142_v30, %v143_v38  ;;  %v2498_v47 = vmax.f32 %v156_v31, %v157_v39  ;;  %s2587_s7 = sld [smem:[#allocation8 + $0x6]] }
  0x2a   :  { %v2502_v48 = vstv %s2181_s24  ;;  %v113_v49 = vadd.f32 %v112_v42, %v111_v33  ;;  %v127_v50 = vadd.f32 %v126_v43, %v125_v34  ;;  %v147_v51 = vmax.f32 %v145_v18, %v146_v35  ;;  %s2599_s9 = sld [smem:[#allocation8 + $0x37]] }
  0x2b   :  { %v211_v52 = vmul.f32 %v2482_v24, %v2492_v44  ;;  %v213_v53 = vmul.f32 %v2482_v24, %v2494_v45  ;;  %v216_v54 = vmul.f32 %v2484_v25, %v2496_v46  ;;  %v218_v55 = vmul.f32 %v2484_v25, %v2498_v47  ;;  %s2603_s10 = sld [smem:[#allocation8 + $0x7]] }
  0x2c   :  { %v169_v56 = vmul.f32 %v2486_v32, %v2492_v44  ;;  %v171_v57 = vmul.f32 %v2486_v32, %v2494_v45  ;;  %v174_v58 = vmul.f32 %v2488_v40, %v2496_v46  ;;  %v176_v59 = vmul.f32 %v2488_v40, %v2498_v47  ;;  %s2607_s11 = sld [smem:[#allocation8 + $0x38]] }
  0x2d   :  { %v220_v60 = vadd.f32 %v216_v54, %v211_v52  ;;  %v222_v61 = vadd.f32 %v218_v55, %v213_v53  ;;  %v252_v62 = vmul.f32 %v2490_v41, %v2492_v44  ;;  %v254_v63 = vmul.f32 %v2490_v41, %v2494_v45  ;;  %s2623_s13 = sld [smem:[#allocation8 + $0x8]] }
  0x2e   :  { %v178_v0 = vadd.f32 %v174_v58, %v169_v56  ;;  %v180_v1 = vadd.f32 %v176_v59, %v171_v57  ;;  %v257_v2 = vmul.f32 %v2502_v48, %v2496_v46  ;;  %v259_v3 = vmul.f32 %v2502_v48, %v2498_v47  ;;  %s2628_s14 = sld [smem:[#allocation8 + $0x39]] }
  0x2f   :  { %v228_v4 = vsel %vm4320_vm1, %v222_v61, %v220_v60  ;;  %v114_v5 = vrot.slane %v113_v49, 1  ;;  %v128_v6 = vrot.slane %v127_v50, 1  ;;  %v148_v7 = vrot.slane %v147_v51, 2  ;;  %s2632_s15 = sld [smem:[#allocation8 + $0x9]] }
  0x30   :  { %232 = vrot.lane.b32.xlu1 %v228_v4, %s2402_s29  ;;  %v187_v8 = vsel %vm4320_vm1, %v180_v1, %v178_v0  ;;  %v261_v9 = vadd.f32 %v257_v2, %v252_v62  ;;  %v263_v10 = vadd.f32 %v259_v3, %v254_v63  ;;  %v160_v11 = vrot.slane %v2480_v19, 4  ;;  %s2648_s16 = sld [smem:[#allocation8 + $0x3a]] }
  0x31   :  { %191 = vrot.lane.b32.xlu0 %v187_v8, %s2403_s30  ;;  %v2539_v12 = vadd.f32 %v114_v5, %v113_v49  ;;  %v2541_v13 = vadd.f32 %v128_v6, %v127_v50  ;;  %v149_v14 = vmax.f32 %v147_v51, %v148_v7  ;;  %v292_v15 = vstv %s2500_s25  ;;  %s2658_s17 = sld [smem:[#allocation8 + $0xa]]  ;;  %s2411_s25 = smov 33  }
  0x32   :  { %v269_v16 = vsel %vm4320_vm1, %v263_v10, %v261_v9  ;;  %v161_v17 = vmax.f32 %v2480_v19, %v160_v11  ;;  %v293_v18 = vmul.f32 %v292_v15, %v2492_v44  ;;  %v295_v20 = vmul.f32 %v292_v15, %v2494_v45  ;;  %s2664_s18 = sld [smem:[#allocation8 + $0x3b]] }
  0x33   :  { %v150_v21 = vrot.slane %v149_v14, 1  ;;  %v212_v22 = vmul.f32 %v2482_v24, %v2539_v12  ;;  %v297_v23 = vstv %s2512_s26  ;;  %v214_v27 = vmul.f32 %v2482_v24, %v2541_v13  ;;  %s2670_s1 = sld [smem:[#allocation8 + $0xb]] }
  0x34   :  { %v162_v26 = vrot.slane %v161_v17, 2  ;;  %v298_v19 = vmul.f32 %v297_v23, %v2496_v46  ;;  %v300_v28 = vmul.f32 %v297_v23, %v2498_v47  ;;  %v253_v30 = vmul.f32 %v2490_v41, %v2539_v12  ;;  %s2686_s0 = sld [smem:[#allocation8 + $0x3c]] }
  0x35   :  { %273 = vrot.lane.b32.xlu0 %v269_v16, %s2404_s5  ;;  %v2560_v29 = vmax.f32 %v149_v14, %v150_v21  ;;  %v331_v31 = vstv %s2522_s27  ;;  %v336_v33 = vstv %s2528_s28  ;;  %v255_v50 = vmul.f32 %v2490_v41, %v2541_v13  ;;  %s2696_s21 = sld [smem:[#allocation8 + $0xc]] }
  0x36   :  { %v163_v34 = vmax.f32 %v161_v17, %v162_v26  ;;  %v302_v35 = vadd.f32 %v298_v19, %v293_v18  ;;  %v304_v36 = vadd.f32 %v300_v28, %v295_v20  ;;  %v332_v37 = vmul.f32 %v331_v31, %v2492_v44  ;;  %s2702_s23 = sld [smem:[#allocation8 + $0x3d]] }
  0x37   :  { %v217_v24 = vmul.f32 %v2484_v25, %v2560_v29  ;;  %v258_v38 = vmul.f32 %v2502_v48, %v2560_v29  ;;  %v334_v39 = vmul.f32 %v331_v31, %v2494_v45  ;;  %v337_v42 = vmul.f32 %v336_v33, %v2496_v46  ;;  %s2708_s24 = sld [smem:[#allocation8 + $0xd]] }
  0x38   :  { %v164_v43 = vrot.slane %v163_v34, 1  ;;  %v310_v49 = vsel %vm4320_vm1, %v304_v36, %v302_v35  ;;  %v339_v51 = vmul.f32 %v336_v33, %v2498_v47  ;;  %v294_v55 = vmul.f32 %v292_v15, %v2539_v12  ;;  %s2723_s26 = sld [smem:[#allocation8 + $0x3e]] }
  0x39   :  { %v221_v52 = vadd.f32 %v217_v24, %v212_v22  ;;  %314 = vrot.lane.b32.xlu0 %v310_v49, %s2405_s6  ;;  %v262_v53 = vadd.f32 %v258_v38, %v253_v30  ;;  %v341_v54 = vadd.f32 %v337_v42, %v332_v37  ;;  %v296_v58 = vmul.f32 %v292_v15, %v2541_v13  ;;  %s2731_s27 = sld [smem:[#allocation8 + $0xe]] }
  0x3a   :  { %v2579_v56 = vmax.f32 %v163_v34, %v164_v43  ;;  %v343_v57 = vadd.f32 %v339_v51, %v334_v39  ;;  %v372_v59 = vstv %s2548_s3  ;;  %v299_v60 = vmul.f32 %v297_v23, %v2560_v29  ;;  %s2735_s28 = sld [smem:[#allocation8 + $0x3f]]  ;;  %s2413_s3 = smov 31  }
  0x3b   :  { %v373_v41 = vmul.f32 %v372_v59, %v2492_v44  ;;  %v375_v61 = vmul.f32 %v372_v59, %v2494_v45  ;;  %v377_v62 = vstv %s2553_s4  ;;  %v333_v5 = vmul.f32 %v331_v31, %v2539_v12  ;;  %s2757_s4 = sld [smem:[#allocation8 + $0x40]] }
  0x3c   :  { %v219_v63 = vmul.f32 %v2484_v25, %v2579_v56  ;;  %v260_v0 = vmul.f32 %v2502_v48, %v2579_v56  ;;  %v349_v1 = vsel %vm4320_vm1, %v343_v57, %v341_v54  ;;  %v301_v2 = vmul.f32 %v297_v23, %v2579_v56 }
  0x3d   :  { %353 = vrot.lane.b32.xlu0 %v349_v1, %s2406_s8  ;;  %v378_v3 = vmul.f32 %v377_v62, %v2496_v46  ;;  %v380_v4 = vmul.f32 %v377_v62, %v2498_v47  ;;  %v335_v7 = vmul.f32 %v331_v31, %v2541_v13  ;;  %v338_v48 = vmul.f32 %v336_v33, %v2560_v29 }
  0x3e   :  { %v223_v6 = vadd.f32 %v219_v63, %v214_v27  ;;  %v264_v25 = vadd.f32 %v260_v0, %v255_v50  ;;  %v340_v10 = vmul.f32 %v336_v33, %v2579_v56  ;;  %v374_v11 = vmul.f32 %v372_v59, %v2539_v12 }
  0x3f   :  { %v382_v8 = vadd.f32 %v378_v3, %v373_v41  ;;  %v384_v9 = vadd.f32 %v380_v4, %v375_v61  ;;  %v303_v16 = vadd.f32 %v299_v60, %v294_v55  ;;  %v305_v17 = vadd.f32 %v301_v2, %v296_v58 }
  0x40   :  { %v229_v14 = vsel %vm4320_vm1, %v223_v6, %v221_v52  ;;  %v270_v15 = vsel %vm4320_vm1, %v264_v25, %v262_v53  ;;  %v342_v20 = vadd.f32 %v338_v48, %v333_v5  ;;  %v376_v21 = vmul.f32 %v372_v59, %v2541_v13 }
  0x41   :  { %234 = vrot.lane.b32.xlu1 %v229_v14, %s2402_s29  ;;  %v390_v18 = vsel %vm4320_vm1, %v384_v9, %v382_v8  ;;  %v379_v22 = vmul.f32 %v377_v62, %v2560_v29  ;;  %v381_v23 = vmul.f32 %v377_v62, %v2579_v56  ;;  %v170_v26 = vmul.f32 %v2486_v32, %v2539_v12  ;;  %s2412_s29 = smov 32  }
  0x42   :  { %394 = vrot.lane.b32.xlu0 %v390_v18, %s2407_s12  ;;  %v172_v27 = vmul.f32 %v2486_v32, %v2541_v13  ;;  %v175_v19 = vmul.f32 %v2488_v40, %v2560_v29  ;;  %v344_v28 = vadd.f32 %v340_v10, %v335_v7  ;;  %v177_v31 = vmul.f32 %v2488_v40, %v2579_v56 }
  0x43   :  { %v383_v30 = vadd.f32 %v379_v22, %v374_v11  ;;  %v413_v33 = vstv %s2587_s7  ;;  %v385_v34 = vadd.f32 %v381_v23, %v376_v21  ;;  %v418_v24 = vstv %s2599_s9  ;;  %s2414_s7 = smov 30   ;;  %s2415_s9 = smov 29  }
  0x44   :  { %v179_v35 = vadd.f32 %v175_v19, %v170_v26  ;;  %v415_v36 = vmul.f32 %v413_v33, %v2539_v12  ;;  %v417_v32 = vmul.f32 %v413_v33, %v2541_v13  ;;  %v181_v37 = vadd.f32 %v177_v31, %v172_v27 }
  0x45   :  { %275 = vrot.lane.b32.xlu1 %v270_v15, %s2404_s5  ;;  %v414_v38 = vmul.f32 %v413_v33, %v2492_v44  ;;  %v416_v40 = vmul.f32 %v413_v33, %v2494_v45  ;;  %v311_v39 = vsel %vm4320_vm1, %v305_v17, %v303_v16  ;;  %v420_v42 = vmul.f32 %v418_v24, %v2560_v29  ;;  %s2766_s5 = sld [smem:[#allocation8 + $0x10]] }
  0x46   :  { %v422_v43 = vmul.f32 %v418_v24, %v2579_v56  ;;  %v419_v49 = vmul.f32 %v418_v24, %v2496_v46  ;;  %v188_v50 = vsel %vm4320_vm1, %v181_v37, %v179_v35  ;;  %v421_v51 = vmul.f32 %v418_v24, %v2498_v47 }
  0x47   :  { %v454_v52 = vstv %s2603_s10  ;;  %v459_v53 = vstv %s2607_s11  ;;  %v350_v54 = vsel %vm4320_vm1, %v344_v28, %v342_v20  ;;  %193 = vrot.lane.b32.xlu0 %v188_v50, %s2403_s30  ;;  %v424_v55 = vadd.f32 %v420_v42, %v415_v36  ;;  %s2740_s30 = sld [smem:[#allocation8 + $0xf]] }
  0x48   :  { %v426_v57 = vadd.f32 %v422_v43, %v417_v32  ;;  %v423_v58 = vadd.f32 %v419_v49, %v414_v38  ;;  %v391_v59 = vsel %vm4320_vm1, %v385_v34, %v383_v30  ;;  %v425_v60 = vadd.f32 %v421_v51, %v416_v40  ;;  %s2794_s10 = sld [smem:[#allocation8 + $0x42]] }
  0x49   :  { %316 = vrot.lane.b32.xlu1 %v311_v39, %s2405_s6  ;;  %v456_v41 = vmul.f32 %v454_v52, %v2539_v12  ;;  %v461_v61 = vmul.f32 %v459_v53, %v2560_v29  ;;  %v458_v62 = vmul.f32 %v454_v52, %v2541_v13  ;;  %v455_v63 = vmul.f32 %v454_v52, %v2492_v44  ;;  %s2772_s6 = sld [smem:[#allocation8 + $0x41]] }
  0x4a   :  { %v457_v0 = vmul.f32 %v454_v52, %v2494_v45  ;;  %v460_v1 = vmul.f32 %v459_v53, %v2496_v46  ;;  %v432_v2 = vsel %vm4320_vm1, %v426_v57, %v424_v55  ;;  %v431_v3 = vsel %vm4320_vm1, %v425_v60, %v423_v58  ;;  %s2804_s11 = sld [smem:[#allocation8 + $0x12]] }
  0x4b   :  { %v463_v4 = vmul.f32 %v459_v53, %v2579_v56  ;;  %v462_v5 = vmul.f32 %v459_v53, %v2498_v47  ;;  %435 = vrot.lane.b32.xlu0 %v431_v3, %s2408_s19  ;;  %v495_v25 = vstv %s2623_s13  ;;  %v500_v7 = vstv %s2628_s14  ;;  %s2810_s13 = sld [smem:[#allocation8 + $0x43]] }
  0x4c   :  { %v464_v6 = vadd.f32 %v460_v1, %v455_v63  ;;  %v536_v48 = vstv %s2632_s15  ;;  %v465_v8 = vadd.f32 %v461_v61, %v456_v41  ;;  %v497_v10 = vmul.f32 %v495_v25, %v2539_v12  ;;  %s2816_s14 = sld [smem:[#allocation8 + $0x13]]  ;;  %s2417_s15 = smov 18  }
  0x4d   :  { %355 = vrot.lane.b32.xlu1 %v350_v54, %s2406_s8  ;;  %v466_v9 = vadd.f32 %v462_v5, %v457_v0  ;;  %v499_v11 = vmul.f32 %v495_v25, %v2541_v13  ;;  %v502_v14 = vmul.f32 %v500_v7, %v2560_v29  ;;  %v504_v15 = vmul.f32 %v500_v7, %v2579_v56  ;;  %s2778_s8 = sld [smem:[#allocation8 + $0x11]] }
  0x4e   :  { %v496_v16 = vmul.f32 %v495_v25, %v2492_v44  ;;  %v498_v17 = vmul.f32 %v495_v25, %v2494_v45  ;;  %v501_v20 = vmul.f32 %v500_v7, %v2496_v46  ;;  %v503_v21 = vmul.f32 %v500_v7, %v2498_v47 }
  0x4f   :  { %v472_v18 = vsel %vm4320_vm1, %v466_v9, %v464_v6  ;;  %v538_v22 = vmul.f32 %v536_v48, %v2539_v12  ;;  %v467_v23 = vadd.f32 %v463_v4, %v458_v62  ;;  %v506_v26 = vadd.f32 %v502_v14, %v497_v10 }
  0x50   :  { %476 = vrot.lane.b32.xlu0 %v472_v18, %s2409_s20  ;;  %v540_v27 = vmul.f32 %v536_v48, %v2541_v13  ;;  %v541_v19 = vstv %s2648_s16  ;;  %v505_v28 = vadd.f32 %v501_v20, %v496_v16  ;;  %v507_v30 = vadd.f32 %v503_v21, %v498_v17  ;;  %s2831_s16 = sld [smem:[#allocation8 + $0x44]] }
  0x51   :  { %396 = vrot.lane.b32.xlu1 %v391_v59, %s2407_s12  ;;  %v543_v31 = vmul.f32 %v541_v19, %v2560_v29  ;;  %v545_v33 = vmul.f32 %v541_v19, %v2579_v56  ;;  %v508_v34 = vadd.f32 %v504_v15, %v499_v11  ;;  %v537_v35 = vmul.f32 %v536_v48, %v2492_v44  ;;  %s2416_s12 = smov 19  }
  0x52   :  { %v539_v36 = vmul.f32 %v536_v48, %v2494_v45  ;;  %v542_v32 = vmul.f32 %v541_v19, %v2496_v46  ;;  %v513_v37 = vsel %vm4320_vm1, %v507_v30, %v505_v28  ;;  %v544_v40 = vmul.f32 %v541_v19, %v2498_v47 }
  0x53   :  { %v547_v24 = vadd.f32 %v543_v31, %v538_v22  ;;  %v549_v38 = vadd.f32 %v545_v33, %v540_v27  ;;  %v577_v42 = vstv %s2658_s17  ;;  %v582_v43 = vstv %s2664_s18  ;;  %s2839_s17 = sld [smem:[#allocation8 + $0x14]] }
  0x54   :  { %517 = vrot.lane.b32.xlu0 %v513_v37, %s2410_s22  ;;  %v546_v39 = vadd.f32 %v542_v32, %v537_v35  ;;  %v616_v49 = vstv %s2670_s1  ;;  %v473_v50 = vsel %vm4320_vm1, %v467_v23, %v465_v8  ;;  %v548_v51 = vadd.f32 %v544_v40, %v539_v36  ;;  %s2843_s18 = sld [smem:[#allocation8 + $0x45]] }
  0x55   :  { %437 = vrot.lane.b32.xlu1 %v432_v2, %s2408_s19  ;;  %v579_v52 = vmul.f32 %v577_v42, %v2539_v12  ;;  %v581_v53 = vmul.f32 %v577_v42, %v2541_v13  ;;  %v584_v54 = vmul.f32 %v582_v43, %v2560_v29  ;;  %v586_v55 = vmul.f32 %v582_v43, %v2579_v56  ;;  %s2418_s19 = smov 17   ;;  %s2848_s1 = sld [smem:[#allocation8 + $0x15]] }
  0x56   :  { %v578_v57 = vmul.f32 %v577_v42, %v2492_v44  ;;  %v580_v58 = vmul.f32 %v577_v42, %v2494_v45  ;;  %v554_v59 = vsel %vm4320_vm1, %v548_v51, %v546_v39  ;;  %v583_v60 = vmul.f32 %v582_v43, %v2496_v46 }
  0x57   :  { %v585_v41 = vmul.f32 %v582_v43, %v2498_v47  ;;  %v618_v61 = vmul.f32 %v616_v49, %v2539_v12  ;;  %v514_v62 = vsel %vm4320_vm1, %v508_v34, %v506_v26  ;;  %v555_v63 = vsel %vm4320_vm1, %v549_v38, %v547_v24 }
  0x58   :  { %558 = vrot.lane.b32.xlu0 %v554_v59, %s2411_s25  ;;  %v620_v0 = vmul.f32 %v616_v49, %v2541_v13  ;;  %v621_v1 = vstv %s2686_s0  ;;  %v587_v2 = vadd.f32 %v583_v60, %v578_v57  ;;  %v588_v6 = vadd.f32 %v584_v54, %v579_v52  ;;  %s2865_s0 = sld [smem:[#allocation8 + $0x46]] }
  0x59   :  { %478 = vrot.lane.b32.xlu1 %v473_v50, %s2409_s20  ;;  %v589_v3 = vadd.f32 %v585_v41, %v580_v58  ;;  %v623_v4 = vmul.f32 %v621_v1, %v2560_v29  ;;  %v625_v5 = vmul.f32 %v621_v1, %v2579_v56  ;;  %v617_v25 = vmul.f32 %v616_v49, %v2492_v44  ;;  %s2419_s20 = smov 16  }
  0x5a   :  { %v619_v7 = vmul.f32 %v616_v49, %v2494_v45  ;;  %v622_v48 = vmul.f32 %v621_v1, %v2496_v46  ;;  %v590_v8 = vadd.f32 %v586_v55, %v581_v53  ;;  %v624_v11 = vmul.f32 %v621_v1, %v2498_v47 }
  0x5b   :  { %v595_v9 = vsel %vm4320_vm1, %v589_v3, %v587_v2  ;;  %v627_v10 = vadd.f32 %v623_v4, %v618_v61  ;;  %v629_v14 = vadd.f32 %v625_v5, %v620_v0  ;;  %v657_v16 = vstv %s2696_s21  ;;  %s2874_s21 = sld [smem:[#allocation8 + $0x16]] }
  0x5c   :  { %599 = vrot.lane.b32.xlu0 %v595_v9, %s2412_s29  ;;  %v626_v15 = vadd.f32 %v622_v48, %v617_v25  ;;  %v662_v17 = vstv %s2702_s23  ;;  %v628_v18 = vadd.f32 %v624_v11, %v619_v7  ;;  %v659_v20 = vmul.f32 %v657_v16, %v2539_v12  ;;  %s2420_s23 = smov 15  }
  0x5d   :  { %519 = vrot.lane.b32.xlu1 %v514_v62, %s2410_s22  ;;  %v661_v21 = vmul.f32 %v657_v16, %v2541_v13  ;;  %v698_v22 = vstv %s2708_s24  ;;  %v664_v23 = vmul.f32 %v662_v17, %v2560_v29  ;;  %v666_v26 = vmul.f32 %v662_v17, %v2579_v56  ;;  %s2880_s22 = sld [smem:[#allocation8 + $0x47]] }
  0x5e   :  { %v658_v27 = vmul.f32 %v657_v16, %v2492_v44  ;;  %v660_v19 = vmul.f32 %v657_v16, %v2494_v45  ;;  %v596_v28 = vsel %vm4320_vm1, %v590_v8, %v588_v6  ;;  %v634_v30 = vsel %vm4320_vm1, %v628_v18, %v626_v15  ;;  %s2886_s24 = sld [smem:[#allocation8 + $0x17]] }
  0x5f   :  { %v663_v31 = vmul.f32 %v662_v17, %v2496_v46  ;;  %v665_v33 = vmul.f32 %v662_v17, %v2498_v47  ;;  %v635_v34 = vsel %vm4320_vm1, %v629_v14, %v627_v10  ;;  %v668_v35 = vadd.f32 %v664_v23, %v659_v20 }
  0x60   :  { %638 = vrot.lane.b32.xlu0 %v634_v30, %s2413_s3  ;;  %v670_v36 = vadd.f32 %v666_v26, %v661_v21  ;;  %v703_v32 = vstv %s2723_s26  ;;  %v700_v38 = vmul.f32 %v698_v22, %v2539_v12  ;;  %v702_v39 = vmul.f32 %v698_v22, %v2541_v13  ;;  %s2902_s26 = sld [smem:[#allocation8 + $0x48]] }
  0x61   :  { %560 = vrot.lane.b32.xlu1 %v555_v63, %s2411_s25  ;;  %v667_v37 = vadd.f32 %v663_v31, %v658_v27  ;;  %v669_v24 = vadd.f32 %v665_v33, %v660_v19  ;;  %v705_v40 = vmul.f32 %v703_v32, %v2560_v29  ;;  %v699_v42 = vmul.f32 %v698_v22, %v2492_v44  ;;  %s2421_s25 = smov 14  }
  0x62   :  { %v701_v43 = vmul.f32 %v698_v22, %v2494_v45  ;;  %v704_v49 = vmul.f32 %v703_v32, %v2496_v46  ;;  %v676_v50 = vsel %vm4320_vm1, %v670_v36, %v668_v35  ;;  %v707_v52 = vmul.f32 %v703_v32, %v2579_v56 }
  0x63   :  { %v675_v51 = vsel %vm4320_vm1, %v669_v24, %v667_v37  ;;  %v706_v53 = vmul.f32 %v703_v32, %v2498_v47  ;;  %v739_v55 = vstv %s2731_s27  ;;  %v744_v57 = vstv %s2735_s28  ;;  %s2912_s27 = sld [smem:[#allocation8 + $0x19]]  ;;  %s2422_s28 = smov 13  }
  0x64   :  { %679 = vrot.lane.b32.xlu0 %v675_v51, %s2414_s7  ;;  %v708_v54 = vadd.f32 %v704_v49, %v699_v42  ;;  %v780_v58 = vstv %s2740_s30  ;;  %v709_v59 = vadd.f32 %v705_v40, %v700_v38  ;;  %v741_v41 = vmul.f32 %v739_v55, %v2539_v12  ;;  %s2924_s30 = sld [smem:[#allocation8 + $0x1a]] }
  0x65   :  { %601 = vrot.lane.b32.xlu1 %v596_v28, %s2412_s29  ;;  %v710_v60 = vadd.f32 %v706_v53, %v701_v43  ;;  %v743_v61 = vmul.f32 %v739_v55, %v2541_v13  ;;  %v746_v62 = vmul.f32 %v744_v57, %v2560_v29  ;;  %v748_v63 = vmul.f32 %v744_v57, %v2579_v56  ;;  %s2918_s29 = sld [smem:[#allocation8 + $0x4a]] }
  0x66   :  { %v740_v0 = vmul.f32 %v739_v55, %v2492_v44  ;;  %v742_v1 = vmul.f32 %v739_v55, %v2494_v45  ;;  %v745_v3 = vmul.f32 %v744_v57, %v2496_v46  ;;  %v747_v4 = vmul.f32 %v744_v57, %v2498_v47 }
  0x67   :  { %v716_v2 = vsel %vm4320_vm1, %v710_v60, %v708_v54  ;;  %v782_v5 = vmul.f32 %v780_v58, %v2539_v12  ;;  %v711_v6 = vadd.f32 %v707_v52, %v702_v39  ;;  %v750_v25 = vadd.f32 %v746_v62, %v741_v41 }
  0x68   :  { %720 = vrot.lane.b32.xlu0 %v716_v2, %s2415_s9  ;;  %v784_v7 = vmul.f32 %v780_v58, %v2541_v13  ;;  %v785_v48 = vstv %s2757_s4  ;;  %v749_v8 = vadd.f32 %v745_v3, %v740_v0  ;;  %v751_v9 = vadd.f32 %v747_v4, %v742_v1  ;;  %s2939_s4 = sld [smem:[#allocation8 + $0x4b]] }
  0x69   :  { %640 = vrot.lane.b32.xlu1 %v635_v34, %s2413_s3  ;;  %v787_v10 = vmul.f32 %v785_v48, %v2560_v29  ;;  %v789_v11 = vmul.f32 %v785_v48, %v2579_v56  ;;  %v752_v14 = vadd.f32 %v748_v63, %v743_v61  ;;  %v781_v15 = vmul.f32 %v780_v58, %v2492_v44  ;;  %s2423_s3 = smov 3  }
  0x6a   :  { %v783_v16 = vmul.f32 %v780_v58, %v2494_v45  ;;  %v786_v17 = vmul.f32 %v785_v48, %v2496_v46  ;;  %v757_v18 = vsel %vm4320_vm1, %v751_v9, %v749_v8  ;;  %v788_v22 = vmul.f32 %v785_v48, %v2498_v47 }
  0x6b   :  { %v791_v20 = vadd.f32 %v787_v10, %v782_v5  ;;  %v793_v21 = vadd.f32 %v789_v11, %v784_v7  ;;  %v821_v26 = vstv %s2766_s5  ;;  %v826_v27 = vstv %s2772_s6  ;;  %s2947_s5 = sld [smem:[#allocation8 + $0x1b]] }
  0x6c   :  { %761 = vrot.lane.b32.xlu0 %v757_v18, %s2416_s12  ;;  %v790_v23 = vadd.f32 %v786_v17, %v781_v15  ;;  %v862_v19 = vstv %s2778_s8  ;;  %v717_v28 = vsel %vm4320_vm1, %v711_v6, %v709_v59  ;;  %v792_v30 = vadd.f32 %v788_v22, %v783_v16  ;;  %s2951_s6 = sld [smem:[#allocation8 + $0x4c]] }
  0x6d   :  { %681 = vrot.lane.b32.xlu1 %v676_v50, %s2414_s7  ;;  %v823_v31 = vmul.f32 %v821_v26, %v2539_v12  ;;  %v825_v33 = vmul.f32 %v821_v26, %v2541_v13  ;;  %v828_v34 = vmul.f32 %v826_v27, %v2560_v29  ;;  %v830_v35 = vmul.f32 %v826_v27, %v2579_v56  ;;  %s2424_s7 = smov 2   ;;  %s2956_s8 = sld [smem:[#allocation8 + $0x1c]] }
  0x6e   :  { %v822_v36 = vmul.f32 %v821_v26, %v2492_v44  ;;  %v824_v32 = vmul.f32 %v821_v26, %v2494_v45  ;;  %v798_v37 = vsel %vm4320_vm1, %v792_v30, %v790_v23  ;;  %v827_v24 = vmul.f32 %v826_v27, %v2496_v46 }
  0x6f   :  { %v829_v38 = vmul.f32 %v826_v27, %v2498_v47  ;;  %v864_v40 = vmul.f32 %v862_v19, %v2539_v12  ;;  %v758_v39 = vsel %vm4320_vm1, %v752_v14, %v750_v25  ;;  %v799_v42 = vsel %vm4320_vm1, %v793_v21, %v791_v20 }
  0x70   :  { %802 = vrot.lane.b32.xlu0 %v798_v37, %s2417_s15  ;;  %v866_v43 = vmul.f32 %v862_v19, %v2541_v13  ;;  %v867_v49 = vstv %s2794_s10  ;;  %v831_v50 = vadd.f32 %v827_v24, %v822_v36  ;;  %v832_v54 = vadd.f32 %v828_v34, %v823_v31  ;;  %s2973_s10 = sld [smem:[#allocation8 + $0x4d]] }
  0x71   :  { %722 = vrot.lane.b32.xlu1 %v717_v28, %s2415_s9  ;;  %v833_v51 = vadd.f32 %v829_v38, %v824_v32  ;;  %v869_v52 = vmul.f32 %v867_v49, %v2560_v29  ;;  %v871_v53 = vmul.f32 %v867_v49, %v2579_v56  ;;  %v863_v55 = vmul.f32 %v862_v19, %v2492_v44  ;;  %s2425_s9 = smov 1  }
  0x72   :  { %v865_v57 = vmul.f32 %v862_v19, %v2494_v45  ;;  %v868_v58 = vmul.f32 %v867_v49, %v2496_v46  ;;  %v834_v59 = vadd.f32 %v830_v35, %v825_v33  ;;  %v870_v61 = vmul.f32 %v867_v49, %v2498_v47 }
  0x73   :  { %v839_v60 = vsel %vm4320_vm1, %v833_v51, %v831_v50  ;;  %v873_v41 = vadd.f32 %v869_v52, %v864_v40  ;;  %v875_v62 = vadd.f32 %v871_v53, %v866_v43  ;;  %v901_v0 = vstv %s2804_s11  ;;  %s2982_s11 = sld [smem:[#allocation8 + $0x1d]] }
  0x74   :  { %843 = vrot.lane.b32.xlu0 %v839_v60, %s2418_s19  ;;  %v872_v63 = vadd.f32 %v868_v58, %v863_v55  ;;  %v906_v1 = vstv %s2810_s13  ;;  %v874_v2 = vadd.f32 %v870_v61, %v865_v57  ;;  %v903_v3 = vmul.f32 %v901_v0, %v2539_v12  ;;  %s2426_s13 = smov 127  }
  0x75   :  { %763 = vrot.lane.b32.xlu1 %v758_v39, %s2416_s12  ;;  %v905_v4 = vmul.f32 %v901_v0, %v2541_v13  ;;  %v942_v5 = vstv %s2816_s14  ;;  %v908_v6 = vmul.f32 %v906_v1, %v2560_v29  ;;  %v910_v25 = vmul.f32 %v906_v1, %v2579_v56  ;;  %s2988_s12 = sld [smem:[#allocation8 + $0x4e]] }
  0x76   :  { %v902_v7 = vmul.f32 %v901_v0, %v2492_v44  ;;  %v904_v48 = vmul.f32 %v901_v0, %v2494_v45  ;;  %v840_v8 = vsel %vm4320_vm1, %v834_v59, %v832_v54  ;;  %v880_v9 = vsel %vm4320_vm1, %v874_v2, %v872_v63  ;;  %s2994_s14 = sld [smem:[#allocation8 + $0x1e]] }
  0x77   :  { %v907_v10 = vmul.f32 %v906_v1, %v2496_v46  ;;  %v909_v11 = vmul.f32 %v906_v1, %v2498_v47  ;;  %v881_v14 = vsel %vm4320_vm1, %v875_v62, %v873_v41  ;;  %v912_v15 = vadd.f32 %v908_v6, %v903_v3 }
  0x78   :  { %884 = vrot.lane.b32.xlu0 %v880_v9, %s2419_s20  ;;  %v914_v16 = vadd.f32 %v910_v25, %v905_v4  ;;  %v947_v17 = vstv %s2831_s16  ;;  %v944_v21 = vmul.f32 %v942_v5, %v2539_v12  ;;  %v946_v23 = vmul.f32 %v942_v5, %v2541_v13  ;;  %s3010_s16 = sld [smem:[#allocation8 + $0x4f]] }
  0x79   :  { %804 = vrot.lane.b32.xlu1 %v799_v42, %s2417_s15  ;;  %v911_v18 = vadd.f32 %v907_v10, %v902_v7  ;;  %v913_v20 = vadd.f32 %v909_v11, %v904_v48  ;;  %v949_v22 = vmul.f32 %v947_v17, %v2560_v29  ;;  %v943_v26 = vmul.f32 %v942_v5, %v2492_v44  ;;  %s2427_s15 = smov 126  }
  0x7a   :  { %v945_v27 = vmul.f32 %v942_v5, %v2494_v45  ;;  %v948_v19 = vmul.f32 %v947_v17, %v2496_v46  ;;  %v920_v28 = vsel %vm4320_vm1, %v914_v16, %v912_v15  ;;  %v951_v31 = vmul.f32 %v947_v17, %v2579_v56 }
  0x7b   :  { %v919_v30 = vsel %vm4320_vm1, %v913_v20, %v911_v18  ;;  %v950_v33 = vmul.f32 %v947_v17, %v2498_v47  ;;  %v983_v35 = vstv %s2839_s17  ;;  %v988_v36 = vstv %s2843_s18  ;;  %s3020_s17 = sld [smem:[#allocation8 + $0x1f]]  ;;  %s2428_s18 = smov 125  }
  0x7c   :  { %923 = vrot.lane.b32.xlu0 %v919_v30, %s2420_s23  ;;  %v952_v34 = vadd.f32 %v948_v19, %v943_v26  ;;  %v1024_v32 = vstv %s2848_s1  ;;  %v953_v37 = vadd.f32 %v949_v22, %v944_v21  ;;  %v985_v38 = vmul.f32 %v983_v35, %v2539_v12  ;;  %s2429_s1 = smov 115  }
  0x7d   :  { %845 = vrot.lane.b32.xlu1 %v840_v8, %s2418_s19  ;;  %v954_v24 = vadd.f32 %v950_v33, %v945_v27  ;;  %v987_v40 = vmul.f32 %v983_v35, %v2541_v13  ;;  %v990_v39 = vmul.f32 %v988_v36, %v2560_v29  ;;  %v992_v42 = vmul.f32 %v988_v36, %v2579_v56  ;;  %s3026_s19 = sld [smem:[#allocation8 + $0x50]] }
  0x7e   :  { %v984_v43 = vmul.f32 %v983_v35, %v2492_v44  ;;  %v986_v49 = vmul.f32 %v983_v35, %v2494_v45  ;;  %v989_v51 = vmul.f32 %v988_v36, %v2496_v46  ;;  %v991_v52 = vmul.f32 %v988_v36, %v2498_v47 }
  0x7f   :  { %v960_v50 = vsel %vm4320_vm1, %v954_v24, %v952_v34  ;;  %v1026_v53 = vmul.f32 %v1024_v32, %v2539_v12  ;;  %v955_v54 = vadd.f32 %v951_v31, %v946_v23  ;;  %v994_v55 = vadd.f32 %v990_v39, %v985_v38 }
  0x80   :  { %964 = vrot.lane.b32.xlu0 %v960_v50, %s2421_s25  ;;  %v1028_v57 = vmul.f32 %v1024_v32, %v2541_v13  ;;  %v1029_v58 = vstv %s2865_s0  ;;  %v993_v59 = vadd.f32 %v989_v51, %v984_v43  ;;  %v995_v60 = vadd.f32 %v991_v52, %v986_v49  ;;  %s3057_s0 = sld [smem:[#allocation8 + $0x51]] }
  0x81   :  { %886 = vrot.lane.b32.xlu1 %v881_v14, %s2419_s20  ;;  %v1031_v41 = vmul.f32 %v1029_v58, %v2560_v29  ;;  %v1033_v61 = vmul.f32 %v1029_v58, %v2579_v56  ;;  %v996_v62 = vadd.f32 %v992_v42, %v987_v40  ;;  %v1025_v63 = vmul.f32 %v1024_v32, %v2492_v44  ;;  %s3051_s20 = sld [smem:[#allocation8 + $0x20]] }
  0x82   :  { %v1027_v0 = vmul.f32 %v1024_v32, %v2494_v45  ;;  %v1030_v1 = vmul.f32 %v1029_v58, %v2496_v46  ;;  %v1001_v2 = vsel %vm4320_vm1, %v995_v60, %v993_v59  ;;  %v1032_v5 = vmul.f32 %v1029_v58, %v2498_v47 }
  0x83   :  { %v1035_v3 = vadd.f32 %v1031_v41, %v1026_v53  ;;  %v1037_v4 = vadd.f32 %v1033_v61, %v1028_v57  ;;  %v1063_v25 = vstv %s2874_s21  ;;  %v1068_v7 = vstv %s2880_s22  ;;  %s2430_s21 = smov 114   ;;  %s3070_s22 = sld [smem:[#allocation8 + $0x21]] }
  0x84   :  { %1005 = vrot.lane.b32.xlu0 %v1001_v2, %s2422_s28  ;;  %v1034_v6 = vadd.f32 %v1030_v1, %v1025_v63  ;;  %v1102_v48 = vstv %s2886_s24  ;;  %v961_v8 = vsel %vm4320_vm1, %v955_v54, %v953_v37  ;;  %v1036_v9 = vadd.f32 %v1032_v5, %v1027_v0  ;;  %s3086_s24 = sld [smem:[#allocation8 + $0x52]] }
  0x85   :  { %925 = vrot.lane.b32.xlu1 %v920_v28, %s2420_s23  ;;  %v1065_v10 = vmul.f32 %v1063_v25, %v2539_v12  ;;  %v1067_v11 = vmul.f32 %v1063_v25, %v2541_v13  ;;  %v1070_v14 = vmul.f32 %v1068_v7, %v2560_v29  ;;  %v1072_v15 = vmul.f32 %v1068_v7, %v2579_v56  ;;  %s2431_s23 = smov 113  }
  0x86   :  { %v1064_v16 = vmul.f32 %v1063_v25, %v2492_v44  ;;  %v1066_v17 = vmul.f32 %v1063_v25, %v2494_v45  ;;  %v1042_v18 = vsel %vm4320_vm1, %v1036_v9, %v1034_v6  ;;  %v1069_v20 = vmul.f32 %v1068_v7, %v2496_v46 }
  0x87   :  { %v1071_v21 = vmul.f32 %v1068_v7, %v2498_v47  ;;  %v1104_v22 = vmul.f32 %v1102_v48, %v2539_v12  ;;  %v1002_v23 = vsel %vm4320_vm1, %v996_v62, %v994_v55  ;;  %v1043_v26 = vsel %vm4320_vm1, %v1037_v4, %v1035_v3 }
  0x88   :  { %1046 = vrot.lane.b32.xlu0 %v1042_v18, %s2423_s3  ;;  %v1106_v27 = vmul.f32 %v1102_v48, %v2541_v13  ;;  %v1107_v19 = vstv %s2902_s26  ;;  %v1073_v28 = vadd.f32 %v1069_v20, %v1064_v16  ;;  %v1074_v34 = vadd.f32 %v1070_v14, %v1065_v10  ;;  %s3112_s26 = sld [smem:[#allocation8 + $0x22]] }
  0x89   :  { %966 = vrot.lane.b32.xlu1 %v961_v8, %s2421_s25  ;;  %v1075_v30 = vadd.f32 %v1071_v21, %v1066_v17  ;;  %v1109_v31 = vmul.f32 %v1107_v19, %v2560_v29  ;;  %v1111_v33 = vmul.f32 %v1107_v19, %v2579_v56  ;;  %v1103_v35 = vmul.f32 %v1102_v48, %v2492_v44  ;;  %s2432_s25 = smov 112  }
  0x8a   :  { %v1105_v36 = vmul.f32 %v1102_v48, %v2494_v45  ;;  %v1108_v32 = vmul.f32 %v1107_v19, %v2496_v46  ;;  %v1076_v37 = vadd.f32 %v1072_v15, %v1067_v11  ;;  %v1110_v40 = vmul.f32 %v1107_v19, %v2498_v47 }
  0x8b   :  { %v1081_v24 = vsel %vm4320_vm1, %v1075_v30, %v1073_v28  ;;  %v1113_v38 = vadd.f32 %v1109_v31, %v1104_v22  ;;  %v1115_v39 = vadd.f32 %v1111_v33, %v1106_v27  ;;  %v1167_v43 = vstv %s2912_s27  ;;  %s3118_s27 = sld [smem:[#allocation8 + $0x53]] }
  0x8c   :  { %1085 = vrot.lane.b32.xlu0 %v1081_v24, %s2424_s7  ;;  %v1112_v42 = vadd.f32 %v1108_v32, %v1103_v35  ;;  %v1172_v49 = vstv %s2918_s29  ;;  %v1114_v50 = vadd.f32 %v1110_v40, %v1105_v36  ;;  %v1169_v51 = vmul.f32 %v1167_v43, %v2539_v12  ;;  %s3163_s29 = sld [smem:[#allocation8 + $0x23]] }
  0x8d   :  { %1007 = vrot.lane.b32.xlu1 %v1002_v23, %s2422_s28  ;;  %v1171_v52 = vmul.f32 %v1167_v43, %v2541_v13  ;;  %v1206_v53 = vstv %s2924_s30  ;;  %v1174_v54 = vmul.f32 %v1172_v49, %v2560_v29  ;;  %v1176_v55 = vmul.f32 %v1172_v49, %v2579_v56  ;;  %s2433_s28 = smov 111   ;;  %s2434_s30 = smov 110  }
  0x8e   :  { %v1168_v57 = vmul.f32 %v1167_v43, %v2492_v44  ;;  %v1170_v58 = vmul.f32 %v1167_v43, %v2494_v45  ;;  %v1082_v59 = vsel %vm4320_vm1, %v1076_v37, %v1074_v34  ;;  %v1120_v60 = vsel %vm4320_vm1, %v1114_v50, %v1112_v42 }
  0x8f   :  { %v1173_v41 = vmul.f32 %v1172_v49, %v2496_v46  ;;  %v1175_v61 = vmul.f32 %v1172_v49, %v2498_v47  ;;  %v1121_v62 = vsel %vm4320_vm1, %v1115_v39, %v1113_v38  ;;  %v1178_v63 = vadd.f32 %v1174_v54, %v1169_v51 }
  0x90   :  { %1124 = vrot.lane.b32.xlu0 %v1120_v60, %s2425_s9  ;;  %v1180_v0 = vadd.f32 %v1176_v55, %v1171_v52  ;;  %v1211_v1 = vstv %s2939_s4  ;;  %v1208_v4 = vmul.f32 %v1206_v53, %v2539_v12  ;;  %v1210_v6 = vmul.f32 %v1206_v53, %v2541_v13  ;;  %s2435_s4 = smov 109  }
  0x91   :  { %1048 = vrot.lane.b32.xlu1 %v1043_v26, %s2423_s3  ;;  %v1177_v2 = vadd.f32 %v1173_v41, %v1168_v57  ;;  %v1179_v3 = vadd.f32 %v1175_v61, %v1170_v58  ;;  %v1213_v5 = vmul.f32 %v1211_v1, %v2560_v29  ;;  %v1207_v25 = vmul.f32 %v1206_v53, %v2492_v44  ;;  %s3183_s3 = sld [smem:[#allocation8 + $0x54]] }
  0x92   :  { %v1209_v7 = vmul.f32 %v1206_v53, %v2494_v45  ;;  %v1212_v48 = vmul.f32 %v1211_v1, %v2496_v46  ;;  %v1186_v8 = vsel %vm4320_vm1, %v1180_v0, %v1178_v63  ;;  %v1215_v10 = vmul.f32 %v1211_v1, %v2579_v56 }
  0x93   :  { %v1185_v9 = vsel %vm4320_vm1, %v1179_v3, %v1177_v2  ;;  %v1214_v11 = vmul.f32 %v1211_v1, %v2498_v47  ;;  %v1245_v15 = vstv %s2947_s5  ;;  %v1250_v16 = vstv %s2951_s6  ;;  %s3240_s5 = sld [smem:[#allocation8 + $0x24]] }
  0x94   :  { %1189 = vrot.lane.b32.xlu0 %v1185_v9, %s2426_s13  ;;  %v1216_v14 = vadd.f32 %v1212_v48, %v1207_v25  ;;  %v1284_v17 = vstv %s2956_s8  ;;  %v1217_v18 = vadd.f32 %v1213_v5, %v1208_v4  ;;  %v1247_v21 = vmul.f32 %v1245_v15, %v2539_v12  ;;  %s3244_s6 = sld [smem:[#allocation8 + $0x55]] }
  0x95   :  { %1087 = vrot.lane.b32.xlu1 %v1082_v59, %s2424_s7  ;;  %v1218_v20 = vadd.f32 %v1214_v11, %v1209_v7  ;;  %v1249_v22 = vmul.f32 %v1245_v15, %v2541_v13  ;;  %v1252_v23 = vmul.f32 %v1250_v16, %v2560_v29  ;;  %v1254_v26 = vmul.f32 %v1250_v16, %v2579_v56  ;;  %s3270_s7 = sld [smem:[#allocation8 + $0x25]] }
  0x96   :  { %v1246_v27 = vmul.f32 %v1245_v15, %v2492_v44  ;;  %v1248_v19 = vmul.f32 %v1245_v15, %v2494_v45  ;;  %v1251_v30 = vmul.f32 %v1250_v16, %v2496_v46  ;;  %v1253_v31 = vmul.f32 %v1250_v16, %v2498_v47  ;;  %s3279_s8 = sld [smem:[#allocation8 + $0x56]] }
  0x97   :  { %v1224_v28 = vsel %vm4320_vm1, %v1218_v20, %v1216_v14  ;;  %v1286_v33 = vmul.f32 %v1284_v17, %v2539_v12  ;;  %v1219_v34 = vadd.f32 %v1215_v10, %v1210_v6  ;;  %v1256_v35 = vadd.f32 %v1252_v23, %v1247_v21 }
  0x98   :  { %1228 = vrot.lane.b32.xlu0 %v1224_v28, %s2427_s15  ;;  %v1288_v36 = vmul.f32 %v1284_v17, %v2541_v13  ;;  %v1289_v32 = vstv %s2973_s10  ;;  %v1255_v37 = vadd.f32 %v1251_v30, %v1246_v27  ;;  %v1257_v24 = vadd.f32 %v1253_v31, %v1248_v19  ;;  %s3310_s10 = sld [smem:[#allocation8 + $0x26]] }
  0x99   :  { %1126 = vrot.lane.b32.xlu1 %v1121_v62, %s2425_s9  ;;  %v1291_v38 = vmul.f32 %v1289_v32, %v2560_v29  ;;  %v1293_v40 = vmul.f32 %v1289_v32, %v2579_v56  ;;  %v1258_v39 = vadd.f32 %v1254_v26, %v1249_v22  ;;  %v1285_v42 = vmul.f32 %v1284_v17, %v2492_v44  ;;  %s2436_s9 = smov 99  }
  0x9a   :  { %v1287_v43 = vmul.f32 %v1284_v17, %v2494_v45  ;;  %v1290_v49 = vmul.f32 %v1289_v32, %v2496_v46  ;;  %v1263_v50 = vsel %vm4320_vm1, %v1257_v24, %v1255_v37  ;;  %v1292_v53 = vmul.f32 %v1289_v32, %v2498_v47 }
  0x9b   :  { %v1295_v51 = vadd.f32 %v1291_v38, %v1286_v33  ;;  %v1297_v52 = vadd.f32 %v1293_v40, %v1288_v36  ;;  %v1325_v55 = vstv %s2982_s11  ;;  %v1330_v57 = vstv %s2988_s12  ;;  %s3329_s11 = sld [smem:[#allocation8 + $0x57]]  ;;  %s2437_s12 = smov 98  }
  0x9c   :  { %1267 = vrot.lane.b32.xlu0 %v1263_v50, %s2428_s18  ;;  %v1294_v54 = vadd.f32 %v1290_v49, %v1285_v42  ;;  %v1366_v58 = vstv %s2994_s14  ;;  %v1225_v59 = vsel %vm4320_vm1, %v1219_v34, %v1217_v18  ;;  %v1296_v60 = vadd.f32 %v1292_v53, %v1287_v43  ;;  %s3343_s14 = sld [smem:[#allocation8 + $0x58]] }
  0x9d   :  { %1191 = vrot.lane.b32.xlu1 %v1186_v8, %s2426_s13  ;;  %v1327_v41 = vmul.f32 %v1325_v55, %v2539_v12  ;;  %v1329_v61 = vmul.f32 %v1325_v55, %v2541_v13  ;;  %v1332_v62 = vmul.f32 %v1330_v57, %v2560_v29  ;;  %v1334_v63 = vmul.f32 %v1330_v57, %v2579_v56  ;;  %s3335_s13 = sld [smem:[#allocation8 + $0x27]] }
  0x9e   :  { %v1326_v0 = vmul.f32 %v1325_v55, %v2492_v44  ;;  %v1328_v1 = vmul.f32 %v1325_v55, %v2494_v45  ;;  %v1302_v2 = vsel %vm4320_vm1, %v1296_v60, %v1294_v54  ;;  %v1331_v3 = vmul.f32 %v1330_v57, %v2496_v46 }
  0x9f   :  { %v1333_v4 = vmul.f32 %v1330_v57, %v2498_v47  ;;  %v1368_v5 = vmul.f32 %v1366_v58, %v2539_v12  ;;  %v1264_v6 = vsel %vm4320_vm1, %v1258_v39, %v1256_v35  ;;  %v1303_v25 = vsel %vm4320_vm1, %v1297_v52, %v1295_v51 }
  0xa0   :  { %1306 = vrot.lane.b32.xlu0 %v1302_v2, %s2429_s1  ;;  %v1370_v7 = vmul.f32 %v1366_v58, %v2541_v13  ;;  %v1371_v48 = vstv %s3010_s16  ;;  %v1335_v8 = vadd.f32 %v1331_v3, %v1326_v0  ;;  %v1336_v14 = vadd.f32 %v1332_v62, %v1327_v41  ;;  %s3374_s16 = sld [smem:[#allocation8 + $0x28]] }
  0xa1   :  { %1230 = vrot.lane.b32.xlu1 %v1225_v59, %s2427_s15  ;;  %v1337_v9 = vadd.f32 %v1333_v4, %v1328_v1  ;;  %v1373_v10 = vmul.f32 %v1371_v48, %v2560_v29  ;;  %v1375_v11 = vmul.f32 %v1371_v48, %v2579_v56  ;;  %v1367_v15 = vmul.f32 %v1366_v58, %v2492_v44  ;;  %s2438_s15 = smov 97  }
  0xa2   :  { %v1369_v16 = vmul.f32 %v1366_v58, %v2494_v45  ;;  %v1372_v17 = vmul.f32 %v1371_v48, %v2496_v46  ;;  %v1338_v18 = vadd.f32 %v1334_v63, %v1329_v61  ;;  %v1374_v23 = vmul.f32 %v1371_v48, %v2498_v47  ;;  %v233_v0 = vpop.permute.xlu1 %232 }
  0xa3   :  { %v1343_v20 = vsel %vm4320_vm1, %v1337_v9, %v1335_v8  ;;  %v3054_v21 = vpop.permute.xlu0 %191  ;;  %v1377_v22 = vadd.f32 %v1373_v10, %v1368_v5  ;;  %v64_v27 = vlaneseq  ;;  %v1407_v19 = vstv %s3020_s17  ;;  %s3395_s17 = sld [smem:[#allocation8 + $0x59]] }
  0xa4   :  { %1347 = vrot.lane.b32.xlu0 %v1343_v20, %s2430_s21  ;;  %v1376_v26 = vadd.f32 %v1372_v17, %v1367_v15  ;;  %v1412_v28 = vstv %s3026_s19  ;;  %v1379_v30 = vadd.f32 %v1375_v11, %v1370_v7  ;;  %v1378_v31 = vadd.f32 %v1374_v23, %v1369_v16  ;;  %s2439_s19 = smov 96  }
  0xa5   :  { %1269 = vrot.lane.b32.xlu1 %v1264_v6, %s2428_s18  ;;  %v1409_v33 = vmul.f32 %v1407_v19, %v2539_v12  ;;  %v1411_v34 = vmul.f32 %v1407_v19, %v2541_v13  ;;  %v3065_v35 = vand.u32 127, %v64_v27  ;;  %v1414_v36 = vmul.f32 %v1412_v28, %v2560_v29  ;;  %s3405_s18 = sld [smem:[#allocation8 + $0x29]] }
  0xa6   :  { %v1416_v32 = vmul.f32 %v1412_v28, %v2579_v56  ;;  %v1408_v37 = vmul.f32 %v1407_v19, %v2492_v44  ;;  %v1384_v24 = vsel %vm4320_vm1, %v1378_v31, %v1376_v26  ;;  %v1410_v40 = vmul.f32 %v1407_v19, %v2494_v45 }
  0xa7   :  { %v3073_v38 = vpop.permute.xlu0 %273  ;;  %v1413_v39 = vmul.f32 %v1412_v28, %v2496_v46  ;;  %v1415_v42 = vmul.f32 %v1412_v28, %v2498_v47  ;;  %v1344_v43 = vsel %vm4320_vm1, %v1338_v18, %v1336_v14  ;;  %v3081_v49 = vadd.s32 128, %v3065_v35 }
  0xa8   :  { %1388 = vrot.lane.b32.xlu0 %v1384_v24, %s2431_s23  ;;  %v3084_v50 = vand.u32 15, %v3065_v35  ;;  %v1418_v51 = vadd.f32 %v1414_v36, %v1409_v33  ;;  %v1420_v52 = vadd.f32 %v1416_v32, %v1411_v34  ;;  %v1385_v55 = vsel %vm4320_vm1, %v1379_v30, %v1377_v22 }
  0xa9   :  { %1308 = vrot.lane.b32.xlu1 %v1303_v25, %s2429_s1  ;;  %v1417_v53 = vadd.f32 %v1413_v39, %v1408_v37  ;;  %v1419_v54 = vadd.f32 %v1415_v42, %v1410_v40  ;;  %v3091_v57 = vand.u32 15, %v3081_v49  ;;  %vm69_vm2 = vcmp.ge.s32.totalorder %v3065_v35, 48  ;;  %s3420_s1 = sld [smem:[#allocation8 + $0x5a]] }
  0xaa   :  { %vm236_vm3 = vcmp.lt.s32.totalorder %v3065_v35, 50  ;;  %vm83_vm4 = vcmp.ge.s32.totalorder %v3084_v50, 2  ;;  %v1446_v60 = vstv %s3051_s20  ;;  %v1451_v41 = vstv %s3057_s0  ;;  %s3428_s20 = sld [smem:[#allocation8 + $0x2a]]  ;;  %s2440_s0 = smov 95  }
  0xab   :  { %v1425_v58 = vsel %vm4320_vm1, %v1419_v54, %v1417_v53  ;;  %v3097_v59 = vpop.permute.xlu0 %314  ;;  %v1426_v61 = vsel %vm4320_vm1, %v1420_v52, %v1418_v51  ;;  %vm4325_vm5 = vcmp.ge.s32.totalorder %v3084_v50, 1  ;;  %v1448_v62 = vmul.f32 %v1446_v60, %v2539_v12  ;;  %vm3135_vm9 = vmand %vm69_vm2, %vm83_vm4 }
  0xac   :  { %1429 = vrot.lane.b32.xlu0 %v1425_v58, %s2432_s25  ;;  %v1450_v63 = vmul.f32 %v1446_v60, %v2541_v13  ;;  %vm277_vm6 = vcmp.lt.s32.totalorder %v3065_v35, 49  ;;  %v1453_v1 = vmul.f32 %v1451_v41, %v2560_v29  ;;  %v1455_v2 = vmul.f32 %v1451_v41, %v2579_v56  ;;  %vm3169_vm13 = vmand %vm69_vm2, %vm4325_vm5 }
  0xad   :  { %1349 = vrot.lane.b32.xlu1 %v1344_v43, %s2430_s21  ;;  %v1447_v3 = vmul.f32 %v1446_v60, %v2492_v44  ;;  %v1449_v4 = vmul.f32 %v1446_v60, %v2494_v45  ;;  %vm4322_vm7 = vcmp.ge.s32.totalorder %v3091_v57, 2  ;;  %v1452_v5 = vmul.f32 %v1451_v41, %v2496_v46  ;;  %s3433_s21 = sld [smem:[#allocation8 + $0x5b]] }
  0xae   :  { %v1454_v6 = vmul.f32 %v1451_v41, %v2498_v47  ;;  %v1487_v25 = vstv %s3070_s22  ;;  %v1457_v7 = vadd.f32 %v1453_v1, %v1448_v62  ;;  %v1459_v48 = vadd.f32 %v1455_v2, %v1450_v63  ;;  %s2441_s22 = smov 94  }
  0xaf   :  { %v3120_v8 = vpop.permute.xlu0 %353  ;;  %v1489_v9 = vmul.f32 %v1487_v25, %v2539_v12  ;;  %v1491_v10 = vmul.f32 %v1487_v25, %v2541_v13  ;;  %v1456_v11 = vadd.f32 %v1452_v5, %v1447_v3  ;;  %v1492_v15 = vstv %s3086_s24  ;;  %s3494_s24 = sld [smem:[#allocation8 + $0x5c]] }
  0xb0   :  { %v1458_v14 = vadd.f32 %v1454_v6, %v1449_v4  ;;  %v1488_v16 = vmul.f32 %v1487_v25, %v2492_v44  ;;  %vm4319_vm8 = vcmp.ge.s32.totalorder %v3091_v57, 1  ;;  %v1494_v17 = vmul.f32 %v1492_v15, %v2560_v29 }
  0xb1   :  { %1390 = vrot.lane.b32.xlu1 %v1385_v55, %s2431_s23  ;;  %v1496_v18 = vmul.f32 %v1492_v15, %v2579_v56  ;;  %v1490_v20 = vmul.f32 %v1487_v25, %v2494_v45  ;;  %vm318_vm10 = vcmp.lt.s32.totalorder %v3065_v35, 48  ;;  %v1493_v26 = vmul.f32 %v1492_v15, %v2496_v46  ;;  %s3467_s23 = sld [smem:[#allocation8 + $0x2b]] }
  0xb2   :  { %v1464_v23 = vsel %vm4320_vm1, %v1458_v14, %v1456_v11  ;;  %v1495_v27 = vmul.f32 %v1492_v15, %v2498_v47  ;;  %v1465_v28 = vsel %vm4320_vm1, %v1459_v48, %v1457_v7  ;;  %v1498_v30 = vadd.f32 %v1494_v17, %v1489_v9 }
  0xb3   :  { %v235_v19 = vpop.permute.xlu1 %234  ;;  %1468 = vrot.lane.b32.xlu0 %v1464_v23, %s2433_s28  ;;  %v1500_v31 = vadd.f32 %v1496_v18, %v1491_v10  ;;  %vm4323_vm11 = vcmp.lt.s32.totalorder %v3084_v50, 15  ;;  %v1497_v36 = vadd.f32 %v1493_v26, %v1488_v16  ;;  %vm357_vm12 = vcmp.lt.s32.totalorder %v3065_v35, 47 }
  0xb4   :  { %v237_v33 = vsel %vm236_vm3, %v233_v0, %v235_v19  ;;  %v3150_v34 = vsel %vm236_vm3, %v235_v19, %v233_v0  ;;  %v1499_v32 = vadd.f32 %v1495_v27, %v1490_v20  ;;  %v3152_v37 = vpop.permute.xlu0 %394  ;;  %v1528_v42 = vstv %s3112_s26  ;;  %s2442_s26 = smov 93  }
  0xb5   :  { %v245_v24 = vsel %vm3135_vm9, %v3150_v34, 0.0  ;;  %v246_v40 = vsel %vm4322_vm7, %v237_v33, 0.0  ;;  %1431 = vrot.lane.b32.xlu1 %v1426_v61, %s2432_s25  ;;  %v1506_v39 = vsel %vm4320_vm1, %v1500_v31, %v1498_v30  ;;  %vm88_vm14 = vcmp.lt.s32.totalorder %v3091_v57, 15  ;;  %s3502_s25 = sld [smem:[#allocation8 + $0x2c]] }
  0xb6   :  { %v1505_v51 = vsel %vm4320_vm1, %v1499_v32, %v1497_v36  ;;  %v1530_v52 = vmul.f32 %v1528_v42, %v2539_v12  ;;  %v1532_v53 = vmul.f32 %v1528_v42, %v2541_v13  ;;  %v1533_v54 = vstv %s3118_s27  ;;  %s3509_s27 = sld [smem:[#allocation8 + $0x5d]] }
  0xb7   :  { %v276_v55 = vpop.permute.xlu1 %275  ;;  %1509 = vrot.lane.b32.xlu0 %v1505_v51, %s2434_s30  ;;  %v1535_v58 = vmul.f32 %v1533_v54, %v2560_v29  ;;  %v1537_v60 = vmul.f32 %v1533_v54, %v2579_v56  ;;  %v1529_v41 = vmul.f32 %v1528_v42, %v2492_v44  ;;  %v1531_v61 = vmul.f32 %v1528_v42, %v2494_v45 }
  0xb8   :  { %v278_v62 = vsel %vm277_vm6, %v3073_v38, %v276_v55  ;;  %v279_v63 = vsel %vm277_vm6, %v276_v55, %v3073_v38  ;;  %v1534_v0 = vmul.f32 %v1533_v54, %v2496_v46  ;;  %v1536_v1 = vmul.f32 %v1533_v54, %v2498_v47 }
  0xb9   :  { %v286_v2 = vsel %vm3169_vm13, %v279_v63, 0.0  ;;  %v287_v3 = vsel %vm4319_vm8, %v278_v62, 0.0  ;;  %1470 = vrot.lane.b32.xlu1 %v1465_v28, %s2433_s28  ;;  %v1539_v4 = vadd.f32 %v1535_v58, %v1530_v52  ;;  %v1541_v5 = vadd.f32 %v1537_v60, %v1532_v53  ;;  %v194_v38 = vpop.permute.xlu0 %193  ;;  %s3539_s28 = sld [smem:[#allocation8 + $0x2d]] }
  0xba   :  { %v1538_v6 = vadd.f32 %v1534_v0, %v1529_v41  ;;  %v1540_v25 = vadd.f32 %v1536_v1, %v1531_v61  ;;  %vm4324_vm15 = vcmp.lt.s32.totalorder %v3084_v50, 14  ;;  %vm90_vm0 = vcmp.lt.s32.totalorder %v3091_v57, 14 }
  0xbb   :  { %v317_v7 = vpop.permute.xlu1 %316  ;;  %v1547_v48 = vsel %vm4320_vm1, %v1541_v5, %v1539_v4  ;;  %vm398_vm3 = vcmp.lt.s32.totalorder %v3065_v35, 46  ;;  %vm81_vm6 = vcmp.ge.s32.totalorder %v3084_v50, 3  ;;  %vm4321_vm9 = vcmp.ge.s32.totalorder %v3091_v57, 3 }
  0xbc   :  { %v319_v9 = vsel %vm318_vm10, %v3097_v59, %v317_v7  ;;  %v320_v10 = vsel %vm318_vm10, %v317_v7, %v3097_v59  ;;  %v1546_v11 = vsel %vm4320_vm1, %v1540_v25, %v1538_v6  ;;  %vm195_vm13 = vcmp.lt.s32.totalorder %v3065_v35, 51  ;;  %vm3216_vm8 = vmand %vm69_vm2, %vm81_vm6 }
  0xbd   :  { %v325_v15 = vsel %vm69_vm2, %v320_v10, 0.0  ;;  %1511 = vrot.lane.b32.xlu1 %v1506_v39, %s2434_s30  ;;  %1550 = vrot.lane.b32.xlu0 %v1546_v11, %s2435_s4  ;;  %v196_v59 = vsel %vm195_vm13, %v3054_v21, %v194_v38  ;;  %v197_v16 = vsel %vm195_vm13, %v194_v38, %v3054_v21  ;;  %v1569_v17 = vstv %s3163_s29  ;;  %vm3230_vm10 = vmand %vm69_vm2, %vm4323_vm11  ;;  %v436_v21 = vpop.permute.xlu0 %435  ;;  %s2443_s29 = smov 83   ;;  %s3566_s30 = sld [smem:[#allocation8 + $0x5e]] }
  0xbe   :  { %v204_v20 = vsel %vm3216_vm8, %v197_v16, 0.0  ;;  %v205_v22 = vsel %vm4321_vm9, %v196_v59, 0.0  ;;  %v1571_v23 = vmul.f32 %v1569_v17, %v2539_v12  ;;  %v1573_v26 = vmul.f32 %v1569_v17, %v2541_v13  ;;  %vm3262_vm8 = vmand %vm69_vm2, %vm4324_vm15 }
  0xbf   :  { %v356_v27 = vpop.permute.xlu1 %355  ;;  %v247_v19 = vadd.f32 %v245_v24, %v204_v20  ;;  %v248_v28 = vadd.f32 %v246_v40, %v205_v22  ;;  %v1574_v30 = vstv %s3183_s3  ;;  %v1570_v31 = vmul.f32 %v1569_v17, %v2492_v44  ;;  %s3582_s3 = sld [smem:[#allocation8 + $0x2e]] }
  0xc0   :  { %v358_v33 = vsel %vm357_vm12, %v3120_v8, %v356_v27  ;;  %v359_v34 = vsel %vm357_vm12, %v356_v27, %v3120_v8  ;;  %v1576_v36 = vmul.f32 %v1574_v30, %v2560_v29  ;;  %v1578_v32 = vmul.f32 %v1574_v30, %v2579_v56 }
  0xc1   :  { %v366_v24 = vsel %vm3230_vm10, %v359_v34, 0.0  ;;  %v367_v40 = vsel %vm88_vm14, %v358_v33, 0.0  ;;  %1552 = vrot.lane.b32.xlu1 %v1547_v48, %s2435_s4  ;;  %v288_v39 = vadd.f32 %v286_v2, %v247_v19  ;;  %v289_v42 = vadd.f32 %v287_v3, %v248_v28  ;;  %s2444_s4 = smov 82  }
  0xc2   :  { %v1580_v8 = vadd.f32 %v1576_v36, %v1571_v23  ;;  %v1582_v51 = vadd.f32 %v1578_v32, %v1573_v26  ;;  %v1572_v52 = vmul.f32 %v1569_v17, %v2494_v45  ;;  %v1575_v53 = vmul.f32 %v1574_v30, %v2496_v46  ;;  %v477_v54 = vpop.permute.xlu0 %476 }
  0xc3   :  { %v397_v55 = vpop.permute.xlu1 %396  ;;  %v327_v58 = vadd.f32 %v325_v15, %v288_v39  ;;  %v328_v60 = vadd.f32 %v319_v9, %v289_v42  ;;  %v1577_v41 = vmul.f32 %v1574_v30, %v2498_v47  ;;  %vm91_vm12 = vcmp.lt.s32.totalorder %v3084_v50, 13 }
  0xc4   :  { %v399_v61 = vsel %vm398_vm3, %v3152_v37, %v397_v55  ;;  %v400_v62 = vsel %vm398_vm3, %v397_v55, %v3152_v37  ;;  %v1588_v63 = vsel %vm4320_vm1, %v1582_v51, %v1580_v8  ;;  %v1579_v0 = vadd.f32 %v1575_v53, %v1570_v31  ;;  %vm3291_vm10 = vmand %vm69_vm2, %vm91_vm12 }
  0xc5   :  { %v407_v1 = vsel %vm3262_vm8, %v400_v62, 0.0  ;;  %v408_v2 = vsel %vm90_vm0, %v399_v61, 0.0  ;;  %1593 = vrot.lane.b32.xlu1 %v1588_v63, %s2436_s9  ;;  %v1581_v3 = vadd.f32 %v1577_v41, %v1572_v52  ;;  %vm92_vm13 = vcmp.lt.s32.totalorder %v3091_v57, 13 }
  0xc6   :  { %v368_v4 = vadd.f32 %v366_v24, %v327_v58  ;;  %v369_v5 = vadd.f32 %v367_v40, %v328_v60  ;;  %vm439_vm3 = vcmp.lt.s32.totalorder %v3065_v35, 45  ;;  %v1610_v6 = vstv %s3240_s5  ;;  %v3296_v25 = vpop.permute.xlu0 %517  ;;  %s3599_s5 = sld [smem:[#allocation8 + $0x5f]] }
  0xc7   :  { %v1587_v38 = vsel %vm4320_vm1, %v1581_v3, %v1579_v0  ;;  %v438_v7 = vpop.permute.xlu1 %437  ;;  %v1612_v48 = vmul.f32 %v1610_v6, %v2539_v12  ;;  %v1614_v9 = vmul.f32 %v1610_v6, %v2541_v13  ;;  %v1615_v10 = vstv %s3244_s6  ;;  %s3604_s6 = sld [smem:[#allocation8 + $0x2f]] }
  0xc8   :  { %1591 = vrot.lane.b32.xlu0 %v1587_v38, %s2436_s9  ;;  %v409_v11 = vadd.f32 %v407_v1, %v368_v4  ;;  %v410_v14 = vadd.f32 %v408_v2, %v369_v5  ;;  %v440_v15 = vsel %vm439_vm3, %v436_v21, %v438_v7  ;;  %v441_v59 = vsel %vm439_vm3, %v438_v7, %v436_v21  ;;  %s2446_s9 = smov 80  }
  0xc9   :  { %v448_v16 = vsel %vm3291_vm10, %v441_v59, 0.0  ;;  %v449_v17 = vsel %vm92_vm13, %v440_v15, 0.0  ;;  %v1617_v18 = vmul.f32 %v1615_v10, %v2560_v29  ;;  %v1619_v20 = vmul.f32 %v1615_v10, %v2579_v56 }
  0xca   :  { %v450_v22 = vadd.f32 %v448_v16, %v409_v11  ;;  %v451_v23 = vadd.f32 %v449_v17, %v410_v14  ;;  %v1611_v26 = vmul.f32 %v1610_v6, %v2492_v44  ;;  %v1613_v27 = vmul.f32 %v1610_v6, %v2494_v45  ;;  %v3312_v21 = vpop.permute.xlu0 %558 }
  0xcb   :  { %v1621_v19 = vadd.f32 %v1617_v18, %v1612_v48  ;;  %v1623_v28 = vadd.f32 %v1619_v20, %v1614_v9  ;;  %v1616_v30 = vmul.f32 %v1615_v10, %v2496_v46  ;;  %v1618_v31 = vmul.f32 %v1615_v10, %v2498_v47  ;;  %v479_v33 = vpop.permute.xlu1 %478 }
  0xcc   :  { %vm71_vm2 = vcmp.ge.s32.totalorder %v3065_v35, 32  ;;  %vm480_vm8 = vcmp.lt.s32.totalorder %v3065_v35, 35  ;;  %v1651_v34 = vstv %s3270_s7  ;;  %v1656_v36 = vstv %s3279_s8  ;;  %s3610_s7 = sld [smem:[#allocation8 + $0x60]]  ;;  %s2445_s8 = smov 81  }
  0xcd   :  { %v1629_v32 = vsel %vm4320_vm1, %v1623_v28, %v1621_v19  ;;  %v1620_v24 = vadd.f32 %v1616_v30, %v1611_v26  ;;  %v1622_v40 = vadd.f32 %v1618_v31, %v1613_v27  ;;  %vm3325_vm3 = vmand %vm71_vm2, %vm81_vm6  ;;  %v481_v42 = vsel %vm480_vm8, %v477_v54, %v479_v33 }
  0xce   :  { %1634 = vrot.lane.b32.xlu1 %v1629_v32, %s2437_s12  ;;  %v482_v43 = vsel %vm480_vm8, %v479_v33, %v477_v54  ;;  %v490_v8 = vsel %vm4321_vm9, %v481_v42, 0.0  ;;  %v1653_v51 = vmul.f32 %v1651_v34, %v2539_v12  ;;  %v1655_v52 = vmul.f32 %v1651_v34, %v2541_v13  ;;  %v3337_v53 = vpop.permute.xlu0 %599  ;;  %vm3352_vm10 = vmand %vm71_vm2, %vm83_vm4 }
  0xcf   :  { %v1628_v55 = vsel %vm4320_vm1, %v1622_v40, %v1620_v24  ;;  %v489_v58 = vsel %vm3325_vm3, %v482_v43, 0.0  ;;  %v492_v60 = vadd.f32 %v490_v8, %v451_v23  ;;  %v1658_v41 = vmul.f32 %v1656_v36, %v2560_v29  ;;  %v520_v54 = vpop.permute.xlu1 %519 }
  0xd0   :  { %1632 = vrot.lane.b32.xlu0 %v1628_v55, %s2437_s12  ;;  %v491_v61 = vadd.f32 %v489_v58, %v450_v22  ;;  %v1660_v62 = vmul.f32 %v1656_v36, %v2579_v56  ;;  %v1652_v63 = vmul.f32 %v1651_v34, %v2492_v44  ;;  %v1654_v0 = vmul.f32 %v1651_v34, %v2494_v45  ;;  %s2447_s12 = smov 79  }
  0xd1   :  { %v1662_v2 = vadd.f32 %v1658_v41, %v1653_v51  ;;  %v1657_v3 = vmul.f32 %v1656_v36, %v2496_v46  ;;  %v1659_v4 = vmul.f32 %v1656_v36, %v2498_v47  ;;  %vm521_vm8 = vcmp.lt.s32.totalorder %v3065_v35, 34 }
  0xd2   :  { %v1664_v5 = vadd.f32 %v1660_v62, %v1655_v52  ;;  %v522_v37 = vsel %vm521_vm8, %v3296_v25, %v520_v54  ;;  %v523_v6 = vsel %vm521_vm8, %v520_v54, %v3296_v25  ;;  %v1692_v38 = vstv %s3310_s10  ;;  %v3362_v7 = vpop.permute.xlu0 %638  ;;  %s3631_s10 = sld [smem:[#allocation8 + $0x30]] }
  0xd3   :  { %v1661_v48 = vadd.f32 %v1657_v3, %v1652_v63  ;;  %v1663_v9 = vadd.f32 %v1659_v4, %v1654_v0  ;;  %v530_v10 = vsel %vm3352_vm10, %v523_v6, 0.0  ;;  %v531_v11 = vsel %vm4322_vm7, %v522_v37, 0.0  ;;  %v561_v14 = vpop.permute.xlu1 %560  ;;  %vm3388_vm10 = vmand %vm71_vm2, %vm4325_vm5 }
  0xd4   :  { %v1670_v15 = vsel %vm4320_vm1, %v1664_v5, %v1662_v2  ;;  %v532_v59 = vadd.f32 %v530_v10, %v491_v61  ;;  %v533_v16 = vadd.f32 %v531_v11, %v492_v60  ;;  %v1694_v17 = vmul.f32 %v1692_v38, %v2539_v12 }
  0xd5   :  { %1675 = vrot.lane.b32.xlu1 %v1670_v15, %s2438_s15  ;;  %v1669_v25 = vsel %vm4320_vm1, %v1663_v9, %v1661_v48  ;;  %v1696_v18 = vmul.f32 %v1692_v38, %v2541_v13  ;;  %v1697_v20 = vstv %s3329_s11  ;;  %v1693_v22 = vmul.f32 %v1692_v38, %v2492_v44  ;;  %s2273_s11 = sld [smem:[#allocation8 + $0x61]] }
  0xd6   :  { %1673 = vrot.lane.b32.xlu0 %v1669_v25, %s2438_s15  ;;  %v1699_v23 = vmul.f32 %v1697_v20, %v2560_v29  ;;  %v1701_v26 = vmul.f32 %v1697_v20, %v2579_v56  ;;  %v1695_v27 = vmul.f32 %v1692_v38, %v2494_v45  ;;  %v1698_v19 = vmul.f32 %v1697_v20, %v2496_v46  ;;  %v3380_v28 = vpop.permute.xlu0 %679  ;;  %s3739_s15 = sld [smem:[#allocation8 + $0x18]] }
  0xd7   :  { %v1700_v30 = vmul.f32 %v1697_v20, %v2498_v47  ;;  %vm562_vm3 = vcmp.lt.s32.totalorder %v3065_v35, 33  ;;  %v1731_v33 = vstv %s3335_s13  ;;  %v1736_v34 = vstv %s3343_s14  ;;  %v602_v36 = vpop.permute.xlu1 %601  ;;  %s2448_s13 = smov 78   ;;  %s2449_s14 = smov 77  }
  0xd8   :  { %v1703_v32 = vadd.f32 %v1699_v23, %v1694_v17  ;;  %v1705_v24 = vadd.f32 %v1701_v26, %v1696_v18  ;;  %v1702_v40 = vadd.f32 %v1698_v19, %v1693_v22  ;;  %v563_v39 = vsel %vm562_vm3, %v3312_v21, %v561_v14 }
  0xd9   :  { %v1704_v42 = vadd.f32 %v1700_v30, %v1695_v27  ;;  %v564_v43 = vsel %vm562_vm3, %v561_v14, %v3312_v21  ;;  %vm4344_vm8 = vcmp.ge.s32.totalorder %v3091_v57, 1  ;;  %v1733_v51 = vmul.f32 %v1731_v33, %v2539_v12 }
  0xda   :  { %v572_v8 = vsel %vm4344_vm8, %v563_v39, 0.0  ;;  %v1711_v52 = vsel %vm4320_vm1, %v1705_v24, %v1703_v32  ;;  %v571_v55 = vsel %vm3388_vm10, %v564_v43, 0.0  ;;  %v1735_v60 = vmul.f32 %v1731_v33, %v2541_v13  ;;  %v3407_v41 = vpop.permute.xlu0 %720  ;;  %vm3443_vm10 = vmand %vm71_vm2, %vm4323_vm11 }
  0xdb   :  { %v574_v58 = vadd.f32 %v572_v8, %v533_v16  ;;  %1716 = vrot.lane.b32.xlu1 %v1711_v52, %s2439_s19  ;;  %v1710_v21 = vsel %vm4320_vm1, %v1704_v42, %v1702_v40  ;;  %v573_v54 = vadd.f32 %v571_v55, %v532_v59  ;;  %v1738_v61 = vmul.f32 %v1736_v34, %v2560_v29  ;;  %v641_v63 = vpop.permute.xlu1 %640 }
  0xdc   :  { %v1740_v62 = vmul.f32 %v1736_v34, %v2579_v56  ;;  %1714 = vrot.lane.b32.xlu0 %v1710_v21, %s2439_s19  ;;  %v1732_v0 = vmul.f32 %v1731_v33, %v2492_v44  ;;  %v1734_v1 = vmul.f32 %v1731_v33, %v2494_v45  ;;  %v1737_v2 = vmul.f32 %v1736_v34, %v2496_v46 }
  0xdd   :  { %v1739_v3 = vmul.f32 %v1736_v34, %v2498_v47  ;;  %v1742_v4 = vadd.f32 %v1738_v61, %v1733_v51  ;;  %vm603_vm3 = vcmp.lt.s32.totalorder %v3065_v35, 32  ;;  %v1772_v37 = vstv %s3374_s16  ;;  %s3749_s16 = sld [smem:[#allocation8 + $0x49]] }
  0xde   :  { %v1744_v5 = vadd.f32 %v1740_v62, %v1735_v60  ;;  %v1741_v6 = vadd.f32 %v1737_v2, %v1732_v0  ;;  %v604_v48 = vsel %vm603_vm3, %v3337_v53, %v602_v36  ;;  %v605_v9 = vsel %vm603_vm3, %v602_v36, %v3337_v53  ;;  %v3422_v10 = vpop.permute.xlu0 %761 }
  0xdf   :  { %v1743_v38 = vadd.f32 %v1739_v3, %v1734_v1  ;;  %v610_v14 = vsel %vm71_vm2, %v605_v9, 0.0  ;;  %v613_v15 = vadd.f32 %v604_v48, %v574_v58  ;;  %v1774_v59 = vmul.f32 %v1772_v37, %v2539_v12  ;;  %v682_v16 = vpop.permute.xlu1 %681 }
  0xe0   :  { %v1750_v11 = vsel %vm4320_vm1, %v1744_v5, %v1742_v4  ;;  %v612_v17 = vadd.f32 %v610_v14, %v573_v54  ;;  %v1776_v25 = vmul.f32 %v1772_v37, %v2541_v13  ;;  %v1777_v18 = vstv %s3395_s17  ;;  %s2450_s17 = smov [#allocation9]  }
  0xe1   :  { %1755 = vrot.lane.b32.xlu1 %v1750_v11, %s2440_s0  ;;  %v1749_v53 = vsel %vm4320_vm1, %v1743_v38, %v1741_v6  ;;  %v1779_v20 = vmul.f32 %v1777_v18, %v2560_v29  ;;  %v1781_v22 = vmul.f32 %v1777_v18, %v2579_v56  ;;  %v1773_v23 = vmul.f32 %v1772_v37, %v2492_v44 }
  0xe2   :  { %1753 = vrot.lane.b32.xlu0 %v1749_v53, %s2440_s0  ;;  %v1775_v26 = vmul.f32 %v1772_v37, %v2494_v45  ;;  %v1778_v19 = vmul.f32 %v1777_v18, %v2496_v46  ;;  %v1780_v30 = vmul.f32 %v1777_v18, %v2498_v47  ;;  %vm642_vm8 = vcmp.lt.s32.totalorder %v3065_v35, 31  ;;  %v3451_v33 = vpop.permute.xlu0 %802 }
  0xe3   :  { %v1813_v31 = vstv %s3405_s18  ;;  %v1783_v34 = vadd.f32 %v1779_v20, %v1774_v59  ;;  %v1785_v36 = vadd.f32 %v1781_v22, %v1776_v25  ;;  %v643_v32 = vsel %vm642_vm8, %v3362_v7, %v641_v63  ;;  %v3455_v40 = vpop.permute.xlu1 %722  ;;  %s2167_s18 = sshll.u32 %s2450_s17, 4  ;;  %s2168_s18 = int_to_ptr.vmem [resolvable:$true] %s2167_s18 }
  0xe4   :  { %v644_v24 = vsel %vm642_vm8, %v641_v63, %v3362_v7  ;;  %v1782_v39 = vadd.f32 %v1778_v19, %v1773_v23  ;;  %v1784_v42 = vadd.f32 %v1780_v30, %v1775_v26  ;;  %v652_v8 = vsel %vm88_vm14, %v643_v32, 0.0  ;;  %vm3519_vm8 = vmand %vm71_vm2, %vm91_vm12  ;;  %s2372_s19 = scalar_lea.vmem %s2168_s18, 64  ;;  %p2377_p11 = scmp.lt.s32.totalorder %s2168_s18, %s2168_s18 }
  0xe5   :  { %v651_v43 = vsel %vm3443_vm10, %v644_v24, 0.0  ;;  %v1791_v51 = vsel %vm4320_vm1, %v1785_v36, %v1783_v34  ;;  %v654_v55 = vadd.f32 %v652_v8, %v613_v15  ;;  %v1815_v58 = vmul.f32 %v1813_v31, %v2539_v12  ;;  %vm3483_vm10 = vmand %vm71_vm2, %vm4324_vm15  ;;  %p2373_p10 = scmp.ne.s32.totalorder %s2168_s18, %s2372_s19  ;;  %p2378_p12 = scmp.lt.s32.totalorder %s2372_s19, %s2372_s19 }
  0xe6   :  { %v653_v52 = vadd.f32 %v651_v43, %v612_v17  ;;  %1796 = vrot.lane.b32.xlu1 %v1791_v51, %s2441_s22  ;;  %v1790_v7 = vsel %vm4320_vm1, %v1784_v42, %v1782_v39  ;;  %v1817_v60 = vmul.f32 %v1813_v31, %v2541_v13  ;;  %v1818_v21 = vstv %s3420_s1  ;;  %v3469_v61 = vpop.permute.xlu0 %843 }
  0xe7   :  { %v1814_v54 = vmul.f32 %v1813_v31, %v2492_v44  ;;  %1794 = vrot.lane.b32.xlu0 %v1790_v7, %s2441_s22  ;;  %v1820_v62 = vmul.f32 %v1818_v21, %v2560_v29  ;;  %v1822_v63 = vmul.f32 %v1818_v21, %v2579_v56  ;;  %v1816_v0 = vmul.f32 %v1813_v31, %v2494_v45  ;;  %v3475_v2 = vpop.permute.xlu1 %763  ;;  %p2379_p13 = por %p2378_p12, %p2377_p11 }
  0xe8   :  { %v1819_v1 = vmul.f32 %v1818_v21, %v2496_v46  ;;  %v1821_v3 = vmul.f32 %v1818_v21, %v2498_v47  ;;  %vm683_vm3 = vcmp.lt.s32.totalorder %v3065_v35, 30  ;;  %v1854_v5 = vstv %s3428_s20 }
  0xe9   :  { %v1859_v37 = vstv %s3433_s21  ;;  %v1824_v6 = vadd.f32 %v1820_v62, %v1815_v58  ;;  %v1826_v38 = vadd.f32 %v1822_v63, %v1817_v60  ;;  %v684_v9 = vsel %vm683_vm3, %v3380_v28, %v682_v16  ;;  %p2380_p0 = pnand %p2379_p13, %p2373_p10 }
  0xea   :  { %v1823_v48 = vadd.f32 %v1819_v1, %v1814_v54  ;;  %v1825_v11 = vadd.f32 %v1821_v3, %v1816_v0  ;;  %v685_v14 = vsel %vm683_vm3, %v682_v16, %v3380_v28  ;;  %v693_v15 = vsel %vm90_vm0, %v684_v9, 0.0  ;;  %v3496_v53 = vpop.permute.xlu0 %884 }
  0xeb   :  { %v1856_v59 = vmul.f32 %v1854_v5, %v2539_v12  ;;  %v1832_v17 = vsel %vm4320_vm1, %v1826_v38, %v1824_v6  ;;  %v692_v25 = vsel %vm3483_vm10, %v685_v14, 0.0  ;;  %v695_v18 = vadd.f32 %v693_v15, %v654_v55  ;;  %v3504_v28 = vpop.permute.xlu1 %804 }
  0xec   :  { %v1858_v20 = vmul.f32 %v1854_v5, %v2541_v13  ;;  %1837 = vrot.lane.b32.xlu1 %v1832_v17, %s2442_s26  ;;  %v1831_v16 = vsel %vm4320_vm1, %v1825_v11, %v1823_v48  ;;  %v694_v22 = vadd.f32 %v692_v25, %v653_v52  ;;  %v1861_v23 = vmul.f32 %v1859_v37, %v2560_v29 }
  0xed   :  { %v1863_v26 = vmul.f32 %v1859_v37, %v2579_v56  ;;  %1835 = vrot.lane.b32.xlu0 %v1831_v16, %s2442_s26  ;;  %v1855_v27 = vmul.f32 %v1854_v5, %v2492_v44  ;;  %v1857_v19 = vmul.f32 %v1854_v5, %v2494_v45  ;;  %v1860_v30 = vmul.f32 %v1859_v37, %v2496_v46 }
  0xee   :  { %v1862_v31 = vmul.f32 %v1859_v37, %v2498_v47  ;;  %v1865_v36 = vadd.f32 %v1861_v23, %v1856_v59  ;;  %vm724_vm3 = vcmp.lt.s32.totalorder %v3065_v35, 29  ;;  %v1895_v24 = vstv %s3467_s23  ;;  %v3525_v39 = vpop.permute.xlu0 %923 }
  0xef   :  { %v1867_v32 = vadd.f32 %v1863_v26, %v1858_v20  ;;  %v1864_v42 = vadd.f32 %v1860_v30, %v1855_v27  ;;  %v725_v8 = vsel %vm724_vm3, %v3407_v41, %v3455_v40  ;;  %v726_v51 = vsel %vm724_vm3, %v3455_v40, %v3407_v41  ;;  %v3531_v52 = vpop.permute.xlu1 %845 }
  0xf0   :  { %v1866_v43 = vadd.f32 %v1862_v31, %v1857_v19  ;;  %v733_v58 = vsel %vm3519_vm8, %v726_v51, 0.0  ;;  %v734_v7 = vsel %vm92_vm13, %v725_v8, 0.0  ;;  %v1897_v60 = vmul.f32 %v1895_v24, %v2539_v12 }
  0xf1   :  { %v1873_v55 = vsel %vm4320_vm1, %v1867_v32, %v1865_v36  ;;  %v735_v54 = vadd.f32 %v733_v58, %v694_v22  ;;  %v736_v41 = vadd.f32 %v734_v7, %v695_v18  ;;  %v1899_v40 = vmul.f32 %v1895_v24, %v2541_v13 }
  0xf2   :  { %1878 = vrot.lane.b32.xlu1 %v1873_v55, %s2443_s29  ;;  %v1872_v21 = vsel %vm4320_vm1, %v1866_v43, %v1864_v42  ;;  %v1900_v62 = vstv %s3494_s24  ;;  %v1896_v63 = vmul.f32 %v1895_v24, %v2492_v44  ;;  %v1898_v0 = vmul.f32 %v1895_v24, %v2494_v45  ;;  %v3547_v1 = vpop.permute.xlu0 %964 }
  0xf3   :  { %1876 = vrot.lane.b32.xlu0 %v1872_v21, %s2443_s29  ;;  %vm73_vm2 = vcmp.ge.s32.totalorder %v3065_v35, 16  ;;  %v1902_v3 = vmul.f32 %v1900_v62, %v2560_v29  ;;  %v1904_v4 = vmul.f32 %v1900_v62, %v2579_v56  ;;  %v1901_v5 = vmul.f32 %v1900_v62, %v2496_v46  ;;  %v3553_v6 = vpop.permute.xlu1 %886 }
  0xf4   :  { %v1903_v37 = vmul.f32 %v1900_v62, %v2498_v47  ;;  %vm765_vm10 = vcmp.lt.s32.totalorder %v3065_v35, 19  ;;  %vm3560_vm8 = vmand %vm73_vm2, %vm81_vm6  ;;  %v1936_v48 = vstv %s3502_s25  ;;  %v1941_v9 = vstv %s3509_s27 }
  0xf5   :  { %v1906_v11 = vadd.f32 %v1902_v3, %v1897_v60  ;;  %v1908_v14 = vadd.f32 %v1904_v4, %v1899_v40  ;;  %v1905_v15 = vadd.f32 %v1901_v5, %v1896_v63  ;;  %v766_v17 = vsel %vm765_vm10, %v3422_v10, %v3475_v2 }
  0xf6   :  { %v1907_v59 = vadd.f32 %v1903_v37, %v1898_v0  ;;  %v767_v25 = vsel %vm765_vm10, %v3475_v2, %v3422_v10  ;;  %v1938_v18 = vmul.f32 %v1936_v48, %v2539_v12  ;;  %v1940_v20 = vmul.f32 %v1936_v48, %v2541_v13  ;;  %v3574_v16 = vpop.permute.xlu0 %1005 }
  0xf7   :  { %v1914_v22 = vsel %vm4320_vm1, %v1908_v14, %v1906_v11  ;;  %v774_v26 = vsel %vm3560_vm8, %v767_v25, 0.0  ;;  %v775_v27 = vsel %vm4321_vm9, %v766_v17, 0.0  ;;  %v3584_v10 = vpop.permute.xlu1 %925  ;;  %v1943_v30 = vmul.f32 %v1941_v9, %v2560_v29  ;;  %vm3715_vm8 = vmand %vm73_vm2, %vm83_vm4 }
  0xf8   :  { %v1913_v23 = vsel %vm4320_vm1, %v1907_v59, %v1905_v15  ;;  %1919 = vrot.lane.b32.xlu1 %v1914_v22, %s2444_s4  ;;  %v3586_v2 = vadd.f32 %v774_v26, %v735_v54  ;;  %v3588_v19 = vadd.f32 %v775_v27, %v736_v41  ;;  %v1977_v31 = vstv %s3539_s28  ;;  %vm3728_vm9 = vmand %vm73_vm2, %vm4325_vm5 }
  0xf9   :  { %1917 = vrot.lane.b32.xlu0 %v1913_v23, %s2444_s4  ;;  %v1945_v34 = vmul.f32 %v1941_v9, %v2579_v56  ;;  %v1937_v36 = vmul.f32 %v1936_v48, %v2492_v44  ;;  %v1939_v32 = vmul.f32 %v1936_v48, %v2494_v45  ;;  %v1942_v24 = vmul.f32 %v1941_v9, %v2496_v46 }
  0xfa   :  { %v1947_v42 = vadd.f32 %v1943_v30, %v1938_v18  ;;  %v1944_v43 = vmul.f32 %v1941_v9, %v2498_v47  ;;  %v3597_v8 = vpop.permute.xlu0 %1046  ;;  %v1979_v60 = vmul.f32 %v1977_v31, %v2539_v12  ;;  %v1981_v54 = vmul.f32 %v1977_v31, %v2541_v13 }
  0xfb   :  { %v1949_v51 = vadd.f32 %v1945_v34, %v1940_v20  ;;  %v1946_v55 = vadd.f32 %v1942_v24, %v1937_v36  ;;  %v3601_v58 = vpop.permute.xlu1 %966  ;;  %v1982_v41 = vstv %s3566_s30  ;;  %v1978_v40 = vmul.f32 %v1977_v31, %v2492_v44 }
  0xfc   :  { %v1948_v7 = vadd.f32 %v1944_v43, %v1939_v32  ;;  %v1984_v63 = vmul.f32 %v1982_v41, %v2560_v29  ;;  %v1986_v0 = vmul.f32 %v1982_v41, %v2579_v56  ;;  %v1980_v3 = vmul.f32 %v1977_v31, %v2494_v45 }
  0xfd   :  { %v1955_v21 = vsel %vm4320_vm1, %v1949_v51, %v1947_v42  ;;  %v1983_v5 = vmul.f32 %v1982_v41, %v2496_v46  ;;  %v1985_v37 = vmul.f32 %v1982_v41, %v2498_v47  ;;  %v2016_v38 = vstv %s3582_s3 }
  0xfe   :  { %1960 = vrot.lane.b32.xlu1 %v1955_v21, %s2445_s8  ;;  %v1954_v62 = vsel %vm4320_vm1, %v1948_v7, %v1946_v55  ;;  %v3616_v4 = vpop.permute.xlu0 %1085  ;;  %v1988_v9 = vadd.f32 %v1984_v63, %v1979_v60  ;;  %v1990_v11 = vadd.f32 %v1986_v0, %v1981_v54  ;;  %v2018_v17 = vmul.f32 %v2016_v38, %v2539_v12 }
  0xff   :  { %1958 = vrot.lane.b32.xlu0 %v1954_v62, %s2445_s8  ;;  %v3621_v48 = vpop.permute.xlu1 %1007  ;;  %v1987_v14 = vadd.f32 %v1983_v5, %v1978_v40  ;;  %v1989_v15 = vadd.f32 %v1985_v37, %v1980_v3  ;;  %v2020_v20 = vmul.f32 %v2016_v38, %v2541_v13  ;;  %v2021_v22 = vstv %s3599_s5 }
 0x100   :  { %v1996_v59 = vsel %vm4320_vm1, %v1990_v11, %v1988_v9  ;;  %v2017_v23 = vmul.f32 %v2016_v38, %v2492_v44  ;;  %v2023_v27 = vmul.f32 %v2021_v22, %v2560_v29  ;;  %v2025_v30 = vmul.f32 %v2021_v22, %v2579_v56 }
 0x101   :  { %v1995_v18 = vsel %vm4320_vm1, %v1989_v15, %v1987_v14  ;;  %v2019_v31 = vmul.f32 %v2016_v38, %v2494_v45  ;;  %v2022_v34 = vmul.f32 %v2021_v22, %v2496_v46  ;;  %v2024_v36 = vmul.f32 %v2021_v22, %v2498_v47 }
 0x102   :  { %v3625_v25 = vpop.permute.xlu0 %1124  ;;  %2001 = vrot.lane.b32.xlu1 %v1996_v59, %s2446_s9  ;;  %v2057_v32 = vstv %s3604_s6  ;;  %v2062_v24 = vstv %s3610_s7  ;;  %v2027_v42 = vadd.f32 %v2023_v27, %v2018_v17  ;;  %v2029_v43 = vadd.f32 %v2025_v30, %v2020_v20 }
 0x103   :  { %v3633_v26 = vpop.permute.xlu1 %1048  ;;  %1999 = vrot.lane.b32.xlu0 %v1995_v18, %s2446_s9  ;;  %v2026_v51 = vadd.f32 %v2022_v34, %v2017_v23  ;;  %v2028_v7 = vadd.f32 %v2024_v36, %v2019_v31  ;;  %v2059_v60 = vmul.f32 %v2057_v32, %v2539_v12  ;;  %v2061_v41 = vmul.f32 %v2057_v32, %v2541_v13 }
 0x104   :  { %v2035_v54 = vsel %vm4320_vm1, %v2029_v43, %v2027_v42  ;;  %v2064_v40 = vmul.f32 %v2062_v24, %v2560_v29  ;;  %v2066_v63 = vmul.f32 %v2062_v24, %v2579_v56  ;;  %v2058_v0 = vmul.f32 %v2057_v32, %v2492_v44 }
 0x105   :  { %v2034_v62 = vsel %vm4320_vm1, %v2028_v7, %v2026_v51  ;;  %v2060_v5 = vmul.f32 %v2057_v32, %v2494_v45  ;;  %v2063_v37 = vmul.f32 %v2062_v24, %v2496_v46  ;;  %v2065_v38 = vmul.f32 %v2062_v24, %v2498_v47 }
 0x106   :  { %v3642_v55 = vpop.permute.xlu0 %1189  ;;  %2040 = vrot.lane.b32.xlu1 %v2035_v54, %s2447_s12  ;;  %v2068_v3 = vadd.f32 %v2064_v40, %v2059_v60  ;;  %v2070_v11 = vadd.f32 %v2066_v63, %v2061_v41  ;;  %v2098_v14 = vstv %s3631_s10  ;;  %v2103_v18 = vstv %s2273_s11 }
 0x107   :  { %v3645_v21 = vpop.permute.xlu1 %1087  ;;  %2038 = vrot.lane.b32.xlu0 %v2034_v62, %s2447_s12  ;;  %v2067_v59 = vadd.f32 %v2063_v37, %v2058_v0  ;;  %v2069_v17 = vadd.f32 %v2065_v38, %v2060_v5  ;;  %v2100_v22 = vmul.f32 %v2098_v14, %v2539_v12  ;;  %v2102_v27 = vmul.f32 %v2098_v14, %v2541_v13 }
 0x108   :  { %v2076_v20 = vsel %vm4320_vm1, %v2070_v11, %v2068_v3  ;;  %v2105_v31 = vmul.f32 %v2103_v18, %v2560_v29  ;;  %v2107_v34 = vmul.f32 %v2103_v18, %v2579_v56  ;;  %v2099_v36 = vmul.f32 %v2098_v14, %v2492_v44 }
 0x109   :  { %v2075_v23 = vsel %vm4320_vm1, %v2069_v17, %v2067_v59  ;;  %v2101_v32 = vmul.f32 %v2098_v14, %v2494_v45  ;;  %v2104_v42 = vmul.f32 %v2103_v18, %v2496_v46  ;;  %v2106_v43 = vmul.f32 %v2103_v18, %v2498_v47 }
 0x10a   :  { %v3656_v9 = vpop.permute.xlu0 %1228  ;;  %2081 = vrot.lane.b32.xlu1 %v2076_v20, %s2448_s13  ;;  %v2109_v51 = vadd.f32 %v2105_v31, %v2100_v22  ;;  %v2111_v7 = vadd.f32 %v2107_v34, %v2102_v27  ;;  %vm806_vm3 = vcmp.lt.s32.totalorder %v3065_v35, 18  ;;  %vm847_vm10 = vcmp.lt.s32.totalorder %v3065_v35, 17 }
 0x10b   :  { %v3659_v15 = vpop.permute.xlu1 %1126  ;;  %2079 = vrot.lane.b32.xlu0 %v2075_v23, %s2448_s13  ;;  %v2108_v60 = vadd.f32 %v2104_v42, %v2099_v36  ;;  %v2110_v54 = vadd.f32 %v2106_v43, %v2101_v32  ;;  %v808_v34 = vsel %vm806_vm3, %v3504_v28, %v3451_v33  ;;  %v807_v36 = vsel %vm806_vm3, %v3451_v33, %v3504_v28 }
 0x10c   :  { %v2117_v40 = vsel %vm4320_vm1, %v2111_v7, %v2109_v51  ;;  %v849_v42 = vsel %vm847_vm10, %v3531_v52, %v3469_v61  ;;  %v815_v43 = vsel %vm3715_vm8, %v808_v34, 0.0  ;;  %v848_v51 = vsel %vm847_vm10, %v3469_v61, %v3531_v52 }
 0x10d   :  { %v2116_v63 = vsel %vm4320_vm1, %v2110_v54, %v2108_v60  ;;  %vm888_vm1 = vcmp.lt.s32.totalorder %v3065_v35, 16  ;;  %vm927_vm3 = vcmp.lt.s32.totalorder %v3065_v35, 15  ;;  %v816_v28 = vsel %vm4322_vm7, %v807_v36, 0.0  ;;  %vm3763_vm7 = vmand %vm73_vm2, %vm4323_vm11 }
 0x10e   :  { %v3665_v30 = vpop.permute.xlu0 %1267  ;;  %2122 = vrot.lane.b32.xlu1 %v2117_v40, %s2449_s14  ;;  %v890_v7 = vsel %vm888_vm1, %v3553_v6, %v3496_v53  ;;  %v856_v61 = vsel %vm3728_vm9, %v849_v42, 0.0  ;;  %vm968_vm10 = vcmp.lt.s32.totalorder %v3065_v35, 14  ;;  %v817_v52 = vadd.f32 %v815_v43, %v3586_v2 }
 0x10f   :  { %v3671_v24 = vpop.permute.xlu1 %1191  ;;  %2120 = vrot.lane.b32.xlu0 %v2116_v63, %s2449_s14  ;;  %vm4357_vm8 = vcmp.ge.s32.totalorder %v3091_v57, 1  ;;  %v929_v63 = vsel %vm927_vm3, %v3584_v10, %v3525_v39  ;;  %v818_v31 = vadd.f32 %v816_v28, %v3588_v19  ;;  %v895_v2 = vsel %vm73_vm2, %v890_v7, 0.0 }
 0x110   :  { %v857_v54 = vsel %vm4357_vm8, %v848_v51, 0.0  ;;  %vm1009_vm9 = vcmp.lt.s32.totalorder %v3065_v35, 13  ;;  %v858_v34 = vadd.f32 %v856_v61, %v817_v52  ;;  %vm3779_vm8 = vmand %vm73_vm2, %vm4324_vm15  ;;  %v970_v32 = vsel %vm968_vm10, %v3601_v58, %v3547_v1 }
 0x111   :  { %vm1050_vm11 = vcmp.lt.s32.totalorder %v3065_v35, 3  ;;  %v859_v19 = vadd.f32 %v857_v54, %v818_v31  ;;  %v936_v42 = vsel %vm3763_vm7, %v929_v63, 0.0  ;;  %v889_v51 = vsel %vm888_vm1, %v3496_v53, %v3553_v6  ;;  %vm3804_vm15 = vmand %vm73_vm2, %vm91_vm12 }
 0x112   :  { %v3675_v41 = vpop.permute.xlu0 %1306  ;;  %v897_v28 = vadd.f32 %v895_v2, %v858_v34  ;;  %v928_v7 = vsel %vm927_vm3, %v3525_v39, %v3584_v10  ;;  %v1011_v52 = vsel %vm1009_vm9, %v3621_v48, %v3574_v16  ;;  %v969_v39 = vsel %vm968_vm10, %v3547_v1, %v3601_v58 }
 0x113   :  { %v3678_v62 = vpop.permute.xlu1 %1230  ;;  %v977_v6 = vsel %vm3779_vm8, %v970_v32, 0.0  ;;  %v1052_v10 = vsel %vm1050_vm11, %v3633_v26, %v3597_v8  ;;  %vm1089_vm1 = vcmp.lt.s32.totalorder %v3065_v35, 2  ;;  %v1141_v40 = vstv %s3739_s15 }
 0x114   :  { %v938_v54 = vadd.f32 %v936_v42, %v897_v28  ;;  %v1146_v63 = vstv %s3749_s16  ;;  %v898_v31 = vadd.f32 %v889_v51, %v859_v19  ;;  %v937_v2 = vsel %vm88_vm14, %v928_v7, 0.0 }
 0x115   :  { %v1018_v1 = vsel %vm3804_vm15, %v1011_v52, 0.0  ;;  %vm1128_vm7 = vcmp.lt.s32.totalorder %v3065_v35, 1  ;;  %v978_v58 = vsel %vm90_vm0, %v969_v39, 0.0  ;;  %v1057_v36 = vsel %vm81_vm6, %v1052_v10, 0.0 }
 0x116   :  { %v3683_v3 = vpop.permute.xlu0 %1347  ;;  %v979_v34 = vadd.f32 %v977_v6, %v938_v54  ;;  %v1091_v32 = vsel %vm1089_vm1, %v3645_v21, %v3616_v4  ;;  %v1142_v19 = vmul.f32 %v1141_v40, %v2492_v44  ;;  %v1144_v42 = vmul.f32 %v1141_v40, %v2494_v45 }
 0x117   :  { %v3681_v0 = vpop.permute.xlu1 %1269  ;;  %v1147_v51 = vmul.f32 %v1146_v63, %v2496_v46  ;;  %v1149_v28 = vmul.f32 %v1146_v63, %v2498_v47  ;;  %v939_v61 = vadd.f32 %v937_v2, %v898_v31  ;;  %v1010_v52 = vsel %vm1009_vm9, %v3574_v16, %v3621_v48 }
 0x118   :  { %v1020_v39 = vadd.f32 %v1018_v1, %v979_v34  ;;  %v1130_v44 = vsel %vm1128_vm7, %v3659_v15, %v3625_v25  ;;  %v1051_v45 = vsel %vm1050_vm11, %v3597_v8, %v3633_v26  ;;  %v1096_v46 = vsel %vm83_vm4, %v1091_v32, 0.0 }
 0x119   :  { %v980_v47 = vadd.f32 %v978_v58, %v939_v61  ;;  %v1019_v16 = vsel %vm92_vm13, %v1010_v52, 0.0  ;;  %v1135_v48 = vsel %vm4325_vm5, %v1130_v44, 0.0  ;;  %v1151_v54 = vadd.f32 %v1147_v51, %v1142_v19 }
 0x11a   :  { %v3687_v37 = vpop.permute.xlu0 %1388  ;;  %v1059_v10 = vadd.f32 %v1057_v36, %v1020_v39  ;;  %v1153_v31 = vadd.f32 %v1149_v28, %v1144_v42  ;;  %vm4364_vm15 = vcmp.ge.s32.totalorder %v3091_v57, 3  ;;  %v1090_v8 = vsel %vm1089_vm1, %v3616_v4, %v3645_v21 }
 0x11b   :  { %v3685_v5 = vpop.permute.xlu1 %1308  ;;  %v1058_v2 = vsel %vm4364_vm15, %v1051_v45, 0.0  ;;  %v1143_v1 = vmul.f32 %v1141_v40, %v2539_v12  ;;  %v1145_v58 = vmul.f32 %v1141_v40, %v2541_v13  ;;  %v1148_v34 = vmul.f32 %v1146_v63, %v2560_v29 }
 0x11c   :  { %v1098_v26 = vadd.f32 %v1096_v46, %v1059_v10  ;;  %v1150_v36 = vmul.f32 %v1146_v63, %v2579_v56  ;;  %vm1193_vm11 = vcmp.lt.s32.totalorder %v3065_v35, 127  ;;  %v1021_v19 = vadd.f32 %v1019_v16, %v980_v47 }
 0x11d   :  { %v1129_v42 = vsel %vm1128_vm7, %v3625_v25, %v3659_v15  ;;  %vm4365_vm2 = vcmp.ge.s32.totalorder %v3091_v57, 2  ;;  %vm4366_vm3 = vcmask 1041409   ;;  %vm1232_vm10 = vcmp.lt.s32.totalorder %v3065_v35, 126 }
 0x11e   :  { %v3693_v14 = vpop.permute.xlu0 %1429  ;;  %v1137_v4 = vadd.f32 %v1135_v48, %v1098_v26  ;;  %v1097_v12 = vsel %vm4365_vm2, %v1090_v8, 0.0  ;;  %v1159_v13 = vsel %vm4366_vm3, %v1153_v31, %v1151_v54  ;;  %v1060_v29 = vadd.f32 %v1058_v2, %v1021_v19  ;;  %vm4369_vm15 = vmmov %vm4366_vm3 }
 0x11f   :  { %v3689_v38 = vpop.permute.xlu1 %1349  ;;  %v1194_v56 = vsel %vm1193_vm11, %v3642_v55, %v3671_v24  ;;  %vm4367_vm9 = vcmp.ge.s32.totalorder %v3091_v57, 1  ;;  %v1152_v25 = vadd.f32 %v1148_v34, %v1143_v1  ;;  %v1154_v15 = vadd.f32 %v1150_v36, %v1145_v58 }
 0x120   :  { %v1136_v40 = vsel %vm4367_vm9, %v1129_v42, 0.0  ;;  %vm1271_vm8 = vcmp.lt.s32.totalorder %v3065_v35, 125  ;;  %v1099_v63 = vadd.f32 %v1097_v12, %v1060_v29  ;;  %v1163_v51 = vadd.f32 %v1159_v13, %v1137_v4 }
 0x121   :  { %v1233_v28 = vsel %vm1232_vm10, %v3656_v9, %v3678_v62  ;;  %vm4368_vm1 = vcmp.lt.s32.totalorder %v3084_v50, 15  ;;  %vm1310_vm7 = vcmp.lt.s32.totalorder %v3065_v35, 115  ;;  %v1272_v45 = vsel %vm1271_vm8, %v3665_v30, %v3681_v0 }
 0x122   :  { %v1200_v52 = vsel %vm4368_vm1, %v1194_v56, 0.0  ;;  %v1138_v44 = vadd.f32 %v1136_v40, %v1099_v63  ;;  %v1160_v46 = vsel %vm4369_vm15, %v1154_v15, %v1152_v25  ;;  %vm4370_vm2 = vcmp.lt.s32.totalorder %v3084_v50, 14 }
 0x123   :  { %v3691_v11 = vpop.permute.xlu1 %1390  ;;  %v1239_v47 = vsel %vm4370_vm2, %v1233_v28, 0.0  ;;  %vm1351_vm3 = vcmp.lt.s32.totalorder %v3065_v35, 114  ;;  %v1195_v10 = vsel %vm1193_vm11, %v3671_v24, %v3642_v55  ;;  %v1202_v16 = vadd.f32 %v1200_v52, %v1163_v51 }
 0x124   :  { %v1311_v48 = vsel %vm1310_vm7, %v3675_v41, %v3685_v5  ;;  %v1278_v54 = vsel %vm91_vm12, %v1272_v45, 0.0  ;;  %vm1392_vm9 = vcmp.lt.s32.totalorder %v3065_v35, 113  ;;  %v1164_v31 = vadd.f32 %v1160_v46, %v1138_v44 }
 0x125   :  { %v3697_v17 = vpop.permute.xlu0 %1468  ;;  %v1234_v2 = vsel %vm1232_vm10, %v3678_v62, %v3656_v9  ;;  %v1241_v8 = vadd.f32 %v1239_v47, %v1202_v16  ;;  %v1352_v55 = vsel %vm1351_vm3, %v3683_v3, %v3689_v38  ;;  %v1201_v26 = vsel %vm88_vm14, %v1195_v10, 0.0 }
 0x126   :  { %vm76_vm11 = vcmp.lt.s32.totalorder %v3081_v49, 240  ;;  %v1319_v1 = vsel %vm81_vm6, %v1311_v48, 0.0  ;;  %v1273_v9 = vsel %vm1271_vm8, %v3681_v0, %v3665_v30  ;;  %v1393_v34 = vsel %vm1392_vm9, %v3687_v37, %v3691_v11 }
 0x127   :  { %v3695_v59 = vpop.permute.xlu1 %1431  ;;  %v1280_v62 = vadd.f32 %v1278_v54, %v1241_v8  ;;  %v1240_v36 = vsel %vm90_vm0, %v1234_v2, 0.0  ;;  %v1360_v19 = vsel %vm83_vm4, %v1352_v55, 0.0  ;;  %v1203_v42 = vadd.f32 %v1201_v26, %v1164_v31 }
 0x128   :  { %vm4371_vm10 = vcmp.ge.s32.totalorder %v3091_v57, 3  ;;  %v1312_v30 = vsel %vm1310_vm7, %v3685_v5, %v3675_v41  ;;  %v1279_v12 = vsel %vm92_vm13, %v1273_v9, 0.0  ;;  %v1401_v13 = vsel %vm4325_vm5, %v1393_v34, 0.0 }
 0x129   :  { %v3703_v22 = vpop.permute.xlu0 %1509  ;;  %vm3959_vm1 = vmand %vm76_vm11, %vm4371_vm10  ;;  %v1321_v0 = vadd.f32 %v1319_v1, %v1280_v62  ;;  %vm1472_vm8 = vcmp.lt.s32.totalorder %v3065_v35, 111  ;;  %v1242_v29 = vadd.f32 %v1240_v36, %v1203_v42  ;;  %vm4374_vm15 = vcmp.ge.s32.totalorder %v3091_v57, 2 }
 0x12a   :  { %vm3976_vm2 = vmand %vm76_vm11, %vm4374_vm15  ;;  %v1353_v41 = vsel %vm1351_vm3, %v3689_v38, %v3683_v3  ;;  %vm1433_vm7 = vcmp.lt.s32.totalorder %v3065_v35, 112  ;;  %v1320_v25 = vsel %vm3959_vm1, %v1312_v30, 0.0  ;;  %vm1513_vm10 = vcmp.lt.s32.totalorder %v3065_v35, 110 }
 0x12b   :  { %v3699_v18 = vpop.permute.xlu1 %1470  ;;  %v1362_v5 = vadd.f32 %v1360_v19, %v1321_v0  ;;  %v1281_v63 = vadd.f32 %v1279_v12, %v1242_v29  ;;  %vm4377_vm15 = vcmp.ge.s32.totalorder %v3091_v57, 1  ;;  %v1394_v3 = vsel %vm1392_vm9, %v3691_v11, %v3687_v37 }
 0x12c   :  { %vm3996_vm5 = vmand %vm76_vm11, %vm4377_vm15  ;;  %v1473_v28 = vsel %vm1472_vm8, %v3697_v17, %v3699_v18  ;;  %v1361_v52 = vsel %vm3976_vm2, %v1353_v41, 0.0  ;;  %v1434_v44 = vsel %vm1433_vm7, %v3693_v14, %v3695_v59  ;;  %vm1554_vm3 = vcmp.lt.s32.totalorder %v3065_v35, 109 }
 0x12d   :  { %v1403_v38 = vadd.f32 %v1401_v13, %v1362_v5  ;;  %v1322_v45 = vadd.f32 %v1320_v25, %v1281_v63  ;;  %v1435_v46 = vsel %vm1433_vm7, %v3695_v59, %v3693_v14  ;;  %v1402_v11 = vsel %vm3996_vm5, %v1394_v3, 0.0  ;;  %vm4028_vm2 = vmand %vm76_vm11, %vm88_vm14 }
 0x12e   :  { %vm4380_vm9 = vcmp.lt.s32.totalorder %v3084_v50, 15  ;;  %vm1595_vm1 = vcmp.lt.s32.totalorder %v3065_v35, 99  ;;  %v1474_v59 = vsel %vm1472_vm8, %v3699_v18, %v3697_v17  ;;  %v1441_v31 = vsel %vm76_vm11, %v1435_v46, 0.0  ;;  %vm4053_vm8 = vmand %vm76_vm11, %vm90_vm0 }
 0x12f   :  { %v3701_v20 = vpop.permute.xlu1 %1511  ;;  %v3708_v27 = vpop.permute.xlu0 %1550  ;;  %v1481_v47 = vsel %vm4380_vm9, %v1473_v28, 0.0  ;;  %v1363_v10 = vadd.f32 %v1361_v52, %v1322_v45  ;;  %v1442_v16 = vadd.f32 %v1434_v44, %v1403_v38  ;;  %vm4383_vm5 = vcmp.lt.s32.totalorder %v3084_v50, 14 }
 0x130   :  { %v1514_v37 = vsel %vm1513_vm10, %v3703_v22, %v3701_v20  ;;  %vm1636_vm7 = vcmp.lt.s32.totalorder %v3065_v35, 98  ;;  %v1515_v18 = vsel %vm1513_vm10, %v3701_v20, %v3703_v22  ;;  %v1482_v9 = vsel %vm4028_vm2, %v1474_v59, 0.0  ;;  %vm4075_vm10 = vmand %vm76_vm11, %vm92_vm13 }
 0x131   :  { %v1522_v2 = vsel %vm4383_vm5, %v1514_v37, 0.0  ;;  %v1404_v55 = vadd.f32 %v1402_v11, %v1363_v10  ;;  %v1483_v26 = vadd.f32 %v1481_v47, %v1442_v16  ;;  %vm78_vm15 = vcmp.lt.s32.totalorder %v3081_v49, 224 }
 0x132   :  { %vm1677_vm9 = vcmp.lt.s32.totalorder %v3065_v35, 97  ;;  %v1523_v42 = vsel %vm4053_vm8, %v1515_v18, 0.0  ;;  %vm4388_vm11 = vcmp.ge.s32.totalorder %v3091_v57, 3  ;;  %vm4394_vm5 = vcmp.ge.s32.totalorder %v3084_v50, 1 }
 0x133   :  { %v3706_v23 = vpop.permute.xlu1 %1552  ;;  %v1443_v34 = vadd.f32 %v1441_v31, %v1404_v55  ;;  %v1524_v36 = vadd.f32 %v1522_v2, %v1483_v26  ;;  %vm4095_vm2 = vmand %vm78_vm15, %vm4388_vm11  ;;  %vm1718_vm8 = vcmp.lt.s32.totalorder %v3065_v35, 96  ;;  %vm4395_vm11 = vcmp.ge.s32.totalorder %v3091_v57, 1 }
 0x134   :  { %v1555_v48 = vsel %vm1554_vm3, %v3708_v27, %v3706_v23  ;;  %v1556_v22 = vsel %vm1554_vm3, %v3706_v23, %v3708_v27  ;;  %vm4391_vm3 = vcmp.ge.s32.totalorder %v3091_v57, 2 }
 0x135   :  { %v1563_v62 = vsel %vm91_vm12, %v1555_v48, 0.0  ;;  %v1484_v30 = vadd.f32 %v1482_v9, %v1443_v34  ;;  %v1564_v29 = vsel %vm4075_vm10, %v1556_v22, 0.0  ;;  %vm1757_vm10 = vcmp.lt.s32.totalorder %v3065_v35, 95 }
 0x136   :  { %v1565_v0 = vadd.f32 %v1563_v62, %v1524_v36 }
 0x137   :  { %v3741_v33 = vpop.permute.xlu1 %1593  ;;  %v1525_v5 = vadd.f32 %v1523_v42, %v1484_v30 }
 0x139   :  { %v1566_v3 = vadd.f32 %v1564_v29, %v1525_v5 }
 0x13a   :  { %v3751_v60 = vpop.permute.xlu0 %1591 }
 0x13b   :  { %v1596_v1 = vsel %vm1595_vm1, %v3751_v60, %v3741_v33  ;;  %v1597_v23 = vsel %vm1595_vm1, %v3741_v33, %v3751_v60  ;;  %vm4117_vm1 = vmand %vm78_vm15, %vm4391_vm3 }
 0x13c   :  { %v1604_v4 = vsel %vm81_vm6, %v1596_v1, 0.0  ;;  %v1605_v63 = vsel %vm4095_vm2, %v1597_v23, 0.0  ;;  %vm4135_vm3 = vmand %vm78_vm15, %vm4395_vm11  ;;  %vm80_vm11 = vcmp.lt.s32.totalorder %v3081_v49, 208 }
 0x13d   :  { %v1606_v25 = vadd.f32 %v1604_v4, %v1565_v0  ;;  %v1607_v52 = vadd.f32 %v1605_v63, %v1566_v3  ;;  %vm4161_vm2 = vmand %vm78_vm15, %vm88_vm14 }
 0x140   :  { %v3790_v43 = vpop.permute.xlu1 %1634 }
 0x142   :  { %v3812_v53 = vpop.permute.xlu0 %1632 }
 0x143   :  { %v1637_v19 = vsel %vm1636_vm7, %v3812_v53, %v3790_v43  ;;  %v1638_v60 = vsel %vm1636_vm7, %v3790_v43, %v3812_v53  ;;  %vm1798_vm7 = vcmp.lt.s32.totalorder %v3065_v35, 94 }
 0x144   :  { %v1645_v56 = vsel %vm83_vm4, %v1637_v19, 0.0  ;;  %v1646_v53 = vsel %vm4117_vm1, %v1638_v60, 0.0  ;;  %vm4400_vm1 = vcmp.lt.s32.totalorder %v3084_v50, 15 }
 0x145   :  { %v1647_v38 = vadd.f32 %v1645_v56, %v1606_v25  ;;  %v1648_v47 = vadd.f32 %v1646_v53, %v1607_v52 }
 0x147   :  { %v3844_v7 = vpop.permute.xlu1 %1675 }
 0x148   :  { %v3854_v6 = vpop.permute.xlu0 %1673 }
 0x149   :  { %v1678_v27 = vsel %vm1677_vm9, %v3854_v6, %v3844_v7  ;;  %v1679_v43 = vsel %vm1677_vm9, %v3844_v7, %v3854_v6  ;;  %vm1839_vm9 = vcmp.lt.s32.totalorder %v3065_v35, 93 }
 0x14a   :  { %v1686_v51 = vsel %vm4394_vm5, %v1678_v27, 0.0  ;;  %v1687_v11 = vsel %vm4135_vm3, %v1679_v43, 0.0  ;;  %vm1880_vm5 = vcmp.lt.s32.totalorder %v3065_v35, 83  ;;  %vm1921_vm3 = vcmp.lt.s32.totalorder %v3065_v35, 82 }
 0x14b   :  { %v1688_v44 = vadd.f32 %v1686_v51, %v1647_v38  ;;  %v1689_v59 = vadd.f32 %v1687_v11, %v1648_v47 }
 0x14d   :  { %v3877_v32 = vpop.permute.xlu1 %1716 }
 0x14e   :  { %v3883_v21 = vpop.permute.xlu0 %1714 }
 0x14f   :  { %v1720_v45 = vsel %vm1718_vm8, %v3877_v32, %v3883_v21  ;;  %v1719_v7 = vsel %vm1718_vm8, %v3883_v21, %v3877_v32  ;;  %vm4182_vm8 = vmand %vm78_vm15, %vm90_vm0 }
 0x150   :  { %v1726_v21 = vsel %vm78_vm15, %v1720_v45, 0.0  ;;  %v1727_v48 = vadd.f32 %v1719_v7, %v1688_v44 }
 0x151   :  { %v1728_v17 = vadd.f32 %v1726_v21, %v1689_v59 }
 0x153   :  { %v3900_v61 = vpop.permute.xlu1 %1755 }
 0x154   :  { %v3905_v39 = vpop.permute.xlu0 %1753 }
 0x155   :  { %v1758_v46 = vsel %vm1757_vm10, %v3905_v39, %v3900_v61  ;;  %v1759_v16 = vsel %vm1757_vm10, %v3900_v61, %v3905_v39  ;;  %vm4403_vm10 = vcmp.lt.s32.totalorder %v3084_v50, 14 }
 0x156   :  { %v1766_v14 = vsel %vm4400_vm1, %v1758_v46, 0.0  ;;  %v1767_v2 = vsel %vm4161_vm2, %v1759_v16, 0.0  ;;  %vm4406_vm2 = vcmp.ge.s32.totalorder %v3091_v57, 3  ;;  %vm4409_vm1 = vcmp.ge.s32.totalorder %v3091_v57, 2 }
 0x157   :  { %v1768_v18 = vadd.f32 %v1766_v14, %v1727_v48  ;;  %v1769_v36 = vadd.f32 %v1767_v2, %v1728_v17 }
 0x158   :  { %v3934_v24 = vpop.permute.xlu1 %1796 }
 0x159   :  { %v3941_v58 = vpop.permute.xlu0 %1794 }
 0x15a   :  { %v1799_v32 = vsel %vm1798_vm7, %v3941_v58, %v3934_v24  ;;  %v1800_v39 = vsel %vm1798_vm7, %v3934_v24, %v3941_v58  ;;  %vm4204_vm7 = vmand %vm78_vm15, %vm92_vm13  ;;  %vm1962_vm15 = vcmp.lt.s32.totalorder %v3065_v35, 81 }
 0x15b   :  { %v1807_v55 = vsel %vm4403_vm10, %v1799_v32, 0.0  ;;  %v1808_v62 = vsel %vm4182_vm8, %v1800_v39, 0.0  ;;  %vm4244_vm8 = vmand %vm80_vm11, %vm4409_vm1 }
 0x15c   :  { %v1809_v20 = vadd.f32 %v1807_v55, %v1768_v18  ;;  %v1810_v4 = vadd.f32 %v1808_v62, %v1769_v36  ;;  %vm2128_vm1 = vmand %vm80_vm11, %vm92_vm13 }
 0x15e   :  { %v3985_v40 = vpop.permute.xlu1 %1837 }
 0x15f   :  { %v3990_v15 = vpop.permute.xlu0 %1835 }
 0x160   :  { %v1840_v31 = vsel %vm1839_vm9, %v3990_v15, %v3985_v40  ;;  %v1841_v58 = vsel %vm1839_vm9, %v3985_v40, %v3990_v15  ;;  %vm4225_vm9 = vmand %vm80_vm11, %vm4406_vm2 }
 0x161   :  { %v1848_v34 = vsel %vm91_vm12, %v1840_v31, 0.0  ;;  %v1849_v19 = vsel %vm4204_vm7, %v1841_v58, 0.0  ;;  %vm2083_vm7 = vcmp.lt.s32.totalorder %v3065_v35, 78  ;;  %vm4294_vm2 = vmand %vm80_vm11, %vm90_vm0  ;;  %vm2124_vm0 = vcmp.lt.s32.totalorder %v3065_v35, 77 }
 0x162   :  { %v1850_v30 = vadd.f32 %v1848_v34, %v1809_v20  ;;  %v1851_v29 = vadd.f32 %v1849_v19, %v1810_v4 }
 0x164   :  { %v4040_v54 = vpop.permute.xlu1 %1878 }
 0x165   :  { %v4047_v8 = vpop.permute.xlu0 %1876 }
 0x166   :  { %v1881_v1 = vsel %vm1880_vm5, %v4047_v8, %v4040_v54  ;;  %v1882_v15 = vsel %vm1880_vm5, %v4040_v54, %v4047_v8  ;;  %vm4412_vm5 = vcmp.ge.s32.totalorder %v3091_v57, 1 }
 0x167   :  { %v1889_v42 = vsel %vm81_vm6, %v1881_v1, 0.0  ;;  %v1890_v12 = vsel %vm4225_vm9, %v1882_v15, 0.0  ;;  %vm2003_vm6 = vcmp.lt.s32.totalorder %v3065_v35, 80  ;;  %vm4262_vm10 = vmand %vm80_vm11, %vm4412_vm5  ;;  %vm4421_vm9 = vcmp.lt.s32.totalorder %v3084_v50, 14 }
 0x168   :  { %v1891_v56 = vadd.f32 %v1889_v42, %v1850_v30  ;;  %v1892_v60 = vadd.f32 %v1890_v12, %v1851_v29 }
 0x16a   :  { %v4107_v13 = vpop.permute.xlu1 %1919 }
 0x16b   :  { %v1918_v41 = vpop.permute.xlu0 %1917 }
 0x16c   :  { %v1922_v22 = vsel %vm1921_vm3, %v1918_v41, %v4107_v13  ;;  %v1923_v54 = vsel %vm1921_vm3, %v4107_v13, %v1918_v41  ;;  %vm2042_vm3 = vcmp.lt.s32.totalorder %v3065_v35, 79 }
 0x16d   :  { %v1930_v23 = vsel %vm83_vm4, %v1922_v22, 0.0  ;;  %v1931_v25 = vsel %vm4244_vm8, %v1923_v54, 0.0  ;;  %vm4415_vm4 = vcmp.ge.s32.totalorder %v3084_v50, 1 }
 0x16e   :  { %v1932_v63 = vadd.f32 %v1930_v23, %v1891_v56  ;;  %v1933_v38 = vadd.f32 %v1931_v25, %v1892_v60 }
 0x170   :  { %v1961_v37 = vpop.permute.xlu1 %1960 }
 0x171   :  { %v1959_v6 = vpop.permute.xlu0 %1958 }
 0x172   :  { %v1963_v8 = vsel %vm1962_vm15, %v1959_v6, %v1961_v37  ;;  %v1964_v41 = vsel %vm1962_vm15, %v1961_v37, %v1959_v6  ;;  %vm4282_vm15 = vmand %vm80_vm11, %vm88_vm14  ;;  %vm4420_vm14 = vcmp.lt.s32.totalorder %v3084_v50, 15 }
 0x173   :  { %v1971_v33 = vsel %vm4415_vm4, %v1963_v8, 0.0  ;;  %v1972_v3 = vsel %vm4262_vm10, %v1964_v41, 0.0 }
 0x174   :  { %v2002_v26 = vpop.permute.xlu1 %2001  ;;  %v1973_v28 = vadd.f32 %v1971_v33, %v1932_v63  ;;  %v1974_v11 = vadd.f32 %v1972_v3, %v1933_v38 }
 0x175   :  { %v2000_v9 = vpop.permute.xlu0 %1999 }
 0x176   :  { %v2005_v51 = vsel %vm2003_vm6, %v2002_v26, %v2000_v9  ;;  %v2004_v45 = vsel %vm2003_vm6, %v2000_v9, %v2002_v26 }
 0x177   :  { %v2011_v46 = vsel %vm80_vm11, %v2005_v51, 0.0  ;;  %v2012_v32 = vadd.f32 %v2004_v45, %v1973_v28 }
 0x178   :  { %v2041_v27 = vpop.permute.xlu1 %2040  ;;  %v2013_v21 = vadd.f32 %v2011_v46, %v1974_v11 }
 0x179   :  { %v2039_v5 = vpop.permute.xlu0 %2038 }
 0x17a   :  { %v2043_v53 = vsel %vm2042_vm3, %v2039_v5, %v2041_v27  ;;  %v2044_v52 = vsel %vm2042_vm3, %v2041_v27, %v2039_v5 }
 0x17b   :  { %v2051_v10 = vsel %vm4420_vm14, %v2043_v53, 0.0  ;;  %v2052_v16 = vsel %vm4282_vm15, %v2044_v52, 0.0 }
 0x17c   :  { %v2082_v44 = vpop.permute.xlu1 %2081  ;;  %v2053_v48 = vadd.f32 %v2051_v10, %v2012_v32  ;;  %v2054_v61 = vadd.f32 %v2052_v16, %v2013_v21 }
 0x17d   :  { %v2080_v37 = vpop.permute.xlu0 %2079 }
 0x17e   :  { %v2084_v6 = vsel %vm2083_vm7, %v2080_v37, %v2082_v44  ;;  %v2085_v47 = vsel %vm2083_vm7, %v2082_v44, %v2080_v37 }
 0x17f   :  { %v2092_v14 = vsel %vm4421_vm9, %v2084_v6, 0.0  ;;  %v2093_v59 = vsel %vm4294_vm2, %v2085_v47, 0.0 }
 0x180   :  { %v2123_v39 = vpop.permute.xlu1 %2122  ;;  %v2094_v2 = vadd.f32 %v2092_v14, %v2053_v48  ;;  %v2095_v55 = vadd.f32 %v2093_v59, %v2054_v61 }
 0x181   :  { %v2121_v31 = vpop.permute.xlu0 %2120 }
 0x182   :  { %v2125_v26 = vsel %vm2124_vm0, %v2121_v31, %v2123_v39  ;;  %v2126_v17 = vsel %vm2124_vm0, %v2123_v39, %v2121_v31 }
 0x183   :  { %v2133_v18 = vsel %vm91_vm12, %v2125_v26, 0.0  ;;  %v2134_v24 = vsel %vm2128_vm1, %v2126_v17, 0.0 }
 0x184   :  { %v2135_v58 = vadd.f32 %v2133_v18, %v2094_v2  ;;  %v2136_v1 = vadd.f32 %v2134_v24, %v2095_v55 }
 0x186   :  { %v2274_v35 = vmul.f32 -1.442695, %v2135_v58  ;;  %v2275_v9 = vmul.f32 -1.442695, %v2136_v1 }
 0x188   :  { %2332 = vpow2.f32 %v2274_v35 }
 0x189   :  { %2334 = vpow2.f32 %v2275_v9 }
 0x195   :  { %v2333_v62 = vpop.eup %2332 }
 0x196   :  { %v2335_v57 = vpop.eup %2334  ;;  %v2143_v34 = vadd.f32 1.0, %v2333_v62 }
 0x197   :  { %v2144_v49 = vadd.f32 1.0, %v2335_v57 }
 0x198   :  { %2336 = vrcp.f32 %v2143_v34 }
 0x199   :  { %2338 = vrcp.f32 %v2144_v49 }
 0x1a5   :  { %v2337_v36 = vpop.eup %2336 }
 0x1a6   :  { %v2339_v20 = vpop.eup %2338 }
 0x1a7   :  { %v2151_v40 = vcombine.low %v2337_v36, %v2339_v20 }
 0x1a9   :  { %2276 = vst.sshfl [vmem:[#allocation9] sm:$0x33 pattern:$0x76325410] %v2151_v40 }
 0x1aa   :  { %2383 = shalt.err (!%p2380_p0)
}
 0x1ab   :  { %2170 = dma.vmem_to_hbm [thread:$0]  %s2168_s18, 64, %s4318_s2, [#allocation6]  }
 0x1ac   :  { %2396 = dma.done.wait [#allocation6], 64  }
 0x1ad   :  { %2397 = vsyncadd [#allocation6], 4294967232 }
 0x1ae   :  { %2174 = vsyncpa [#allocation5], 1 }
 0x1af   :  { %2175 = vsyncpa [#allocation6], 1 }
 0x1b0   :  { %2176 = vsyncpa [#allocation7], 1 }

</bundles_post_ra>
